<compile_context>
chip_gen: v6e
topology: v6e:2x2x1
jax: 0.10.0
libtpu: 0.0.40
codegen_flags: <defaults>
</compile_context>

<pallas_src>
import functools

import jax
import jax.numpy as jnp
from jax.experimental import pallas as pl
from jax.experimental.pallas import tpu as pltpu


def _round_up(x, m):
    return ((x + m - 1) // m) * m


# ----------------------------------------------------------------------------
# Pallas kernel: one grid step == one chunk of `time_chunk` LSTM timesteps.
# ----------------------------------------------------------------------------
def _lstm_proj_kernel(maxlen_ref,     # (nb,)         i32  SMEM scalar prefetch
                      lengths_ref,    # (bt, 1)       i32  per-row lengths
                      x_ref,          # (bt, Tc, Din) f32  raw inputs (chunk)
                      h0_ref,         # (bt, H)       f32  initial hidden
                      c0_ref,         # (bt, C)       f32  initial memory
                      wi_ref,         # (Din, 4C)     mm   input_linearity.weight^T (gate-permuted)
                      ws_ref,         # (H, 4C)       mm   state_linearity.weight^T (gate-permuted)
                      bias_ref,       # (1, 4C)       f32  state_linearity.bias (gate-permuted)
                      wp_ref,         # (C, H)        mm   state_projection.weight^T
                      drop_ref,       # (bt, H)       f32  recurrent dropout mask
                      out_ref,        # (bt, Tc, H)   f32  per-step outputs
                      hfin_ref,       # (bt, H)       f32  running/final hidden (resident)
                      cfin_ref,       # (bt, C)       f32  running/final memory (resident)
                      gx_ref,         # (bt, Tc, 4C)  f32  scratch: fused input projection
                      *,
                      cell_size,
                      time_chunk,
                      num_chunks,
                      go_forward,
                      memory_cell_clip_value,
                      state_projection_clip_value,
                      matmul_dtype):
    b_idx = pl.program_id(0)
    c_idx = pl.program_id(1)          # sequential position along the time axis

    # Seed the resident recurrent state from the initial state on the first
    # time chunk of each batch tile.
    @pl.when(c_idx == 0)
    def _():
        hfin_ref[...] = h0_ref[...]
        cfin_ref[...] = c0_ref[...]

    C = cell_size
    Tc = time_chunk
    chunk = c_idx if go_forward else num_chunks - 1 - c_idx
    t_base = chunk * Tc
    tile_max = maxlen_ref[b_idx]      # longest sequence in this batch tile

    # Chunks entirely past this tile's longest sequence do no compute; they
    # only emit the zeros the module contract requires (state is untouched).
    @pl.when(t_base >= tile_max)
    def _():
        out_ref[...] = jnp.zeros_like(out_ref)

    @pl.when(t_base < tile_max)
    def _():
        bt, _, din = x_ref.shape

        # ---- fused input projection for the whole chunk: one MXU matmul ----
        # (bt, Tc, Din) -> (bt*Tc, Din) is layout-free because Tc % 8 == 0;
        # cast AFTER the reshape so the collapse happens on the f32 layout.
        x2 = x_ref[...].reshape(bt * Tc, din).astype(matmul_dtype)
        gx = jnp.dot(x2, wi_ref[...], preferred_element_type=jnp.float32)
        gx = gx + bias_ref[...]                       # fold state bias once
        # Rows are batch-major; lay them into a (bt, Tc, 4C) scratch with
        # static per-row-group stores (avoids a rank-expanding reshape) so
        # each timestep reloads only its own (bt, 4C) slice.
        for b in range(bt):
            gx_ref[b] = gx[b * Tc:(b + 1) * Tc, :]

        lengths = lengths_ref[...]                    # (bt, 1) i32
        drop = drop_ref[...]                          # (bt, H)
        w_state = ws_ref[...]                         # (H, 4C)
        w_proj = wp_ref[...]                          # (C, H)

        h = hfin_ref[...]                             # (bt, H) f32
        c = cfin_ref[...]                             # (bt, C) f32

        steps = range(Tc) if go_forward else range(Tc - 1, -1, -1)
        for lt in steps:                              # capped static unroll
            t = t_base + lt

            # Pre-activations: fused input projection (from scratch) + the
            # recurrent projection (bf16 operands, f32 accumulation).
            gates = gx_ref[:, lt, :] + jnp.dot(
                h.astype(matmul_dtype), w_state,
                preferred_element_type=jnp.float32)   # (bt, 4C)

            # Gate order is [input, forget, output | tanh]: one sigmoid over a
            # contiguous 3C slab + one tanh over the trailing C block.
            sig = jax.nn.sigmoid(gates[:, 0:3 * C])
            input_gate = sig[:, 0 * C:1 * C]
            forget_gate = sig[:, 1 * C:2 * C]
            output_gate = sig[:, 2 * C:3 * C]
            memory_init = jnp.tanh(gates[:, 3 * C:4 * C])

            memory = input_gate * memory_init + forget_gate * c
            # Python truthiness matches the torch module: 0.0 disables clip.
            if memory_cell_clip_value:
                memory = jnp.clip(memory, -memory_cell_clip_value,
                                  memory_cell_clip_value)

            pre_proj = output_gate * jnp.tanh(memory)                 # (bt, C)
            ts_out = jnp.dot(pre_proj.astype(matmul_dtype), w_proj,
                             preferred_element_type=jnp.float32)      # (bt, H)
            if state_projection_clip_value:
                ts_out = jnp.clip(ts_out, -state_projection_clip_value,
                                  state_projection_clip_value)
            ts_out = ts_out * drop

            # Rows whose sequence is over carry state and emit exact zeros.
            active = lengths > t                                      # (bt, 1)
            c = jnp.where(active, memory, c)
            h = jnp.where(active, ts_out, h)
            out_ref[:, lt, :] = jnp.where(active, ts_out, 0.0)

        hfin_ref[...] = h
        cfin_ref[...] = c


# ----------------------------------------------------------------------------
# Wrapper: fused input projection, fixed time grid, device-gated parallelism.
# ----------------------------------------------------------------------------
def lstm_cell_with_projection(inputs,            # (B, T, input_size) float32
                              batch_lengths,     # (B,) ints / int array
                              params,            # dict of torch-shaped weights
                              *,
                              go_forward=True,
                              memory_cell_clip_value=None,
                              state_projection_clip_value=None,
                              initial_state=None,
                              dropout_mask=None,
                              time_chunk=8,
                              use_bf16=True):
    B, T, Din = inputs.shape
    w_input = params["w_input"]       # (4C, Din)
    w_state = params["w_state"]       # (4C, H)
    b_state = params["b_state"]       # (4C,)
    w_proj = params["w_proj"]         # (H, C)
    C = w_input.shape[0] // 4
    H = w_proj.shape[0]
    mdt = jnp.bfloat16 if use_bf16 else jnp.float32
    # Best performance when C % 32 == 0 (lane-aligned gate slabs) and
    # H % 128 == 0 (lane-dense output rows); correctness holds regardless.

    # Device-generation gating: only v7x has 2 TensorCores per chip, so only
    # there is a batch-parallel grid axis worth creating.  v7x also only has
    # 64 MiB of VMEM per TensorCore, so cap the scoped VMEM request there.
    kind = jax.devices()[0].device_kind.lower()
    is_v7 = "v7" in kind
    nb = 2 if (is_v7 and B % 16 == 0) else 1
    bt = B // nb
    vmem_limit = (48 if is_v7 else 64) * 1024 * 1024

    # Fixed time grid: depends only on the static padded length T, never on
    # runtime batch_lengths, so changing lengths never triggers a recompile.
    Tc = _round_up(max(1, int(time_chunk)), 8)
    num_chunks = max(1, -(-T // Tc))
    t_pad = num_chunks * Tc

    x_in = inputs
    if t_pad > T:
        x_in = jnp.pad(inputs, ((0, 0), (0, t_pad - T), (0, 0)))

    lengths = jnp.asarray(batch_lengths, jnp.int32).reshape(B)
    lengths_col = lengths.reshape(B, 1)
    # Per-batch-tile max length (scalar-prefetched): each TensorCore skips the
    # compute of chunks that are fully past its own longest sequence.
    tile_max = jnp.max(lengths.reshape(nb, bt), axis=1).astype(jnp.int32)

    if initial_state is None:
        h0 = jnp.zeros((B, H), jnp.float32)
        c0 = jnp.zeros((B, C), jnp.float32)
    else:
        h0 = jnp.asarray(initial_state[0], jnp.float32).reshape(B, H)
        c0 = jnp.asarray(initial_state[1], jnp.float32).reshape(B, C)

    if dropout_mask is None:
        dropout_mask = jnp.ones((B, H), jnp.float32)
    else:
        dropout_mask = jnp.asarray(dropout_mask, jnp.float32).reshape(B, H)

    # Permute gate blocks from torch order [i, f, g, o] to [i, f, o, g] so the
    # three sigmoid gates are contiguous along the 4C axis.
    perm = jnp.concatenate([
        jnp.arange(0 * C, 2 * C),       # input, forget
        jnp.arange(3 * C, 4 * C),       # output
        jnp.arange(2 * C, 3 * C),       # memory init (tanh)
    ])
    wi_t = jnp.transpose(w_input[perm, :]).astype(mdt)        # (Din, 4C)
    ws_t = jnp.transpose(w_state[perm, :]).astype(mdt)        # (H, 4C)
    bias = b_state[perm].astype(jnp.float32).reshape(1, 4 * C)
    wp_t = jnp.transpose(w_proj).astype(mdt)                  # (C, H)

    if go_forward:
        t_map = lambda b, c, ml: (b, c, 0)
    else:
        t_map = lambda b, c, ml: (b, num_chunks - 1 - c, 0)
    b_map = lambda b, c, ml: (b, 0)
    const = lambda b, c, ml: (0, 0)

    kernel = functools.partial(
        _lstm_proj_kernel,
        cell_size=C,
        time_chunk=Tc,
        num_chunks=num_chunks,
        go_forward=go_forward,
        memory_cell_clip_value=memory_cell_clip_value,
        state_projection_clip_value=state_projection_clip_value,
        matmul_dtype=mdt,
    )

    out_pad, h_fin, c_fin = pl.pallas_call(
        kernel,
        out_shape=(
            jax.ShapeDtypeStruct((B, t_pad, H), jnp.float32),
            jax.ShapeDtypeStruct((B, H), jnp.float32),
            jax.ShapeDtypeStruct((B, C), jnp.float32),
        ),
        grid_spec=pltpu.PrefetchScalarGridSpec(
            num_scalar_prefetch=1,                   # per-tile max lengths
            grid=(nb, num_chunks),
            in_specs=[
                pl.BlockSpec((bt, 1), b_map),        # lengths
                pl.BlockSpec((bt, Tc, Din), t_map),  # raw inputs (chunk)
                pl.BlockSpec((bt, H), b_map),        # h0
                pl.BlockSpec((bt, C), b_map),        # c0
                # TODO(synk): pipeline_mode=pl.Buffered(1) on the four
                # constant-index specs below would halve their VMEM footprint
                # (needed to fit full ELMo weights on v7x); left at default
                # double-buffering here for portability.
                pl.BlockSpec((Din, 4 * C), const),   # W_input^T (resident)
                pl.BlockSpec((H, 4 * C), const),     # W_state^T (resident)
                pl.BlockSpec((1, 4 * C), const),     # bias      (resident)
                pl.BlockSpec((C, H), const),         # W_proj^T  (resident)
                pl.BlockSpec((bt, H), b_map),        # dropout mask
            ],
            out_specs=[
                pl.BlockSpec((bt, Tc, H), t_map),    # per-step outputs
                pl.BlockSpec((bt, H), b_map),        # final hidden (resident)
                pl.BlockSpec((bt, C), b_map),        # final memory (resident)
            ],
            scratch_shapes=[
                pltpu.VMEM((bt, Tc, 4 * C), jnp.float32),  # chunk pre-activations
            ],
        ),
        compiler_params=pltpu.CompilerParams(
            # Time axis must stay "arbitrary": h/c accumulate sequentially.
            dimension_semantics=("parallel", "arbitrary"),
            vmem_limit_bytes=vmem_limit,
        ),
    )(tile_max, lengths_col, x_in, h0, c0, wi_t, ws_t, bias, wp_t, dropout_mask)

    output = out_pad[:, :T, :]
    final_state = (h_fin[None, :, :], c_fin[None, :, :])
    return output, final_state


# ----------------------------------------------------------------------------
# Deterministic parameter init (mirrors reset_parameters: block-orthogonal
# weights, zero bias with forget-gate bias = 1).
# ----------------------------------------------------------------------------
def _block_orthogonal(key, shape, split_sizes, gain=1.0):
    init = jax.nn.initializers.orthogonal(scale=gain)
    out = jnp.zeros(shape, jnp.float32)
    for r in range(0, shape[0], split_sizes[0]):
        for c in range(0, shape[1], split_sizes[1]):
            key, sub = jax.random.split(key)
            block = init(sub, (split_sizes[0], split_sizes[1]), jnp.float32)
            out = out.at[r:r + split_sizes[0], c:c + split_sizes[1]].set(block)
    return out


def init_params(key, input_size, hidden_size, cell_size):
    k1, k2 = jax.random.split(key)
    w_input = _block_orthogonal(k1, (4 * cell_size, input_size),
                                [cell_size, input_size])
    w_state = _block_orthogonal(k2, (4 * cell_size, hidden_size),
                                [cell_size, hidden_size])
    b_state = jnp.zeros((4 * cell_size,), jnp.float32)
    b_state = b_state.at[cell_size:2 * cell_size].set(1.0)   # forget-gate bias
    w_proj = jax.random.normal(jax.random.fold_in(key, 7),
                               (hidden_size, cell_size), jnp.float32) * 0.1
    return {"w_input": w_input, "w_state": w_state,
            "b_state": b_state, "w_proj": w_proj}


# ----------------------------------------------------------------------------
# Pure-JAX reference (same math & same bf16 casts, lax.scan) for correctness.
# ----------------------------------------------------------------------------
def reference_forward(inputs, batch_lengths, params, *, go_forward=True,
                      memory_cell_clip_value=None,
                      state_projection_clip_value=None,
                      dropout_mask=None, use_bf16=True):
    B, T, _ = inputs.shape
    C = params["w_input"].shape[0] // 4
    H = params["w_proj"].shape[0]
    mdt = jnp.bfloat16 if use_bf16 else jnp.float32
    lengths = jnp.asarray([int(v) for v in batch_lengths], jnp.int32)[:, None]
    wi = params["w_input"].T.astype(mdt)       # (Din, 4C)
    ws = params["w_state"].T.astype(mdt)       # (H, 4C)
    wp = params["w_proj"].T.astype(mdt)        # (C, H)
    bias = params["b_state"].astype(jnp.float32)
    drop = (jnp.ones((B, H), jnp.float32) if dropout_mask is None
            else jnp.asarray(dropout_mask, jnp.float32).reshape(B, H))

    def step(carry, s):
        h, c = carry
        idx = s if go_forward else T - 1 - s
        x_t = inputs[:, idx, :].astype(mdt)
        gates = (jnp.dot(x_t, wi, preferred_element_type=jnp.float32) + bias
                 + jnp.dot(h.astype(mdt), ws, preferred_element_type=jnp.float32))
        i = jax.nn.sigmoid(gates[:, 0 * C:1 * C])
        f = jax.nn.sigmoid(gates[:, 1 * C:2 * C])
        g = jnp.tanh(gates[:, 2 * C:3 * C])
        o = jax.nn.sigmoid(gates[:, 3 * C:4 * C])
        mem = i * g + f * c
        if memory_cell_clip_value:
            mem = jnp.clip(mem, -memory_cell_clip_value, memory_cell_clip_value)
        out = jnp.dot((o * jnp.tanh(mem)).astype(mdt), wp,
                      preferred_element_type=jnp.float32)
        if state_projection_clip_value:
            out = jnp.clip(out, -state_projection_clip_value,
                           state_projection_clip_value)
        out = out * drop
        active = lengths > idx
        c_new = jnp.where(active, mem, c)
        h_new = jnp.where(active, out, h)
        return (h_new, c_new), jnp.where(active, out, 0.0)

    (h_fin, c_fin), outs = jax.lax.scan(
        step, (jnp.zeros((B, H), jnp.float32), jnp.zeros((B, C), jnp.float32)),
        jnp.arange(T))
    if not go_forward:
        outs = outs[::-1]
    return jnp.transpose(outs, (1, 0, 2)), (h_fin[None], c_fin[None])


if __name__ == "__main__":
    key = jax.random.PRNGKey(0)
    batch, seq, input_size, hidden_size, cell_size = 4, 40, 16, 64, 128
    batch_lengths = [18, 13, 8, 1]        # sorted descending, as required

    k_x, k_p = jax.random.split(key)
    inputs = jax.random.normal(k_x, (batch, seq, input_size), jnp.float32)
    params = init_params(k_p, input_size, hidden_size, cell_size)

    for go_forward in (True, False):
        out, (h_fin, c_fin) = lstm_cell_with_projection(
            inputs, batch_lengths, params,
            go_forward=go_forward,
            memory_cell_clip_value=3.0,
            state_projection_clip_value=3.0,
        )
        jax.block_until_ready((out, h_fin, c_fin))

        ref_out, (ref_h, ref_c) = reference_forward(
            inputs, batch_lengths, params,
            go_forward=go_forward,
            memory_cell_clip_value=3.0,
            state_projection_clip_value=3.0,
        )

        assert out.shape == (batch, seq, hidden_size)
        assert h_fin.shape == (1, batch, hidden_size)
        assert c_fin.shape == (1, batch, cell_size)
        assert jnp.allclose(out, ref_out, atol=1e-3, rtol=1e-3), \
            float(jnp.max(jnp.abs(out - ref_out)))
        assert jnp.allclose(h_fin, ref_h, atol=1e-3, rtol=1e-3)
        assert jnp.allclose(c_fin, ref_c, atol=1e-3, rtol=1e-3)

    # TODO(synk): training-time recurrent (variational) dropout mask generation
    # (get_dropout_mask) is left to the caller; the demo runs eval mode (mask
    # of ones), matching self.training == False in the reference module.
    print("KERNEL_OK")
</pallas_src>

<mosaic_0001>
module attributes {stable_mosaic.version = 11 : i64} {
  func.func @_lstm_proj_kernel(%arg0: i32, %arg1: i32, %arg2: memref<1xi32, #tpu.memory_space<smem>>, %arg3: memref<4x1xi32, #tpu.memory_space<vmem>>, %arg4: memref<4x8x16xf32, #tpu.memory_space<vmem>>, %arg5: memref<4x64xf32, #tpu.memory_space<vmem>>, %arg6: memref<4x128xf32, #tpu.memory_space<vmem>>, %arg7: memref<16x512xbf16, #tpu.memory_space<vmem>>, %arg8: memref<64x512xbf16, #tpu.memory_space<vmem>>, %arg9: memref<1x512xf32, #tpu.memory_space<vmem>>, %arg10: memref<128x64xbf16, #tpu.memory_space<vmem>>, %arg11: memref<4x64xf32, #tpu.memory_space<vmem>>, %arg12: memref<4x8x64xf32, #tpu.memory_space<vmem>>, %arg13: memref<4x64xf32, #tpu.memory_space<vmem>>, %arg14: memref<4x128xf32, #tpu.memory_space<vmem>>, %arg15: memref<4x8x512xf32, #tpu.memory_space<vmem>>) attributes {dimension_semantics = [#tpu.dimension_semantics<parallel>, #tpu.dimension_semantics<arbitrary>], iteration_bounds = array<i64: 1, 5>, scalar_prefetch = 1 : i64, scratch_operands = 1 : i64, tpu.core_type = #tpu.core_type<tc>, window_params = [{transform_indices = @transform_0, window_bounds = array<i64: 4, 1>}, {transform_indices = @transform_1, window_bounds = array<i64: 4, 8, 16>}, {transform_indices = @transform_2, window_bounds = array<i64: 4, 64>}, {transform_indices = @transform_3, window_bounds = array<i64: 4, 128>}, {pipeline_mode = #tpu.pipeline_mode<synchronous>, transform_indices = @transform_4, window_bounds = array<i64: 16, 512>}, {pipeline_mode = #tpu.pipeline_mode<synchronous>, transform_indices = @transform_5, window_bounds = array<i64: 64, 512>}, {pipeline_mode = #tpu.pipeline_mode<synchronous>, transform_indices = @transform_6, window_bounds = array<i64: 1, 512>}, {pipeline_mode = #tpu.pipeline_mode<synchronous>, transform_indices = @transform_7, window_bounds = array<i64: 128, 64>}, {transform_indices = @transform_8, window_bounds = array<i64: 4, 64>}, {transform_indices = @transform_9, window_bounds = array<i64: 4, 8, 64>}, {transform_indices = @transform_10, window_bounds = array<i64: 4, 64>}, {transform_indices = @transform_11, window_bounds = array<i64: 4, 128>}]} {
    %c0_i32 = arith.constant 0 : i32
    %0 = arith.cmpi eq, %arg1, %c0_i32 : i32
    %1 = arith.extui %0 : i1 to i32
    %c0_i32_0 = arith.constant 0 : i32
    %2 = arith.cmpi ne, %1, %c0_i32_0 : i32
    scf.if %2 {
      %c0 = arith.constant 0 : index
      %c0_3 = arith.constant 0 : index
      %12 = vector.load %arg5[%c0, %c0_3] : memref<4x64xf32, #tpu.memory_space<vmem>>, vector<4x64xf32>
      %c0_4 = arith.constant 0 : index
      %c0_5 = arith.constant 0 : index
      %13 = vector.load %arg13[%c0_4, %c0_5] : memref<4x64xf32, #tpu.memory_space<vmem>>, vector<4x64xf32>
      tpu.vector_store %arg13[%c0_4, %c0_5], %12 {strides = array<i32>} : memref<4x64xf32, #tpu.memory_space<vmem>>, vector<4x64xf32>,
      %c0_6 = arith.constant 0 : index
      %c0_7 = arith.constant 0 : index
      %14 = vector.load %arg6[%c0_6, %c0_7] : memref<4x128xf32, #tpu.memory_space<vmem>>, vector<4x128xf32>
      %c0_8 = arith.constant 0 : index
      %c0_9 = arith.constant 0 : index
      %15 = vector.load %arg14[%c0_8, %c0_9] : memref<4x128xf32, #tpu.memory_space<vmem>>, vector<4x128xf32>
      tpu.vector_store %arg14[%c0_8, %c0_9], %14 {strides = array<i32>} : memref<4x128xf32, #tpu.memory_space<vmem>>, vector<4x128xf32>,
    } else {
    }
    %c8_i32 = arith.constant 8 : i32
    %3 = arith.muli %arg1, %c8_i32 : i32
    %4 = arith.index_cast %arg0 : i32 to index
    %5 = memref.load %arg2[%4] : memref<1xi32, #tpu.memory_space<smem>>
    %6 = arith.cmpi sge, %3, %5 : i32
    %7 = arith.extui %6 : i1 to i32
    %c0_i32_1 = arith.constant 0 : i32
    %8 = arith.cmpi ne, %7, %c0_i32_1 : i32
    scf.if %8 {
      %cst = arith.constant 0.000000e+00 : f32
      %12 = vector.broadcast %cst : f32 to vector<4x8x64xf32>
      %c0 = arith.constant 0 : index
      %c0_3 = arith.constant 0 : index
      %c0_4 = arith.constant 0 : index
      %13 = vector.load %arg12[%c0, %c0_3, %c0_4] : memref<4x8x64xf32, #tpu.memory_space<vmem>>, vector<4x8x64xf32>
      tpu.vector_store %arg12[%c0, %c0_3, %c0_4], %12 {strides = array<i32>} : memref<4x8x64xf32, #tpu.memory_space<vmem>>, vector<4x8x64xf32>,
    } else {
    }
    %9 = arith.cmpi slt, %3, %5 : i32
    %10 = arith.extui %9 : i1 to i32
    %c0_i32_2 = arith.constant 0 : i32
    %11 = arith.cmpi ne, %10, %c0_i32_2 : i32
    scf.if %11 {
      %c0 = arith.constant 0 : index
      %c0_3 = arith.constant 0 : index
      %c0_4 = arith.constant 0 : index
      %12 = vector.load %arg4[%c0, %c0_3, %c0_4] : memref<4x8x16xf32, #tpu.memory_space<vmem>>, vector<4x8x16xf32>
      %13 = vector.shape_cast %12 : vector<4x8x16xf32> to vector<32x16xf32>
      %14 = arith.truncf %13 : vector<32x16xf32> to vector<32x16xbf16>
      %c0_5 = arith.constant 0 : index
      %c0_6 = arith.constant 0 : index
      %15 = vector.load %arg7[%c0_5, %c0_6] : memref<16x512xbf16, #tpu.memory_space<vmem>>, vector<16x512xbf16>
      %cst = arith.constant dense<0.000000e+00> : vector<32x512xf32>
      %16 = tpu.matmul %14, %15, %cst {dimension_numbers = #tpu.dot_dimension_numbers<[1], [0], [0], [1], [0, 0, 1, 1], [], []>} : vector<32x16xbf16>, vector<16x512xbf16>, vector<32x512xf32> -> vector<32x512xf32>
      %c0_7 = arith.constant 0 : index
      %c0_8 = arith.constant 0 : index
      %17 = vector.load %arg9[%c0_7, %c0_8] : memref<1x512xf32, #tpu.memory_space<vmem>>, vector<1x512xf32>
      %18 = vector.broadcast %17 : vector<1x512xf32> to vector<32x512xf32>
      %19 = arith.addf %16, %18 : vector<32x512xf32>
      %20 = vector.extract_strided_slice %19 {offsets = [0, 0], sizes = [8, 512], strides = [1, 1]} : vector<32x512xf32> to vector<8x512xf32>
      %c0_9 = arith.constant 0 : index
      %c0_10 = arith.constant 0 : index
      %c0_11 = arith.constant 0 : index
      %21 = vector.load %arg15[%c0_9, %c0_10, %c0_11] : memref<4x8x512xf32, #tpu.memory_space<vmem>>, vector<1x8x512xf32>
      %22 = vector.shape_cast %21 : vector<1x8x512xf32> to vector<8x512xf32>
      %23 = vector.shape_cast %20 : vector<8x512xf32> to vector<1x8x512xf32>
      tpu.vector_store %arg15[%c0_9, %c0_10, %c0_11], %23 {strides = array<i32>} : memref<4x8x512xf32, #tpu.memory_space<vmem>>, vector<1x8x512xf32>,
      %24 = vector.extract_strided_slice %19 {offsets = [8, 0], sizes = [8, 512], strides = [1, 1]} : vector<32x512xf32> to vector<8x512xf32>
      %c1 = arith.constant 1 : index
      %c0_12 = arith.constant 0 : index
      %c0_13 = arith.constant 0 : index
      %25 = vector.load %arg15[%c1, %c0_12, %c0_13] : memref<4x8x512xf32, #tpu.memory_space<vmem>>, vector<1x8x512xf32>
      %26 = vector.shape_cast %25 : vector<1x8x512xf32> to vector<8x512xf32>
      %27 = vector.shape_cast %24 : vector<8x512xf32> to vector<1x8x512xf32>
      tpu.vector_store %arg15[%c1, %c0_12, %c0_13], %27 {strides = array<i32>} : memref<4x8x512xf32, #tpu.memory_space<vmem>>, vector<1x8x512xf32>,
      %28 = vector.extract_strided_slice %19 {offsets = [16, 0], sizes = [8, 512], strides = [1, 1]} : vector<32x512xf32> to vector<8x512xf32>
      %c2 = arith.constant 2 : index
      %c0_14 = arith.constant 0 : index
      %c0_15 = arith.constant 0 : index
      %29 = vector.load %arg15[%c2, %c0_14, %c0_15] : memref<4x8x512xf32, #tpu.memory_space<vmem>>, vector<1x8x512xf32>
      %30 = vector.shape_cast %29 : vector<1x8x512xf32> to vector<8x512xf32>
      %31 = vector.shape_cast %28 : vector<8x512xf32> to vector<1x8x512xf32>
      tpu.vector_store %arg15[%c2, %c0_14, %c0_15], %31 {strides = array<i32>} : memref<4x8x512xf32, #tpu.memory_space<vmem>>, vector<1x8x512xf32>,
      %32 = vector.extract_strided_slice %19 {offsets = [24, 0], sizes = [8, 512], strides = [1, 1]} : vector<32x512xf32> to vector<8x512xf32>
      %c3 = arith.constant 3 : index
      %c0_16 = arith.constant 0 : index
      %c0_17 = arith.constant 0 : index
      %33 = vector.load %arg15[%c3, %c0_16, %c0_17] : memref<4x8x512xf32, #tpu.memory_space<vmem>>, vector<1x8x512xf32>
      %34 = vector.shape_cast %33 : vector<1x8x512xf32> to vector<8x512xf32>
      %35 = vector.shape_cast %32 : vector<8x512xf32> to vector<1x8x512xf32>
      tpu.vector_store %arg15[%c3, %c0_16, %c0_17], %35 {strides = array<i32>} : memref<4x8x512xf32, #tpu.memory_space<vmem>>, vector<1x8x512xf32>,
      %c0_18 = arith.constant 0 : index
      %c0_19 = arith.constant 0 : index
      %36 = vector.load %arg3[%c0_18, %c0_19] : memref<4x1xi32, #tpu.memory_space<vmem>>, vector<4x1xi32>
      %c0_20 = arith.constant 0 : index
      %c0_21 = arith.constant 0 : index
      %37 = vector.load %arg11[%c0_20, %c0_21] : memref<4x64xf32, #tpu.memory_space<vmem>>, vector<4x64xf32>
      %c0_22 = arith.constant 0 : index
      %c0_23 = arith.constant 0 : index
      %38 = vector.load %arg8[%c0_22, %c0_23] : memref<64x512xbf16, #tpu.memory_space<vmem>>, vector<64x512xbf16>
      %c0_24 = arith.constant 0 : index
      %c0_25 = arith.constant 0 : index
      %39 = vector.load %arg10[%c0_24, %c0_25] : memref<128x64xbf16, #tpu.memory_space<vmem>>, vector<128x64xbf16>
      %c0_26 = arith.constant 0 : index
      %c0_27 = arith.constant 0 : index
      %40 = vector.load %arg13[%c0_26, %c0_27] : memref<4x64xf32, #tpu.memory_space<vmem>>, vector<4x64xf32>
      %c0_28 = arith.constant 0 : index
      %c0_29 = arith.constant 0 : index
      %41 = vector.load %arg14[%c0_28, %c0_29] : memref<4x128xf32, #tpu.memory_space<vmem>>, vector<4x128xf32>
      %c0_i32_30 = arith.constant 0 : i32
      %42 = arith.addi %3, %c0_i32_30 : i32
      %c0_31 = arith.constant 0 : index
      %c0_32 = arith.constant 0 : index
      %c0_33 = arith.constant 0 : index
      %43 = vector.load %arg15[%c0_31, %c0_32, %c0_33] : memref<4x8x512xf32, #tpu.memory_space<vmem>>, vector<4x1x512xf32>
      %44 = vector.shape_cast %43 : vector<4x1x512xf32> to vector<4x512xf32>
      %45 = arith.truncf %40 : vector<4x64xf32> to vector<4x64xbf16>
      %cst_34 = arith.constant dense<0.000000e+00> : vector<4x512xf32>
      %46 = tpu.matmul %45, %38, %cst_34 {dimension_numbers = #tpu.dot_dimension_numbers<[1], [0], [0], [1], [0, 0, 1, 1], [], []>} : vector<4x64xbf16>, vector<64x512xbf16>, vector<4x512xf32> -> vector<4x512xf32>
      %47 = arith.addf %44, %46 : vector<4x512xf32>
      %48 = vector.extract_strided_slice %47 {offsets = [0, 0], sizes = [4, 384], strides = [1, 1]} : vector<4x512xf32> to vector<4x384xf32>
      %49 = arith.negf %48 : vector<4x384xf32>
      %50 = math.exp %49 : vector<4x384xf32>
      %cst_35 = arith.constant 1.000000e+00 : f32
      %51 = vector.broadcast %cst_35 : f32 to vector<4x384xf32>
      %52 = arith.addf %51, %50 : vector<4x384xf32>
      %53 = arith.divf %51, %52 : vector<4x384xf32>
      %54 = vector.extract_strided_slice %53 {offsets = [0, 0], sizes = [4, 128], strides = [1, 1]} : vector<4x384xf32> to vector<4x128xf32>
      %55 = vector.extract_strided_slice %53 {offsets = [0, 128], sizes = [4, 128], strides = [1, 1]} : vector<4x384xf32> to vector<4x128xf32>
      %56 = vector.extract_strided_slice %53 {offsets = [0, 256], sizes = [4, 128], strides = [1, 1]} : vector<4x384xf32> to vector<4x128xf32>
      %57 = vector.extract_strided_slice %47 {offsets = [0, 384], sizes = [4, 128], strides = [1, 1]} : vector<4x512xf32> to vector<4x128xf32>
      %58 = math.tanh %57 : vector<4x128xf32>
      %59 = arith.mulf %54, %58 : vector<4x128xf32>
      %60 = arith.mulf %55, %41 : vector<4x128xf32>
      %61 = arith.addf %59, %60 : vector<4x128xf32>
      %cst_36 = arith.constant -3.000000e+00 : f32
      %cst_37 = arith.constant 3.000000e+00 : f32
      %62 = vector.broadcast %cst_36 : f32 to vector<4x128xf32>
      %63 = arith.maximumf %62, %61 : vector<4x128xf32>
      %64 = vector.broadcast %cst_37 : f32 to vector<4x128xf32>
      %65 = arith.minimumf %64, %63 : vector<4x128xf32>
      %66 = math.tanh %65 : vector<4x128xf32>
      %67 = arith.mulf %56, %66 : vector<4x128xf32>
      %68 = arith.truncf %67 : vector<4x128xf32> to vector<4x128xbf16>
      %cst_38 = arith.constant dense<0.000000e+00> : vector<4x64xf32>
      %69 = tpu.matmul %68, %39, %cst_38 {dimension_numbers = #tpu.dot_dimension_numbers<[1], [0], [0], [1], [0, 0, 1, 1], [], []>} : vector<4x128xbf16>, vector<128x64xbf16>, vector<4x64xf32> -> vector<4x64xf32>
      %cst_39 = arith.constant -3.000000e+00 : f32
      %cst_40 = arith.constant 3.000000e+00 : f32
      %70 = vector.broadcast %cst_39 : f32 to vector<4x64xf32>
      %71 = arith.maximumf %70, %69 : vector<4x64xf32>
      %72 = vector.broadcast %cst_40 : f32 to vector<4x64xf32>
      %73 = arith.minimumf %72, %71 : vector<4x64xf32>
      %74 = arith.mulf %73, %37 : vector<4x64xf32>
      %75 = vector.broadcast %42 : i32 to vector<4x1xi32>
      %76 = arith.cmpi sgt, %36, %75 : vector<4x1xi32>
      %77 = vector.shape_cast %76 : vector<4x1xi1> to vector<4x1xi1>
      %78 = vector.broadcast %77 : vector<4x1xi1> to vector<4x128xi1>
      %79 = arith.select %78, %65, %41 : vector<4x128xi1>, vector<4x128xf32>
      %80 = vector.shape_cast %76 : vector<4x1xi1> to vector<4x1xi1>
      %81 = vector.broadcast %80 : vector<4x1xi1> to vector<4x64xi1>
      %82 = arith.select %81, %74, %40 : vector<4x64xi1>, vector<4x64xf32>
      %cst_41 = arith.constant 0.000000e+00 : f32
      %83 = vector.shape_cast %76 : vector<4x1xi1> to vector<4x1xi1>
      %84 = vector.broadcast %83 : vector<4x1xi1> to vector<4x64xi1>
      %85 = vector.broadcast %cst_41 : f32 to vector<4x64xf32>
      %86 = arith.select %84, %74, %85 : vector<4x64xi1>, vector<4x64xf32>
      %c0_42 = arith.constant 0 : index
      %c0_43 = arith.constant 0 : index
      %c0_44 = arith.constant 0 : index
      %87 = vector.load %arg12[%c0_42, %c0_43, %c0_44] : memref<4x8x64xf32, #tpu.memory_space<vmem>>, vector<4x1x64xf32>
      %88 = vector.shape_cast %87 : vector<4x1x64xf32> to vector<4x64xf32>
      %89 = vector.shape_cast %86 : vector<4x64xf32> to vector<4x1x64xf32>
      tpu.vector_store %arg12[%c0_42, %c0_43, %c0_44], %89 {strides = array<i32>} : memref<4x8x64xf32, #tpu.memory_space<vmem>>, vector<4x1x64xf32>,
      %c1_i32 = arith.constant 1 : i32
      %90 = arith.addi %3, %c1_i32 : i32
      %c0_45 = arith.constant 0 : index
      %c1_46 = arith.constant 1 : index
      %c0_47 = arith.constant 0 : index
      %91 = vector.load %arg15[%c0_45, %c1_46, %c0_47] : memref<4x8x512xf32, #tpu.memory_space<vmem>>, vector<4x1x512xf32>
      %92 = vector.shape_cast %91 : vector<4x1x512xf32> to vector<4x512xf32>
      %93 = arith.truncf %82 : vector<4x64xf32> to vector<4x64xbf16>
      %cst_48 = arith.constant dense<0.000000e+00> : vector<4x512xf32>
      %94 = tpu.matmul %93, %38, %cst_48 {dimension_numbers = #tpu.dot_dimension_numbers<[1], [0], [0], [1], [0, 0, 1, 1], [], []>} : vector<4x64xbf16>, vector<64x512xbf16>, vector<4x512xf32> -> vector<4x512xf32>
      %95 = arith.addf %92, %94 : vector<4x512xf32>
      %96 = vector.extract_strided_slice %95 {offsets = [0, 0], sizes = [4, 384], strides = [1, 1]} : vector<4x512xf32> to vector<4x384xf32>
      %97 = arith.negf %96 : vector<4x384xf32>
      %98 = math.exp %97 : vector<4x384xf32>
      %cst_49 = arith.constant 1.000000e+00 : f32
      %99 = vector.broadcast %cst_49 : f32 to vector<4x384xf32>
      %100 = arith.addf %99, %98 : vector<4x384xf32>
      %101 = arith.divf %99, %100 : vector<4x384xf32>
      %102 = vector.extract_strided_slice %101 {offsets = [0, 0], sizes = [4, 128], strides = [1, 1]} : vector<4x384xf32> to vector<4x128xf32>
      %103 = vector.extract_strided_slice %101 {offsets = [0, 128], sizes = [4, 128], strides = [1, 1]} : vector<4x384xf32> to vector<4x128xf32>
      %104 = vector.extract_strided_slice %101 {offsets = [0, 256], sizes = [4, 128], strides = [1, 1]} : vector<4x384xf32> to vector<4x128xf32>
      %105 = vector.extract_strided_slice %95 {offsets = [0, 384], sizes = [4, 128], strides = [1, 1]} : vector<4x512xf32> to vector<4x128xf32>
      %106 = math.tanh %105 : vector<4x128xf32>
      %107 = arith.mulf %102, %106 : vector<4x128xf32>
      %108 = arith.mulf %103, %79 : vector<4x128xf32>
      %109 = arith.addf %107, %108 : vector<4x128xf32>
      %cst_50 = arith.constant -3.000000e+00 : f32
      %cst_51 = arith.constant 3.000000e+00 : f32
      %110 = vector.broadcast %cst_50 : f32 to vector<4x128xf32>
      %111 = arith.maximumf %110, %109 : vector<4x128xf32>
      %112 = vector.broadcast %cst_51 : f32 to vector<4x128xf32>
      %113 = arith.minimumf %112, %111 : vector<4x128xf32>
      %114 = math.tanh %113 : vector<4x128xf32>
      %115 = arith.mulf %104, %114 : vector<4x128xf32>
      %116 = arith.truncf %115 : vector<4x128xf32> to vector<4x128xbf16>
      %cst_52 = arith.constant dense<0.000000e+00> : vector<4x64xf32>
      %117 = tpu.matmul %116, %39, %cst_52 {dimension_numbers = #tpu.dot_dimension_numbers<[1], [0], [0], [1], [0, 0, 1, 1], [], []>} : vector<4x128xbf16>, vector<128x64xbf16>, vector<4x64xf32> -> vector<4x64xf32>
      %cst_53 = arith.constant -3.000000e+00 : f32
      %cst_54 = arith.constant 3.000000e+00 : f32
      %118 = vector.broadcast %cst_53 : f32 to vector<4x64xf32>
      %119 = arith.maximumf %118, %117 : vector<4x64xf32>
      %120 = vector.broadcast %cst_54 : f32 to vector<4x64xf32>
      %121 = arith.minimumf %120, %119 : vector<4x64xf32>
      %122 = arith.mulf %121, %37 : vector<4x64xf32>
      %123 = vector.broadcast %90 : i32 to vector<4x1xi32>
      %124 = arith.cmpi sgt, %36, %123 : vector<4x1xi32>
      %125 = vector.shape_cast %124 : vector<4x1xi1> to vector<4x1xi1>
      %126 = vector.broadcast %125 : vector<4x1xi1> to vector<4x128xi1>
      %127 = arith.select %126, %113, %79 : vector<4x128xi1>, vector<4x128xf32>
      %128 = vector.shape_cast %124 : vector<4x1xi1> to vector<4x1xi1>
      %129 = vector.broadcast %128 : vector<4x1xi1> to vector<4x64xi1>
      %130 = arith.select %129, %122, %82 : vector<4x64xi1>, vector<4x64xf32>
      %cst_55 = arith.constant 0.000000e+00 : f32
      %131 = vector.shape_cast %124 : vector<4x1xi1> to vector<4x1xi1>
      %132 = vector.broadcast %131 : vector<4x1xi1> to vector<4x64xi1>
      %133 = vector.broadcast %cst_55 : f32 to vector<4x64xf32>
      %134 = arith.select %132, %122, %133 : vector<4x64xi1>, vector<4x64xf32>
      %c0_56 = arith.constant 0 : index
      %c1_57 = arith.constant 1 : index
      %c0_58 = arith.constant 0 : index
      %135 = vector.load %arg12[%c0_56, %c1_57, %c0_58] : memref<4x8x64xf32, #tpu.memory_space<vmem>>, vector<4x1x64xf32>
      %136 = vector.shape_cast %135 : vector<4x1x64xf32> to vector<4x64xf32>
      %137 = vector.shape_cast %134 : vector<4x64xf32> to vector<4x1x64xf32>
      tpu.vector_store %arg12[%c0_56, %c1_57, %c0_58], %137 {strides = array<i32>} : memref<4x8x64xf32, #tpu.memory_space<vmem>>, vector<4x1x64xf32>,
      %c2_i32 = arith.constant 2 : i32
      %138 = arith.addi %3, %c2_i32 : i32
      %c0_59 = arith.constant 0 : index
      %c2_60 = arith.constant 2 : index
      %c0_61 = arith.constant 0 : index
      %139 = vector.load %arg15[%c0_59, %c2_60, %c0_61] : memref<4x8x512xf32, #tpu.memory_space<vmem>>, vector<4x1x512xf32>
      %140 = vector.shape_cast %139 : vector<4x1x512xf32> to vector<4x512xf32>
      %141 = arith.truncf %130 : vector<4x64xf32> to vector<4x64xbf16>
      %cst_62 = arith.constant dense<0.000000e+00> : vector<4x512xf32>
      %142 = tpu.matmul %141, %38, %cst_62 {dimension_numbers = #tpu.dot_dimension_numbers<[1], [0], [0], [1], [0, 0, 1, 1], [], []>} : vector<4x64xbf16>, vector<64x512xbf16>, vector<4x512xf32> -> vector<4x512xf32>
      %143 = arith.addf %140, %142 : vector<4x512xf32>
      %144 = vector.extract_strided_slice %143 {offsets = [0, 0], sizes = [4, 384], strides = [1, 1]} : vector<4x512xf32> to vector<4x384xf32>
      %145 = arith.negf %144 : vector<4x384xf32>
      %146 = math.exp %145 : vector<4x384xf32>
      %cst_63 = arith.constant 1.000000e+00 : f32
      %147 = vector.broadcast %cst_63 : f32 to vector<4x384xf32>
      %148 = arith.addf %147, %146 : vector<4x384xf32>
      %149 = arith.divf %147, %148 : vector<4x384xf32>
      %150 = vector.extract_strided_slice %149 {offsets = [0, 0], sizes = [4, 128], strides = [1, 1]} : vector<4x384xf32> to vector<4x128xf32>
      %151 = vector.extract_strided_slice %149 {offsets = [0, 128], sizes = [4, 128], strides = [1, 1]} : vector<4x384xf32> to vector<4x128xf32>
      %152 = vector.extract_strided_slice %149 {offsets = [0, 256], sizes = [4, 128], strides = [1, 1]} : vector<4x384xf32> to vector<4x128xf32>
      %153 = vector.extract_strided_slice %143 {offsets = [0, 384], sizes = [4, 128], strides = [1, 1]} : vector<4x512xf32> to vector<4x128xf32>
      %154 = math.tanh %153 : vector<4x128xf32>
      %155 = arith.mulf %150, %154 : vector<4x128xf32>
      %156 = arith.mulf %151, %127 : vector<4x128xf32>
      %157 = arith.addf %155, %156 : vector<4x128xf32>
      %cst_64 = arith.constant -3.000000e+00 : f32
      %cst_65 = arith.constant 3.000000e+00 : f32
      %158 = vector.broadcast %cst_64 : f32 to vector<4x128xf32>
      %159 = arith.maximumf %158, %157 : vector<4x128xf32>
      %160 = vector.broadcast %cst_65 : f32 to vector<4x128xf32>
      %161 = arith.minimumf %160, %159 : vector<4x128xf32>
      %162 = math.tanh %161 : vector<4x128xf32>
      %163 = arith.mulf %152, %162 : vector<4x128xf32>
      %164 = arith.truncf %163 : vector<4x128xf32> to vector<4x128xbf16>
      %cst_66 = arith.constant dense<0.000000e+00> : vector<4x64xf32>
      %165 = tpu.matmul %164, %39, %cst_66 {dimension_numbers = #tpu.dot_dimension_numbers<[1], [0], [0], [1], [0, 0, 1, 1], [], []>} : vector<4x128xbf16>, vector<128x64xbf16>, vector<4x64xf32> -> vector<4x64xf32>
      %cst_67 = arith.constant -3.000000e+00 : f32
      %cst_68 = arith.constant 3.000000e+00 : f32
      %166 = vector.broadcast %cst_67 : f32 to vector<4x64xf32>
      %167 = arith.maximumf %166, %165 : vector<4x64xf32>
      %168 = vector.broadcast %cst_68 : f32 to vector<4x64xf32>
      %169 = arith.minimumf %168, %167 : vector<4x64xf32>
      %170 = arith.mulf %169, %37 : vector<4x64xf32>
      %171 = vector.broadcast %138 : i32 to vector<4x1xi32>
      %172 = arith.cmpi sgt, %36, %171 : vector<4x1xi32>
      %173 = vector.shape_cast %172 : vector<4x1xi1> to vector<4x1xi1>
      %174 = vector.broadcast %173 : vector<4x1xi1> to vector<4x128xi1>
      %175 = arith.select %174, %161, %127 : vector<4x128xi1>, vector<4x128xf32>
      %176 = vector.shape_cast %172 : vector<4x1xi1> to vector<4x1xi1>
      %177 = vector.broadcast %176 : vector<4x1xi1> to vector<4x64xi1>
      %178 = arith.select %177, %170, %130 : vector<4x64xi1>, vector<4x64xf32>
      %cst_69 = arith.constant 0.000000e+00 : f32
      %179 = vector.shape_cast %172 : vector<4x1xi1> to vector<4x1xi1>
      %180 = vector.broadcast %179 : vector<4x1xi1> to vector<4x64xi1>
      %181 = vector.broadcast %cst_69 : f32 to vector<4x64xf32>
      %182 = arith.select %180, %170, %181 : vector<4x64xi1>, vector<4x64xf32>
      %c0_70 = arith.constant 0 : index
      %c2_71 = arith.constant 2 : index
      %c0_72 = arith.constant 0 : index
      %183 = vector.load %arg12[%c0_70, %c2_71, %c0_72] : memref<4x8x64xf32, #tpu.memory_space<vmem>>, vector<4x1x64xf32>
      %184 = vector.shape_cast %183 : vector<4x1x64xf32> to vector<4x64xf32>
      %185 = vector.shape_cast %182 : vector<4x64xf32> to vector<4x1x64xf32>
      tpu.vector_store %arg12[%c0_70, %c2_71, %c0_72], %185 {strides = array<i32>} : memref<4x8x64xf32, #tpu.memory_space<vmem>>, vector<4x1x64xf32>,
      %c3_i32 = arith.constant 3 : i32
      %186 = arith.addi %3, %c3_i32 : i32
      %c0_73 = arith.constant 0 : index
      %c3_74 = arith.constant 3 : index
      %c0_75 = arith.constant 0 : index
      %187 = vector.load %arg15[%c0_73, %c3_74, %c0_75] : memref<4x8x512xf32, #tpu.memory_space<vmem>>, vector<4x1x512xf32>
      %188 = vector.shape_cast %187 : vector<4x1x512xf32> to vector<4x512xf32>
      %189 = arith.truncf %178 : vector<4x64xf32> to vector<4x64xbf16>
      %cst_76 = arith.constant dense<0.000000e+00> : vector<4x512xf32>
      %190 = tpu.matmul %189, %38, %cst_76 {dimension_numbers = #tpu.dot_dimension_numbers<[1], [0], [0], [1], [0, 0, 1, 1], [], []>} : vector<4x64xbf16>, vector<64x512xbf16>, vector<4x512xf32> -> vector<4x512xf32>
      %191 = arith.addf %188, %190 : vector<4x512xf32>
      %192 = vector.extract_strided_slice %191 {offsets = [0, 0], sizes = [4, 384], strides = [1, 1]} : vector<4x512xf32> to vector<4x384xf32>
      %193 = arith.negf %192 : vector<4x384xf32>
      %194 = math.exp %193 : vector<4x384xf32>
      %cst_77 = arith.constant 1.000000e+00 : f32
      %195 = vector.broadcast %cst_77 : f32 to vector<4x384xf32>
      %196 = arith.addf %195, %194 : vector<4x384xf32>
      %197 = arith.divf %195, %196 : vector<4x384xf32>
      %198 = vector.extract_strided_slice %197 {offsets = [0, 0], sizes = [4, 128], strides = [1, 1]} : vector<4x384xf32> to vector<4x128xf32>
      %199 = vector.extract_strided_slice %197 {offsets = [0, 128], sizes = [4, 128], strides = [1, 1]} : vector<4x384xf32> to vector<4x128xf32>
      %200 = vector.extract_strided_slice %197 {offsets = [0, 256], sizes = [4, 128], strides = [1, 1]} : vector<4x384xf32> to vector<4x128xf32>
      %201 = vector.extract_strided_slice %191 {offsets = [0, 384], sizes = [4, 128], strides = [1, 1]} : vector<4x512xf32> to vector<4x128xf32>
      %202 = math.tanh %201 : vector<4x128xf32>
      %203 = arith.mulf %198, %202 : vector<4x128xf32>
      %204 = arith.mulf %199, %175 : vector<4x128xf32>
      %205 = arith.addf %203, %204 : vector<4x128xf32>
      %cst_78 = arith.constant -3.000000e+00 : f32
      %cst_79 = arith.constant 3.000000e+00 : f32
      %206 = vector.broadcast %cst_78 : f32 to vector<4x128xf32>
      %207 = arith.maximumf %206, %205 : vector<4x128xf32>
      %208 = vector.broadcast %cst_79 : f32 to vector<4x128xf32>
      %209 = arith.minimumf %208, %207 : vector<4x128xf32>
      %210 = math.tanh %209 : vector<4x128xf32>
      %211 = arith.mulf %200, %210 : vector<4x128xf32>
      %212 = arith.truncf %211 : vector<4x128xf32> to vector<4x128xbf16>
      %cst_80 = arith.constant dense<0.000000e+00> : vector<4x64xf32>
      %213 = tpu.matmul %212, %39, %cst_80 {dimension_numbers = #tpu.dot_dimension_numbers<[1], [0], [0], [1], [0, 0, 1, 1], [], []>} : vector<4x128xbf16>, vector<128x64xbf16>, vector<4x64xf32> -> vector<4x64xf32>
      %cst_81 = arith.constant -3.000000e+00 : f32
      %cst_82 = arith.constant 3.000000e+00 : f32
      %214 = vector.broadcast %cst_81 : f32 to vector<4x64xf32>
      %215 = arith.maximumf %214, %213 : vector<4x64xf32>
      %216 = vector.broadcast %cst_82 : f32 to vector<4x64xf32>
      %217 = arith.minimumf %216, %215 : vector<4x64xf32>
      %218 = arith.mulf %217, %37 : vector<4x64xf32>
      %219 = vector.broadcast %186 : i32 to vector<4x1xi32>
      %220 = arith.cmpi sgt, %36, %219 : vector<4x1xi32>
      %221 = vector.shape_cast %220 : vector<4x1xi1> to vector<4x1xi1>
      %222 = vector.broadcast %221 : vector<4x1xi1> to vector<4x128xi1>
      %223 = arith.select %222, %209, %175 : vector<4x128xi1>, vector<4x128xf32>
      %224 = vector.shape_cast %220 : vector<4x1xi1> to vector<4x1xi1>
      %225 = vector.broadcast %224 : vector<4x1xi1> to vector<4x64xi1>
      %226 = arith.select %225, %218, %178 : vector<4x64xi1>, vector<4x64xf32>
      %cst_83 = arith.constant 0.000000e+00 : f32
      %227 = vector.shape_cast %220 : vector<4x1xi1> to vector<4x1xi1>
      %228 = vector.broadcast %227 : vector<4x1xi1> to vector<4x64xi1>
      %229 = vector.broadcast %cst_83 : f32 to vector<4x64xf32>
      %230 = arith.select %228, %218, %229 : vector<4x64xi1>, vector<4x64xf32>
      %c0_84 = arith.constant 0 : index
      %c3_85 = arith.constant 3 : index
      %c0_86 = arith.constant 0 : index
      %231 = vector.load %arg12[%c0_84, %c3_85, %c0_86] : memref<4x8x64xf32, #tpu.memory_space<vmem>>, vector<4x1x64xf32>
      %232 = vector.shape_cast %231 : vector<4x1x64xf32> to vector<4x64xf32>
      %233 = vector.shape_cast %230 : vector<4x64xf32> to vector<4x1x64xf32>
      tpu.vector_store %arg12[%c0_84, %c3_85, %c0_86], %233 {strides = array<i32>} : memref<4x8x64xf32, #tpu.memory_space<vmem>>, vector<4x1x64xf32>,
      %c4_i32 = arith.constant 4 : i32
      %234 = arith.addi %3, %c4_i32 : i32
      %c0_87 = arith.constant 0 : index
      %c4 = arith.constant 4 : index
      %c0_88 = arith.constant 0 : index
      %235 = vector.load %arg15[%c0_87, %c4, %c0_88] : memref<4x8x512xf32, #tpu.memory_space<vmem>>, vector<4x1x512xf32>
      %236 = vector.shape_cast %235 : vector<4x1x512xf32> to vector<4x512xf32>
      %237 = arith.truncf %226 : vector<4x64xf32> to vector<4x64xbf16>
      %cst_89 = arith.constant dense<0.000000e+00> : vector<4x512xf32>
      %238 = tpu.matmul %237, %38, %cst_89 {dimension_numbers = #tpu.dot_dimension_numbers<[1], [0], [0], [1], [0, 0, 1, 1], [], []>} : vector<4x64xbf16>, vector<64x512xbf16>, vector<4x512xf32> -> vector<4x512xf32>
      %239 = arith.addf %236, %238 : vector<4x512xf32>
      %240 = vector.extract_strided_slice %239 {offsets = [0, 0], sizes = [4, 384], strides = [1, 1]} : vector<4x512xf32> to vector<4x384xf32>
      %241 = arith.negf %240 : vector<4x384xf32>
      %242 = math.exp %241 : vector<4x384xf32>
      %cst_90 = arith.constant 1.000000e+00 : f32
      %243 = vector.broadcast %cst_90 : f32 to vector<4x384xf32>
      %244 = arith.addf %243, %242 : vector<4x384xf32>
      %245 = arith.divf %243, %244 : vector<4x384xf32>
      %246 = vector.extract_strided_slice %245 {offsets = [0, 0], sizes = [4, 128], strides = [1, 1]} : vector<4x384xf32> to vector<4x128xf32>
      %247 = vector.extract_strided_slice %245 {offsets = [0, 128], sizes = [4, 128], strides = [1, 1]} : vector<4x384xf32> to vector<4x128xf32>
      %248 = vector.extract_strided_slice %245 {offsets = [0, 256], sizes = [4, 128], strides = [1, 1]} : vector<4x384xf32> to vector<4x128xf32>
      %249 = vector.extract_strided_slice %239 {offsets = [0, 384], sizes = [4, 128], strides = [1, 1]} : vector<4x512xf32> to vector<4x128xf32>
      %250 = math.tanh %249 : vector<4x128xf32>
      %251 = arith.mulf %246, %250 : vector<4x128xf32>
      %252 = arith.mulf %247, %223 : vector<4x128xf32>
      %253 = arith.addf %251, %252 : vector<4x128xf32>
      %cst_91 = arith.constant -3.000000e+00 : f32
      %cst_92 = arith.constant 3.000000e+00 : f32
      %254 = vector.broadcast %cst_91 : f32 to vector<4x128xf32>
      %255 = arith.maximumf %254, %253 : vector<4x128xf32>
      %256 = vector.broadcast %cst_92 : f32 to vector<4x128xf32>
      %257 = arith.minimumf %256, %255 : vector<4x128xf32>
      %258 = math.tanh %257 : vector<4x128xf32>
      %259 = arith.mulf %248, %258 : vector<4x128xf32>
      %260 = arith.truncf %259 : vector<4x128xf32> to vector<4x128xbf16>
      %cst_93 = arith.constant dense<0.000000e+00> : vector<4x64xf32>
      %261 = tpu.matmul %260, %39, %cst_93 {dimension_numbers = #tpu.dot_dimension_numbers<[1], [0], [0], [1], [0, 0, 1, 1], [], []>} : vector<4x128xbf16>, vector<128x64xbf16>, vector<4x64xf32> -> vector<4x64xf32>
      %cst_94 = arith.constant -3.000000e+00 : f32
      %cst_95 = arith.constant 3.000000e+00 : f32
      %262 = vector.broadcast %cst_94 : f32 to vector<4x64xf32>
      %263 = arith.maximumf %262, %261 : vector<4x64xf32>
      %264 = vector.broadcast %cst_95 : f32 to vector<4x64xf32>
      %265 = arith.minimumf %264, %263 : vector<4x64xf32>
      %266 = arith.mulf %265, %37 : vector<4x64xf32>
      %267 = vector.broadcast %234 : i32 to vector<4x1xi32>
      %268 = arith.cmpi sgt, %36, %267 : vector<4x1xi32>
      %269 = vector.shape_cast %268 : vector<4x1xi1> to vector<4x1xi1>
      %270 = vector.broadcast %269 : vector<4x1xi1> to vector<4x128xi1>
      %271 = arith.select %270, %257, %223 : vector<4x128xi1>, vector<4x128xf32>
      %272 = vector.shape_cast %268 : vector<4x1xi1> to vector<4x1xi1>
      %273 = vector.broadcast %272 : vector<4x1xi1> to vector<4x64xi1>
      %274 = arith.select %273, %266, %226 : vector<4x64xi1>, vector<4x64xf32>
      %cst_96 = arith.constant 0.000000e+00 : f32
      %275 = vector.shape_cast %268 : vector<4x1xi1> to vector<4x1xi1>
      %276 = vector.broadcast %275 : vector<4x1xi1> to vector<4x64xi1>
      %277 = vector.broadcast %cst_96 : f32 to vector<4x64xf32>
      %278 = arith.select %276, %266, %277 : vector<4x64xi1>, vector<4x64xf32>
      %c0_97 = arith.constant 0 : index
      %c4_98 = arith.constant 4 : index
      %c0_99 = arith.constant 0 : index
      %279 = vector.load %arg12[%c0_97, %c4_98, %c0_99] : memref<4x8x64xf32, #tpu.memory_space<vmem>>, vector<4x1x64xf32>
      %280 = vector.shape_cast %279 : vector<4x1x64xf32> to vector<4x64xf32>
      %281 = vector.shape_cast %278 : vector<4x64xf32> to vector<4x1x64xf32>
      tpu.vector_store %arg12[%c0_97, %c4_98, %c0_99], %281 {strides = array<i32>} : memref<4x8x64xf32, #tpu.memory_space<vmem>>, vector<4x1x64xf32>,
      %c5_i32 = arith.constant 5 : i32
      %282 = arith.addi %3, %c5_i32 : i32
      %c0_100 = arith.constant 0 : index
      %c5 = arith.constant 5 : index
      %c0_101 = arith.constant 0 : index
      %283 = vector.load %arg15[%c0_100, %c5, %c0_101] : memref<4x8x512xf32, #tpu.memory_space<vmem>>, vector<4x1x512xf32>
      %284 = vector.shape_cast %283 : vector<4x1x512xf32> to vector<4x512xf32>
      %285 = arith.truncf %274 : vector<4x64xf32> to vector<4x64xbf16>
      %cst_102 = arith.constant dense<0.000000e+00> : vector<4x512xf32>
      %286 = tpu.matmul %285, %38, %cst_102 {dimension_numbers = #tpu.dot_dimension_numbers<[1], [0], [0], [1], [0, 0, 1, 1], [], []>} : vector<4x64xbf16>, vector<64x512xbf16>, vector<4x512xf32> -> vector<4x512xf32>
      %287 = arith.addf %284, %286 : vector<4x512xf32>
      %288 = vector.extract_strided_slice %287 {offsets = [0, 0], sizes = [4, 384], strides = [1, 1]} : vector<4x512xf32> to vector<4x384xf32>
      %289 = arith.negf %288 : vector<4x384xf32>
      %290 = math.exp %289 : vector<4x384xf32>
      %cst_103 = arith.constant 1.000000e+00 : f32
      %291 = vector.broadcast %cst_103 : f32 to vector<4x384xf32>
      %292 = arith.addf %291, %290 : vector<4x384xf32>
      %293 = arith.divf %291, %292 : vector<4x384xf32>
      %294 = vector.extract_strided_slice %293 {offsets = [0, 0], sizes = [4, 128], strides = [1, 1]} : vector<4x384xf32> to vector<4x128xf32>
      %295 = vector.extract_strided_slice %293 {offsets = [0, 128], sizes = [4, 128], strides = [1, 1]} : vector<4x384xf32> to vector<4x128xf32>
      %296 = vector.extract_strided_slice %293 {offsets = [0, 256], sizes = [4, 128], strides = [1, 1]} : vector<4x384xf32> to vector<4x128xf32>
      %297 = vector.extract_strided_slice %287 {offsets = [0, 384], sizes = [4, 128], strides = [1, 1]} : vector<4x512xf32> to vector<4x128xf32>
      %298 = math.tanh %297 : vector<4x128xf32>
      %299 = arith.mulf %294, %298 : vector<4x128xf32>
      %300 = arith.mulf %295, %271 : vector<4x128xf32>
      %301 = arith.addf %299, %300 : vector<4x128xf32>
      %cst_104 = arith.constant -3.000000e+00 : f32
      %cst_105 = arith.constant 3.000000e+00 : f32
      %302 = vector.broadcast %cst_104 : f32 to vector<4x128xf32>
      %303 = arith.maximumf %302, %301 : vector<4x128xf32>
      %304 = vector.broadcast %cst_105 : f32 to vector<4x128xf32>
      %305 = arith.minimumf %304, %303 : vector<4x128xf32>
      %306 = math.tanh %305 : vector<4x128xf32>
      %307 = arith.mulf %296, %306 : vector<4x128xf32>
      %308 = arith.truncf %307 : vector<4x128xf32> to vector<4x128xbf16>
      %cst_106 = arith.constant dense<0.000000e+00> : vector<4x64xf32>
      %309 = tpu.matmul %308, %39, %cst_106 {dimension_numbers = #tpu.dot_dimension_numbers<[1], [0], [0], [1], [0, 0, 1, 1], [], []>} : vector<4x128xbf16>, vector<128x64xbf16>, vector<4x64xf32> -> vector<4x64xf32>
      %cst_107 = arith.constant -3.000000e+00 : f32
      %cst_108 = arith.constant 3.000000e+00 : f32
      %310 = vector.broadcast %cst_107 : f32 to vector<4x64xf32>
      %311 = arith.maximumf %310, %309 : vector<4x64xf32>
      %312 = vector.broadcast %cst_108 : f32 to vector<4x64xf32>
      %313 = arith.minimumf %312, %311 : vector<4x64xf32>
      %314 = arith.mulf %313, %37 : vector<4x64xf32>
      %315 = vector.broadcast %282 : i32 to vector<4x1xi32>
      %316 = arith.cmpi sgt, %36, %315 : vector<4x1xi32>
      %317 = vector.shape_cast %316 : vector<4x1xi1> to vector<4x1xi1>
      %318 = vector.broadcast %317 : vector<4x1xi1> to vector<4x128xi1>
      %319 = arith.select %318, %305, %271 : vector<4x128xi1>, vector<4x128xf32>
      %320 = vector.shape_cast %316 : vector<4x1xi1> to vector<4x1xi1>
      %321 = vector.broadcast %320 : vector<4x1xi1> to vector<4x64xi1>
      %322 = arith.select %321, %314, %274 : vector<4x64xi1>, vector<4x64xf32>
      %cst_109 = arith.constant 0.000000e+00 : f32
      %323 = vector.shape_cast %316 : vector<4x1xi1> to vector<4x1xi1>
      %324 = vector.broadcast %323 : vector<4x1xi1> to vector<4x64xi1>
      %325 = vector.broadcast %cst_109 : f32 to vector<4x64xf32>
      %326 = arith.select %324, %314, %325 : vector<4x64xi1>, vector<4x64xf32>
      %c0_110 = arith.constant 0 : index
      %c5_111 = arith.constant 5 : index
      %c0_112 = arith.constant 0 : index
      %327 = vector.load %arg12[%c0_110, %c5_111, %c0_112] : memref<4x8x64xf32, #tpu.memory_space<vmem>>, vector<4x1x64xf32>
      %328 = vector.shape_cast %327 : vector<4x1x64xf32> to vector<4x64xf32>
      %329 = vector.shape_cast %326 : vector<4x64xf32> to vector<4x1x64xf32>
      tpu.vector_store %arg12[%c0_110, %c5_111, %c0_112], %329 {strides = array<i32>} : memref<4x8x64xf32, #tpu.memory_space<vmem>>, vector<4x1x64xf32>,
      %c6_i32 = arith.constant 6 : i32
      %330 = arith.addi %3, %c6_i32 : i32
      %c0_113 = arith.constant 0 : index
      %c6 = arith.constant 6 : index
      %c0_114 = arith.constant 0 : index
      %331 = vector.load %arg15[%c0_113, %c6, %c0_114] : memref<4x8x512xf32, #tpu.memory_space<vmem>>, vector<4x1x512xf32>
      %332 = vector.shape_cast %331 : vector<4x1x512xf32> to vector<4x512xf32>
      %333 = arith.truncf %322 : vector<4x64xf32> to vector<4x64xbf16>
      %cst_115 = arith.constant dense<0.000000e+00> : vector<4x512xf32>
      %334 = tpu.matmul %333, %38, %cst_115 {dimension_numbers = #tpu.dot_dimension_numbers<[1], [0], [0], [1], [0, 0, 1, 1], [], []>} : vector<4x64xbf16>, vector<64x512xbf16>, vector<4x512xf32> -> vector<4x512xf32>
      %335 = arith.addf %332, %334 : vector<4x512xf32>
      %336 = vector.extract_strided_slice %335 {offsets = [0, 0], sizes = [4, 384], strides = [1, 1]} : vector<4x512xf32> to vector<4x384xf32>
      %337 = arith.negf %336 : vector<4x384xf32>
      %338 = math.exp %337 : vector<4x384xf32>
      %cst_116 = arith.constant 1.000000e+00 : f32
      %339 = vector.broadcast %cst_116 : f32 to vector<4x384xf32>
      %340 = arith.addf %339, %338 : vector<4x384xf32>
      %341 = arith.divf %339, %340 : vector<4x384xf32>
      %342 = vector.extract_strided_slice %341 {offsets = [0, 0], sizes = [4, 128], strides = [1, 1]} : vector<4x384xf32> to vector<4x128xf32>
      %343 = vector.extract_strided_slice %341 {offsets = [0, 128], sizes = [4, 128], strides = [1, 1]} : vector<4x384xf32> to vector<4x128xf32>
      %344 = vector.extract_strided_slice %341 {offsets = [0, 256], sizes = [4, 128], strides = [1, 1]} : vector<4x384xf32> to vector<4x128xf32>
      %345 = vector.extract_strided_slice %335 {offsets = [0, 384], sizes = [4, 128], strides = [1, 1]} : vector<4x512xf32> to vector<4x128xf32>
      %346 = math.tanh %345 : vector<4x128xf32>
      %347 = arith.mulf %342, %346 : vector<4x128xf32>
      %348 = arith.mulf %343, %319 : vector<4x128xf32>
      %349 = arith.addf %347, %348 : vector<4x128xf32>
      %cst_117 = arith.constant -3.000000e+00 : f32
      %cst_118 = arith.constant 3.000000e+00 : f32
      %350 = vector.broadcast %cst_117 : f32 to vector<4x128xf32>
      %351 = arith.maximumf %350, %349 : vector<4x128xf32>
      %352 = vector.broadcast %cst_118 : f32 to vector<4x128xf32>
      %353 = arith.minimumf %352, %351 : vector<4x128xf32>
      %354 = math.tanh %353 : vector<4x128xf32>
      %355 = arith.mulf %344, %354 : vector<4x128xf32>
      %356 = arith.truncf %355 : vector<4x128xf32> to vector<4x128xbf16>
      %cst_119 = arith.constant dense<0.000000e+00> : vector<4x64xf32>
      %357 = tpu.matmul %356, %39, %cst_119 {dimension_numbers = #tpu.dot_dimension_numbers<[1], [0], [0], [1], [0, 0, 1, 1], [], []>} : vector<4x128xbf16>, vector<128x64xbf16>, vector<4x64xf32> -> vector<4x64xf32>
      %cst_120 = arith.constant -3.000000e+00 : f32
      %cst_121 = arith.constant 3.000000e+00 : f32
      %358 = vector.broadcast %cst_120 : f32 to vector<4x64xf32>
      %359 = arith.maximumf %358, %357 : vector<4x64xf32>
      %360 = vector.broadcast %cst_121 : f32 to vector<4x64xf32>
      %361 = arith.minimumf %360, %359 : vector<4x64xf32>
      %362 = arith.mulf %361, %37 : vector<4x64xf32>
      %363 = vector.broadcast %330 : i32 to vector<4x1xi32>
      %364 = arith.cmpi sgt, %36, %363 : vector<4x1xi32>
      %365 = vector.shape_cast %364 : vector<4x1xi1> to vector<4x1xi1>
      %366 = vector.broadcast %365 : vector<4x1xi1> to vector<4x128xi1>
      %367 = arith.select %366, %353, %319 : vector<4x128xi1>, vector<4x128xf32>
      %368 = vector.shape_cast %364 : vector<4x1xi1> to vector<4x1xi1>
      %369 = vector.broadcast %368 : vector<4x1xi1> to vector<4x64xi1>
      %370 = arith.select %369, %362, %322 : vector<4x64xi1>, vector<4x64xf32>
      %cst_122 = arith.constant 0.000000e+00 : f32
      %371 = vector.shape_cast %364 : vector<4x1xi1> to vector<4x1xi1>
      %372 = vector.broadcast %371 : vector<4x1xi1> to vector<4x64xi1>
      %373 = vector.broadcast %cst_122 : f32 to vector<4x64xf32>
      %374 = arith.select %372, %362, %373 : vector<4x64xi1>, vector<4x64xf32>
      %c0_123 = arith.constant 0 : index
      %c6_124 = arith.constant 6 : index
      %c0_125 = arith.constant 0 : index
      %375 = vector.load %arg12[%c0_123, %c6_124, %c0_125] : memref<4x8x64xf32, #tpu.memory_space<vmem>>, vector<4x1x64xf32>
      %376 = vector.shape_cast %375 : vector<4x1x64xf32> to vector<4x64xf32>
      %377 = vector.shape_cast %374 : vector<4x64xf32> to vector<4x1x64xf32>
      tpu.vector_store %arg12[%c0_123, %c6_124, %c0_125], %377 {strides = array<i32>} : memref<4x8x64xf32, #tpu.memory_space<vmem>>, vector<4x1x64xf32>,
      %c7_i32 = arith.constant 7 : i32
      %378 = arith.addi %3, %c7_i32 : i32
      %c0_126 = arith.constant 0 : index
      %c7 = arith.constant 7 : index
      %c0_127 = arith.constant 0 : index
      %379 = vector.load %arg15[%c0_126, %c7, %c0_127] : memref<4x8x512xf32, #tpu.memory_space<vmem>>, vector<4x1x512xf32>
      %380 = vector.shape_cast %379 : vector<4x1x512xf32> to vector<4x512xf32>
      %381 = arith.truncf %370 : vector<4x64xf32> to vector<4x64xbf16>
      %cst_128 = arith.constant dense<0.000000e+00> : vector<4x512xf32>
      %382 = tpu.matmul %381, %38, %cst_128 {dimension_numbers = #tpu.dot_dimension_numbers<[1], [0], [0], [1], [0, 0, 1, 1], [], []>} : vector<4x64xbf16>, vector<64x512xbf16>, vector<4x512xf32> -> vector<4x512xf32>
      %383 = arith.addf %380, %382 : vector<4x512xf32>
      %384 = vector.extract_strided_slice %383 {offsets = [0, 0], sizes = [4, 384], strides = [1, 1]} : vector<4x512xf32> to vector<4x384xf32>
      %385 = arith.negf %384 : vector<4x384xf32>
      %386 = math.exp %385 : vector<4x384xf32>
      %cst_129 = arith.constant 1.000000e+00 : f32
      %387 = vector.broadcast %cst_129 : f32 to vector<4x384xf32>
      %388 = arith.addf %387, %386 : vector<4x384xf32>
      %389 = arith.divf %387, %388 : vector<4x384xf32>
      %390 = vector.extract_strided_slice %389 {offsets = [0, 0], sizes = [4, 128], strides = [1, 1]} : vector<4x384xf32> to vector<4x128xf32>
      %391 = vector.extract_strided_slice %389 {offsets = [0, 128], sizes = [4, 128], strides = [1, 1]} : vector<4x384xf32> to vector<4x128xf32>
      %392 = vector.extract_strided_slice %389 {offsets = [0, 256], sizes = [4, 128], strides = [1, 1]} : vector<4x384xf32> to vector<4x128xf32>
      %393 = vector.extract_strided_slice %383 {offsets = [0, 384], sizes = [4, 128], strides = [1, 1]} : vector<4x512xf32> to vector<4x128xf32>
      %394 = math.tanh %393 : vector<4x128xf32>
      %395 = arith.mulf %390, %394 : vector<4x128xf32>
      %396 = arith.mulf %391, %367 : vector<4x128xf32>
      %397 = arith.addf %395, %396 : vector<4x128xf32>
      %cst_130 = arith.constant -3.000000e+00 : f32
      %cst_131 = arith.constant 3.000000e+00 : f32
      %398 = vector.broadcast %cst_130 : f32 to vector<4x128xf32>
      %399 = arith.maximumf %398, %397 : vector<4x128xf32>
      %400 = vector.broadcast %cst_131 : f32 to vector<4x128xf32>
      %401 = arith.minimumf %400, %399 : vector<4x128xf32>
      %402 = math.tanh %401 : vector<4x128xf32>
      %403 = arith.mulf %392, %402 : vector<4x128xf32>
      %404 = arith.truncf %403 : vector<4x128xf32> to vector<4x128xbf16>
      %cst_132 = arith.constant dense<0.000000e+00> : vector<4x64xf32>
      %405 = tpu.matmul %404, %39, %cst_132 {dimension_numbers = #tpu.dot_dimension_numbers<[1], [0], [0], [1], [0, 0, 1, 1], [], []>} : vector<4x128xbf16>, vector<128x64xbf16>, vector<4x64xf32> -> vector<4x64xf32>
      %cst_133 = arith.constant -3.000000e+00 : f32
      %cst_134 = arith.constant 3.000000e+00 : f32
      %406 = vector.broadcast %cst_133 : f32 to vector<4x64xf32>
      %407 = arith.maximumf %406, %405 : vector<4x64xf32>
      %408 = vector.broadcast %cst_134 : f32 to vector<4x64xf32>
      %409 = arith.minimumf %408, %407 : vector<4x64xf32>
      %410 = arith.mulf %409, %37 : vector<4x64xf32>
      %411 = vector.broadcast %378 : i32 to vector<4x1xi32>
      %412 = arith.cmpi sgt, %36, %411 : vector<4x1xi32>
      %413 = vector.shape_cast %412 : vector<4x1xi1> to vector<4x1xi1>
      %414 = vector.broadcast %413 : vector<4x1xi1> to vector<4x128xi1>
      %415 = arith.select %414, %401, %367 : vector<4x128xi1>, vector<4x128xf32>
      %416 = vector.shape_cast %412 : vector<4x1xi1> to vector<4x1xi1>
      %417 = vector.broadcast %416 : vector<4x1xi1> to vector<4x64xi1>
      %418 = arith.select %417, %410, %370 : vector<4x64xi1>, vector<4x64xf32>
      %cst_135 = arith.constant 0.000000e+00 : f32
      %419 = vector.shape_cast %412 : vector<4x1xi1> to vector<4x1xi1>
      %420 = vector.broadcast %419 : vector<4x1xi1> to vector<4x64xi1>
      %421 = vector.broadcast %cst_135 : f32 to vector<4x64xf32>
      %422 = arith.select %420, %410, %421 : vector<4x64xi1>, vector<4x64xf32>
      %c0_136 = arith.constant 0 : index
      %c7_137 = arith.constant 7 : index
      %c0_138 = arith.constant 0 : index
      %423 = vector.load %arg12[%c0_136, %c7_137, %c0_138] : memref<4x8x64xf32, #tpu.memory_space<vmem>>, vector<4x1x64xf32>
      %424 = vector.shape_cast %423 : vector<4x1x64xf32> to vector<4x64xf32>
      %425 = vector.shape_cast %422 : vector<4x64xf32> to vector<4x1x64xf32>
      tpu.vector_store %arg12[%c0_136, %c7_137, %c0_138], %425 {strides = array<i32>} : memref<4x8x64xf32, #tpu.memory_space<vmem>>, vector<4x1x64xf32>,
      %c0_139 = arith.constant 0 : index
      %c0_140 = arith.constant 0 : index
      %426 = vector.load %arg13[%c0_139, %c0_140] : memref<4x64xf32, #tpu.memory_space<vmem>>, vector<4x64xf32>
      tpu.vector_store %arg13[%c0_139, %c0_140], %418 {strides = array<i32>} : memref<4x64xf32, #tpu.memory_space<vmem>>, vector<4x64xf32>,
      %c0_141 = arith.constant 0 : index
      %c0_142 = arith.constant 0 : index
      %427 = vector.load %arg14[%c0_141, %c0_142] : memref<4x128xf32, #tpu.memory_space<vmem>>, vector<4x128xf32>
      tpu.vector_store %arg14[%c0_141, %c0_142], %415 {strides = array<i32>} : memref<4x128xf32, #tpu.memory_space<vmem>>, vector<4x128xf32>,
    } else {
    }
    return
  }
  func.func @transform_0(%arg0: i32, %arg1: i32, %arg2: memref<1xi32, #tpu.memory_space<smem>>) -> (i32, i32) {
    %c0_i32 = arith.constant 0 : i32
    %c0_i32_0 = arith.constant 0 : i32
    return %arg0, %c0_i32 : i32, i32
  }
  func.func @transform_1(%arg0: i32, %arg1: i32, %arg2: memref<1xi32, #tpu.memory_space<smem>>) -> (i32, i32, i32) {
    %c0_i32 = arith.constant 0 : i32
    %c0_i32_0 = arith.constant 0 : i32
    return %arg0, %arg1, %c0_i32 : i32, i32, i32
  }
  func.func @transform_2(%arg0: i32, %arg1: i32, %arg2: memref<1xi32, #tpu.memory_space<smem>>) -> (i32, i32) {
    %c0_i32 = arith.constant 0 : i32
    %c0_i32_0 = arith.constant 0 : i32
    return %arg0, %c0_i32 : i32, i32
  }
  func.func @transform_3(%arg0: i32, %arg1: i32, %arg2: memref<1xi32, #tpu.memory_space<smem>>) -> (i32, i32) {
    %c0_i32 = arith.constant 0 : i32
    %c0_i32_0 = arith.constant 0 : i32
    return %arg0, %c0_i32 : i32, i32
  }
  func.func @transform_4(%arg0: i32, %arg1: i32, %arg2: memref<1xi32, #tpu.memory_space<smem>>) -> (i32, i32) {
    %c0_i32 = arith.constant 0 : i32
    %c0_i32_0 = arith.constant 0 : i32
    %c0_i32_1 = arith.constant 0 : i32
    return %c0_i32, %c0_i32_0 : i32, i32
  }
  func.func @transform_5(%arg0: i32, %arg1: i32, %arg2: memref<1xi32, #tpu.memory_space<smem>>) -> (i32, i32) {
    %c0_i32 = arith.constant 0 : i32
    %c0_i32_0 = arith.constant 0 : i32
    %c0_i32_1 = arith.constant 0 : i32
    return %c0_i32, %c0_i32_0 : i32, i32
  }
  func.func @transform_6(%arg0: i32, %arg1: i32, %arg2: memref<1xi32, #tpu.memory_space<smem>>) -> (i32, i32) {
    %c0_i32 = arith.constant 0 : i32
    %c0_i32_0 = arith.constant 0 : i32
    %c0_i32_1 = arith.constant 0 : i32
    return %c0_i32, %c0_i32_0 : i32, i32
  }
  func.func @transform_7(%arg0: i32, %arg1: i32, %arg2: memref<1xi32, #tpu.memory_space<smem>>) -> (i32, i32) {
    %c0_i32 = arith.constant 0 : i32
    %c0_i32_0 = arith.constant 0 : i32
    %c0_i32_1 = arith.constant 0 : i32
    return %c0_i32, %c0_i32_0 : i32, i32
  }
  func.func @transform_8(%arg0: i32, %arg1: i32, %arg2: memref<1xi32, #tpu.memory_space<smem>>) -> (i32, i32) {
    %c0_i32 = arith.constant 0 : i32
    %c0_i32_0 = arith.constant 0 : i32
    return %arg0, %c0_i32 : i32, i32
  }
  func.func @transform_9(%arg0: i32, %arg1: i32, %arg2: memref<1xi32, #tpu.memory_space<smem>>) -> (i32, i32, i32) {
    %c0_i32 = arith.constant 0 : i32
    %c0_i32_0 = arith.constant 0 : i32
    return %arg0, %arg1, %c0_i32 : i32, i32, i32
  }
  func.func @transform_10(%arg0: i32, %arg1: i32, %arg2: memref<1xi32, #tpu.memory_space<smem>>) -> (i32, i32) {
    %c0_i32 = arith.constant 0 : i32
    %c0_i32_0 = arith.constant 0 : i32
    return %arg0, %c0_i32 : i32, i32
  }
  func.func @transform_11(%arg0: i32, %arg1: i32, %arg2: memref<1xi32, #tpu.memory_space<smem>>) -> (i32, i32) {
    %c0_i32 = arith.constant 0 : i32
    %c0_i32_0 = arith.constant 0 : i32
    return %arg0, %c0_i32 : i32, i32
  }
}

</mosaic_0001>

<bundles_post_ra>
// kernel: tpu_custom_call.1
= control target key start
LH: loop header
LB: loop body
LE: loop exit
PB: predicated region body
PF: predicated region fallthrough
CT: control target
= control target key end

     0   :  { %s6535_s0 = inlined_call_operand.<no memory space> [shape: s32[1], index: 0, kind: input, shape index: {}]   ;;  %s6536_s1 = inlined_call_operand.vmem [shape: s32[4,1], index: 1, kind: input, shape index: {}]   ;;  %s6537_s2 = inlined_call_operand.vmem [shape: f32[4,40,16], index: 2, kind: input, shape index: {}]   ;;  %s6538_s3 = inlined_call_operand.vmem [shape: f32[4,64], index: 3, kind: input, shape index: {}]   ;;  %s6539_s4 = inlined_call_operand.vmem [shape: f32[4,128], index: 4, kind: input, shape index: {}]   ;;  %s6540_s5 = inlined_call_operand.vmem [shape: bf16[16,512], index: 5, kind: input, shape index: {}]   ;;  %s6541_s6 = inlined_call_operand.vmem [shape: bf16[64,512], index: 6, kind: input, shape index: {}]   ;;  %s6542_s7 = inlined_call_operand.vmem [shape: f32[1,512], index: 7, kind: input, shape index: {}]   ;;  %s6543_s8 = inlined_call_operand.vmem [shape: bf16[128,64], index: 8, kind: input, shape index: {}]   ;;  %s6544_s9 = inlined_call_operand.vmem [shape: f32[4,64], index: 9, kind: input, shape index: {}]   ;;  %s6545_s10 = inlined_call_operand.hbm [shape: f32[4,40,64], index: 10, kind: output, shape index: {0}]   ;;  %s6546_s11 = inlined_call_operand.hbm [shape: f32[4,64], index: 11, kind: output, shape index: {1}]   ;;  %s6547_s12 = inlined_call_operand.hbm [shape: f32[4,128], index: 12, kind: output, shape index: {2}]  }
   0x1   :  { %6549 = sst [smem:[#allocation13_spill]] %s6536_s1 }
   0x2   :  { %6550 = sst [smem:[#allocation14_spill]] %s6537_s2 }
   0x3   :  { %6551 = sst [smem:[#allocation15_spill]] %s6538_s3 }
   0x4   :  { %6552 = sst [smem:[#allocation16_spill]] %s6539_s4 }
   0x5   :  { %18 = sst [smem:[#allocation4]] %s6535_s0 }
   0x6   :  { %19 = vsyncpa [#allocation7], 0 }
   0x7   :  { %21 = vsyncpa [#allocation7 + $0x1], 0 }
   0x8   :  { %22 = vsyncpa [#allocation9], 0  ;;  %s5269_s23 = smov 0   ;;  %s5271_s24 = smov 0  }
   0x9   :  { %s5273_s25 = smov 0   ;;  %s5275_s26 = smov 0  }
   0xa   :  { %s5277_s27 = smov 0   ;;  %s5279_s28 = smov 0  }
   0xb LB: > { %s4259_s0 = sadd.s32 4294967295, %s5188_s28   ;;  %s4260_s29 = sadd.s32 4294967294, %s5188_s28   ;;  %s5188_s28 = sphi %s5279_s28, %s28_s28   ;;  %s5184_s27 = sphi %s5277_s27, %s6565_s27   ;;  %s5180_s26 = sphi %s5275_s26, %s6564_s26   ;;  %s5176_s25 = sphi %s5273_s25, %s6563_s25   ;;  %s5172_s24 = sphi %s5271_s24, %s6562_s24   ;;  %s5168_s23 = sphi %s5269_s23, %s6561_s23  }
   0xc   : > { %s37_s30 = sadd.s32 1, %s5184_s27  ;;  %s75_s13 = sadd.s32 1, %s5176_s25 }
   0xd   : > { %p38_p0 = scmp.ge.s32.totalorder %s37_s30, 5  ;;  %p82_p1 = scmp.ne.s32.totalorder %s5176_s25, %s5172_s24 }
   0xe   : > { %p83_p2 = scmp.eq.s32.totalorder %s5188_s28, 0  ;;  %p5306_p3 = scmp.eq.s32.totalorder %s4259_s0, 4 }
   0xf   : > { %s6567_s30 = smov (%p38_p0, %s37_s30), 0  ;;  %p281_p6 = scmp.ne.s32.totalorder %s5172_s24, %s5168_s23 }
  0x10   : > { %p84_p4 = por %p83_p2, %p82_p1  ;;  %p5314_p5 = por %p5306_p3, %p82_p1 }
  0x11   : > { %s71_s16 = ssub.s32 %s5184_s27, %s6567_s30  ;;  %p282_p8 = scmp.eq.s32.totalorder %s4260_s29, 4 }
  0x12   : > { %p73_p7 = scmp.eq.s32.totalorder %s71_s16, 0  ;;  %p4266_p10 = scmp.ge.s32.totalorder %s5188_s28, 5 }
  0x13   : > { %p5325_p9 = por %p282_p8, %p281_p6 }
  0x14   : > { %s5323_s17 = scalar_select %p73_p7, %s5176_s25, %s75_s13  }
  0x15   : > { %390 = sbr.rel (%p4266_p10) target bundleno = 38 (0x26), region = 48 }
  0x1a   : > { %393 = sbr.rel (!%p84_p4) target bundleno = 38 (0x26), region = 52  ;;  %s395_s19 = sand.u32 (%p84_p4), 1, %s5176_s25  }
  0x1b   : > { %s4268_s20 = sshll.u32 (%p84_p4), %s5184_s27, 3  ;;  %s4267_s21 = sshll.u32 (%p84_p4), %s395_s19, 5 }
  0x1c   : > { %s6556_s2 = sld [smem:[#allocation14_spill]] (%p84_p4)  ;;  %s397_s29 = scalar_lea.vmem (%p84_p4), [#allocation5], %s4267_s21 }
  0x22   : > { %s402_s16 = scalar_lea.vmem %s6556_s2, %s4268_s20 }
  0x23   : > { %v437_v0 = vld [vmem:[%s402_s16] sm:$0xff]  ;;  %v439_v1 = vld [vmem:[%s402_s16 + $0x28] sm:$0xff]  ;;  %v441_v2 = vld [vmem:[%s402_s16 + $0x50] sm:$0xff] }
  0x24   : > { %438 = vst [vmem:[%s397_s29] sm:$0xff] %v437_v0  ;;  %440 = vst [vmem:[%s397_s29 + $0x8] sm:$0xff] %v439_v1  ;;  %v443_v3 = vld [vmem:[%s402_s16 + $0x78] sm:$0xff] }
  0x25   : > { %442 = vst [vmem:[%s397_s29 + $0x10] sm:$0xff] %v441_v2  ;;  %444 = vst [vmem:[%s397_s29 + $0x18] sm:$0xff] %v443_v3 }
  0x26 PF: > { %p4269_p11 = scmp.ge.s32.totalorder %s5188_s28, 1  ;;  %p449_p12 = scmp.lt.s32.totalorder %s5188_s28, 6 }
  0x28   : > { %p450_p13 = pnand %p4269_p11, %p449_p12 }
  0x29   : > { %s6548_s13 = sand.u32 (!%p450_p13), 1, %s5172_s24   ;;  %p4272_p0 = scmp.ne.s32.totalorder (!%p450_p13), %s5180_s26, 0 }
  0x2a   : > { %453 = sbr.rel (%p450_p13) target bundleno = 4074 (0xfea), region = 90  ;;  %s4270_s19 = sshll.u32 (!%p450_p13), %s6548_s13, 5 }
  0x2b   : > { %s5340_s20 = scalar_lea.vmem (!%p450_p13), [#allocation5], %s4270_s19  ;;  %s5342_s21 = scalar_lea.vmem (!%p450_p13), [#allocation6], %s4270_s19 }
  0x2f   : > { %533 = sbr.rel (%p4272_p0) target bundleno = 56 (0x38), region = 98  ;;  %s6557_s3 = sld [smem:[#allocation15_spill]] (!%p4272_p0) }
  0x30   : > { %s6558_s4 = sld [smem:[#allocation16_spill]] (!%p4272_p0) }
  0x34   : > { %vm535_vm0 = vcmask 519168  }
  0x35   : > { %v534_v4 = vld [vmem:[%s6557_s3] sm:$0xf] }
  0x36   : > { %v537_v5 = vld [vmem:[%s6558_s4] sm:$0xf]  ;;  %536 = vst.msk [vmem:[#allocation8] sm:$0xf] %vm535_vm0, %v534_v4 }
  0x37   : > { %538 = vst [vmem:[#allocation10] sm:$0xf] %v537_v5 }
  0x38 PF: > { %s5352_s13 = sshll.u32 %s5180_s26, 3  ;;  %s540_s19 = sld [smem:[#allocation4]] }
  0x3e   : > { %p4274_p1 = scmp.lt.s32.totalorder %s5352_s13, %s540_s19 }
  0x40   : > { %544 = sbr.rel (%p4274_p1) target bundleno = 72 (0x48), region = 102 }
  0x45   : > { %vm545_vm1 = vcmask 523264   ;;  %v5190_v6 = vmov 0.0  }
  0x46   : > { %546 = vst.msk [vmem:[%s5342_s21] sm:$0xff] %vm545_vm1, %v5190_v6  ;;  %547 = vst.msk [vmem:[%s5342_s21 + $0x8] sm:$0xff] %vm545_vm1, %v5190_v6 }
  0x47   : > { %548 = vst.msk [vmem:[%s5342_s21 + $0x10] sm:$0xff] %vm545_vm1, %v5190_v6  ;;  %549 = vst.msk [vmem:[%s5342_s21 + $0x18] sm:$0xff] %vm545_vm1, %v5190_v6 }
  0x48 PF: > { %p4275_p2 = scmp.ge.s32.totalorder %s5352_s13, %s540_s19 }
  0x49   : > { %s6559_s1 = sld [smem:[#allocation13_spill]] (!%p4275_p2)  ;;  %s1298_s16 = sadd.s32 (!%p4275_p2), 1, %s5352_s13 }
  0x4a   : > { %553 = sbr.rel (%p4275_p2) target bundleno = 4021 (0xfb5), region = 106  ;;  %s2477_s29 = sadd.s32 (!%p4275_p2), 4, %s5352_s13 }
  0x4b   : > { %s3263_s19 = sadd.s32 (!%p4275_p2), 6, %s5352_s13  ;;  %s2084_s0 = sadd.s32 (!%p4275_p2), 3, %s5352_s13 }
  0x4f   : > { %v4715_v7 = vld [vmem:[%s6540_s5 + $0x4] ss:$16 sps:$4 sm:$0xff]   ;;  %v4717_v8 = vld [vmem:[%s6540_s5 + $0xc] ss:$16 sps:$4 sm:$0xff]   ;;  %v5191_v9 = vmov 0   ;;  %vm606_vm2 = vcmask 130048   ;;  %v1225_v25 = vstv %s5352_s13  ;;  %v566_v48 = vlaneseq }
  0x50   : > { %645 = vmatprep.mubr.bf16.mxu0 %v5191_v9  ;;  %698 = vmatprep.mubr.bf16.mxu1 %v5191_v9  ;;  %v4719_v10 = vld [vmem:[%s6540_s5] ss:$16 sps:$4 sm:$0xff]   ;;  %v4720_v11 = vld [vmem:[%s6540_s5 + $0x8] ss:$16 sps:$4 sm:$0xff]   ;;  %v5381_v15 = vld [vmem:[%s6541_s6 + $0x64] ss:$16 sps:$4 sm:$0xff]   ;;  %v1619_v49 = vstv %s1298_s16 }
  0x51   : > { %627 = vmatprep.subr.bf16.mxu0 %v4715_v7  ;;  %v554_v12 = vld [vmem:[%s5340_s20] sm:$0xff]  ;;  %4713 = vset.pattern.permute.xlu0 %v5191_v9  ;;  %v555_v13 = vld [vmem:[%s5340_s20 + $0x8] sm:$0xff]  ;;  %v556_v19 = vld [vmem:[%s5340_s20 + $0x10] sm:$0xff]  ;;  %vm862_vm4 = vcmask 523264   ;;  %v5192_v40 = vmov 0.0   ;;  %vm5193_vm5 = vmmov 0   ;;  %v2798_v50 = vstv %s2477_s29 }
  0x52   : > { %680 = vmatprep.subr.bf16.mxu1 %v4717_v8  ;;  %4714 = vset.pattern.permute.xlu1 %v5191_v9  ;;  %v558_v14 = vpack.c.bf16 %v555_v13, %v554_v12  ;;  %v5386_v16 = vld [vmem:[%s6541_s6 + $0x60] ss:$16 sps:$4 sm:$0xff]   ;;  %v5391_v17 = vld [vmem:[%s6541_s6 + $0x44] ss:$16 sps:$4 sm:$0xff]   ;;  %v557_v20 = vld [vmem:[%s5340_s20 + $0x18] sm:$0xff]  ;;  %v3584_v52 = vstv %s3263_s19  ;;  %v5573_v53 = vshrl.u32 %v566_v48, 7 }
  0x53   : > { %628 = vmatpush1.bf16.msra.mxu0 %v4719_v10  ;;  %681 = vmatpush1.bf16.msra.mxu1 %v4720_v11  ;;  %v5399_v18 = vld [vmem:[%s6541_s6 + $0x40] ss:$16 sps:$4 sm:$0xff]   ;;  %v5410_v21 = vld [vmem:[%s6541_s6 + $0x24] ss:$16 sps:$4 sm:$0xff]   ;;  %v559_v22 = vpack.c.bf16 %v557_v20, %v556_v19  ;;  %v5437_v28 = vld [vmem:[%s6541_s6 + $0x6c] ss:$16 sps:$4 sm:$0xff]  }
  0x54   : > { %874 = vmatprep.subr.bf16.mxu1 %v5381_v15  ;;  %v5416_v23 = vld [vmem:[%s6541_s6 + $0x20] ss:$16 sps:$4 sm:$0xff]   ;;  %v5422_v24 = vld [vmem:[%s6541_s6 + $0x4] ss:$16 sps:$4 sm:$0xff]   ;;  %v5452_v31 = vld [vmem:[%s6541_s6 + $0x68] ss:$16 sps:$4 sm:$0xff]   ;;  %4476 = vmatprep.subr.bf16.mxu0 %v5192_v40 }
  0x55   : > { %v5428_v26 = vld [vmem:[%s6541_s6] ss:$16 sps:$4 sm:$0xff]   ;;  %v5461_v33 = vld [vmem:[%s6541_s6 + $0x4c] ss:$16 sps:$4 sm:$0xff]   ;;  %v5468_v34 = vld [vmem:[%s6541_s6 + $0x48] ss:$16 sps:$4 sm:$0xff]  }
  0x56   : > { %4280 = vmatmul.mubr.msk.bf16.vlgmr.msra.gmra.mxu0 %vm606_vm2, %v558_v14  ;;  %4282 = vmatmul.mubr.msk.bf16.vlgmr.msra.gmra.mxu1 %vm606_vm2, %v558_v14  ;;  %v5430_v27 = vld [vmem:[#allocation8] sm:$0xf]  ;;  %v5475_v35 = vld [vmem:[%s6541_s6 + $0x2c] ss:$16 sps:$4 sm:$0xff]   ;;  %v5481_v36 = vld [vmem:[%s6541_s6 + $0x28] ss:$16 sps:$4 sm:$0xff]  }
  0x57   : > { %875 = vmatpush1.bf16.msra.mxu1 %v5386_v16  ;;  %655 = vmatprep.mubr.bf16.mxu0 %v5191_v9  ;;  %v5442_v29 = vld [vmem:[%s6559_s1] sm:$0xf]  ;;  %v781_v32 = vpack.c.bf16 %v5430_v27, %v5430_v27  ;;  %v5487_v37 = vld [vmem:[%s6541_s6 + $0xc] ss:$16 sps:$4 sm:$0xff]   ;;  %v5493_v38 = vld [vmem:[%s6541_s6 + $0x8] ss:$16 sps:$4 sm:$0xff]  }
  0x58   : > { %876 = vmatprep.subr.bf16.mxu1 %v5391_v17  ;;  %708 = vmatprep.mubr.bf16.mxu1 %v5191_v9  ;;  %vm1226_vm3 = vcmp.gt.s32.totalorder %v5442_v29, %v1225_v25  ;;  %v5511_v39 = vld [vmem:[%s6543_s8 + $0x38] sm:$0xff]   ;;  %v5518_v41 = vld [vmem:[%s6543_s8 + $0x30] sm:$0xff]   ;;  %v5525_v42 = vld [vmem:[%s6543_s8 + $0x28] sm:$0xff]   ;;  %vm1620_vm6 = vcmp.gt.s32.totalorder %v5442_v29, %v1619_v49  ;;  %vm2799_vm7 = vcmp.gt.s32.totalorder %v5442_v29, %v2798_v50  ;;  %v568_v55 = vsub.s32 0, %v5573_v53  ;;  %s1691_s20 = sadd.s32 2, %s5352_s13  ;;  %s2870_s16 = sadd.s32 5, %s5352_s13 }
  0x59   : > { %v1227_v30 = vsel %vm1226_vm3, 1, %v5191_v9  ;;  %4477 = vmatpush3.bf16.msra.mxu0 %v5511_v39  ;;  %v5533_v43 = vld [vmem:[%s6543_s8 + $0x20] sm:$0xff]   ;;  %v5540_v44 = vld [vmem:[%s6543_s8 + $0x18] sm:$0xff]   ;;  %v5546_v45 = vld [vmem:[%s6543_s8 + $0x10] sm:$0xff]   ;;  %v1621_v51 = vsel %vm1620_vm6, 1, %v5191_v9  ;;  %v2800_v54 = vsel %vm2799_vm7, 1, %v5191_v9  ;;  %vm3585_vm8 = vcmp.gt.s32.totalorder %v5442_v29, %v3584_v52 }
  0x5a   : > { %1229 = vperm.xlu0 %4713, %v1227_v30   ;;  %4478 = vmatprep.subr.bf16.mxu0 %v5192_v40  ;;  %v5555_v46 = vld [vmem:[%s6543_s8 + $0x8] sm:$0xff]   ;;  %v5562_v47 = vld [vmem:[%s6543_s8] sm:$0xff]   ;;  %v576_v56 = vsub.s32 2, %v5573_v53  ;;  %v3586_v58 = vsel %vm3585_vm8, 1, %v5191_v9  ;;  %v572_v59 = vsub.s32 1, %v5573_v53  ;;  %v580_v60 = vsub.s32 3, %v5573_v53 }
  0x5b   : > { %877 = vmatpush1.bf16.msra.mxu1 %v5399_v18  ;;  %v564_v57 = vld [vmem:[%s6542_s7] sm:$0xf]  ;;  %vm1124_vm9 = vcmask 1041409   ;;  %vm1127_vm10 = vcmask 1042434   ;;  %vm1130_vm11 = vcmask 1043459   ;;  %vm1293_vm13 = vcmask 516096  }
  0x5c   : > { %878 = vmatprep.subr.bf16.mxu1 %v5410_v21  ;;  %v569_v61 = vrot.slane %v564_v57, %v568_v55  ;;  %v577_v62 = vrot.slane %v564_v57, %v576_v56  ;;  %v573_v63 = vrot.slane %v564_v57, %v572_v59  ;;  %v581_v0 = vrot.slane %v564_v57, %v580_v60  ;;  %s3656_s29 = sadd.s32 7, %s5352_s13 }
  0x5d   : > { %4479 = vmatpush3.bf16.msra.mxu0 %v5518_v41 }
  0x5e   : > { %4281 = vmatmul.mubr.msk.bf16.gmra.mxu0 %vm606_vm2, %v559_v22  ;;  %4283 = vmatmul.mubr.msk.bf16.gmra.mxu1 %vm606_vm2, %v559_v22 }
  0x5f   : > { %879 = vmatpush1.bf16.msra.mxu1 %v5416_v23  ;;  %898 = vmatprep.mubr.bf16.mxu1 %v5191_v9 }
  0x60   : > { %880 = vmatprep.subr.bf16.mxu1 %v5422_v24  ;;  %4480 = vmatprep.subr.bf16.mxu0 %v5192_v40 }
  0x61   : > { %4481 = vmatpush3.bf16.msra.mxu0 %v5525_v42  ;;  %4492 = vmatprep.mubr.msk.bf16.mxu0 %vm5193_vm5, %v5192_v40 }
  0x62   : > { %4482 = vmatprep.subr.bf16.mxu0 %v5192_v40  ;;  %1623 = vperm.xlu0 %4713, %v1621_v51  }
  0x63   : > { %881 = vmatpush1.bf16.msra.mxu1 %v5428_v26 }
  0x64   : > { %915 = vmatprep.subr.bf16.mxu1 %v5437_v28 }
  0x65   : > { %4483 = vmatpush3.bf16.msra.mxu0 %v5533_v43 }
  0x66   : > { %4300 = vmatmul.mubr.msk.bf16.vlgmr.msra.gmra.mxu1 %vm862_vm4, %v781_v32  ;;  %4484 = vmatprep.subr.bf16.mxu0 %v5192_v40 }
  0x67   : > { %916 = vmatpush1.bf16.msra.mxu1 %v5452_v31  ;;  %939 = vmatprep.mubr.bf16.mxu1 %v5191_v9 }
  0x68   : > { %917 = vmatprep.subr.bf16.mxu1 %v5461_v33  ;;  %2802 = vperm.xlu0 %4713, %v2800_v54  }
  0x69   : > { %4485 = vmatpush3.bf16.msra.mxu0 %v5540_v44 }
  0x6a   : > { %4486 = vmatprep.subr.bf16.mxu0 %v5192_v40 }
  0x6b   : > { %918 = vmatpush1.bf16.msra.mxu1 %v5468_v34 }
  0x6c   : > { %919 = vmatprep.subr.bf16.mxu1 %v5475_v35  ;;  %3588 = vperm.xlu0 %4713, %v3586_v58  }
  0x6d   : > { %4487 = vmatpush3.bf16.msra.mxu0 %v5546_v45 }
  0x6e   : > { %4488 = vmatprep.subr.bf16.mxu0 %v5192_v40 }
  0x6f   : > { %920 = vmatpush1.bf16.msra.mxu1 %v5481_v36 }
  0x70   : > { %921 = vmatprep.subr.bf16.mxu1 %v5487_v37 }
  0x71   : > { %4489 = vmatpush3.bf16.msra.mxu0 %v5555_v46 }
  0x72   : > { %4490 = vmatprep.subr.bf16.mxu0 %v5192_v40 }
  0x73   : > { %922 = vmatpush1.bf16.msra.mxu1 %v5493_v38 }
  0x74   : > { %1319 = vmatprep.subr.bf16.mxu1 %v5381_v15 }
  0x75   : > { %4491 = vmatpush3.bf16.msra.mxu0 %v5562_v47 }
  0x76   : > { %4301 = vmatmul.mubr.msk.bf16.vlgmr.msra.gmra.mxu1 %vm862_vm4, %v781_v32  ;;  %4496 = vmatprep.subr.bf16.mxu0 %v5192_v40 }
  0x77   : > { %1320 = vmatpush1.bf16.msra.mxu1 %v5386_v16  ;;  %1343 = vmatprep.mubr.bf16.mxu1 %v5191_v9 }
  0x78   : > { %1321 = vmatprep.subr.bf16.mxu1 %v5391_v17 }
  0x7b   : > { %1322 = vmatpush1.bf16.msra.mxu1 %v5399_v18 }
  0x7c   : > { %1323 = vmatprep.subr.bf16.mxu1 %v5410_v21 }
  0x7f   : > { %1324 = vmatpush1.bf16.msra.mxu1 %v5416_v23 }
  0x80   : > { %1325 = vmatprep.subr.bf16.mxu1 %v5422_v24 }
  0x83   : > { %1326 = vmatpush1.bf16.msra.mxu1 %v5428_v26 }
  0x84   : > { %1360 = vmatprep.subr.bf16.mxu1 %v5437_v28 }
 0x116   : > { %v647_v1 = vpop.f32.mrf.mxu0  ;;  %v700_v2 = vpop.f32.mrf.mxu1 }
 0x117   : > { %v648_v3 = vadd.f32 %v647_v1, %v569_v61  ;;  %v701_v4 = vadd.f32 %v700_v2, %v577_v62 }
 0x118   : > { %v649_v5 = vpop.f32.mrf.mxu0  ;;  %v702_v6 = vpop.f32.mrf.mxu1 }
 0x119   : > { %719 = vst [vmem:[#allocation2] sm:$0xff] %v648_v3  ;;  %721 = vst [vmem:[#allocation2 + $0x10] sm:$0xff] %v701_v4  ;;  %v650_v7 = vadd.f32 %v649_v5, %v573_v63  ;;  %v703_v8 = vadd.f32 %v702_v6, %v581_v0  ;;  %v5194_v6 = vmov 1966171168  }
 0x11a   : > { %v651_v10 = vpop.f32.mrf.mxu0  ;;  %v704_v11 = vpop.f32.mrf.mxu1 }
 0x11b   : > { %720 = vst [vmem:[#allocation2 + $0x8] sm:$0xff] %v650_v7  ;;  %722 = vst [vmem:[#allocation2 + $0x18] sm:$0xff] %v703_v8  ;;  %v652_v12 = vadd.f32 %v651_v10, %v569_v61  ;;  %v705_v13 = vadd.f32 %v704_v11, %v577_v62  ;;  %v955_v7 = vunpack.c.l.s4 %v5194_v6 }
 0x11c   : > { %v653_v14 = vpop.f32.mrf.mxu0  ;;  %v706_v19 = vpop.f32.mrf.mxu1 }
 0x11d   : > { %724 = vst [vmem:[#allocation2 + $0x20] sm:$0xff] %v652_v12  ;;  %726 = vst [vmem:[#allocation2 + $0x30] sm:$0xff] %v705_v13  ;;  %v654_v20 = vadd.f32 %v653_v14, %v573_v63  ;;  %v707_v22 = vadd.f32 %v706_v19, %v581_v0  ;;  %v956_v8 = vunpack.c.0.s8 %v955_v7 }
 0x11e   : > { %v657_v25 = vpop.f32.mrf.mxu0  ;;  %v710_v30 = vpop.f32.mrf.mxu1 }
 0x11f   : > { %725 = vst [vmem:[#allocation2 + $0x28] sm:$0xff] %v654_v20  ;;  %727 = vst [vmem:[#allocation2 + $0x38] sm:$0xff] %v707_v22  ;;  %v658_v32 = vadd.f32 %v657_v25, %v569_v61  ;;  %v711_v48 = vadd.f32 %v710_v30, %v577_v62  ;;  %v5586_v11 = vsub.s32 %v956_v8, %v5573_v53 }
 0x120   : > { %v659_v49 = vpop.f32.mrf.mxu0  ;;  %v712_v50 = vpop.f32.mrf.mxu1 }
 0x121   : > { %729 = vst [vmem:[#allocation2 + $0x40] sm:$0xff] %v658_v32  ;;  %731 = vst [vmem:[#allocation2 + $0x50] sm:$0xff] %v711_v48  ;;  %v660_v51 = vadd.f32 %v659_v49, %v573_v63  ;;  %v713_v52 = vadd.f32 %v712_v50, %v581_v0 }
 0x122   : > { %v661_v54 = vpop.f32.mrf.mxu0  ;;  %v714_v55 = vpop.f32.mrf.mxu1  ;;  %v774_v30 = vld [vmem:[#allocation2] ss:$8 sm:$0xf] }
 0x123   : > { %730 = vst [vmem:[#allocation2 + $0x48] sm:$0xff] %v660_v51  ;;  %732 = vst [vmem:[#allocation2 + $0x58] sm:$0xff] %v713_v52  ;;  %v662_v56 = vadd.f32 %v661_v54, %v569_v61  ;;  %v715_v57 = vadd.f32 %v714_v55, %v577_v62 }
 0x124   : > { %v663_v58 = vpop.f32.mrf.mxu0  ;;  %v716_v59 = vpop.f32.mrf.mxu1 }
 0x125   : > { %734 = vst [vmem:[#allocation2 + $0x60] sm:$0xff] %v662_v56  ;;  %736 = vst [vmem:[#allocation2 + $0x70] sm:$0xff] %v715_v57  ;;  %v664_v60 = vadd.f32 %v663_v58, %v573_v63  ;;  %v717_v1 = vadd.f32 %v716_v59, %v581_v0 }
 0x126   : > { %v900_v2 = vpop.f32.mrf.mxu1  ;;  %v776_v32 = vld [vmem:[#allocation2 + $0x20] ss:$8 sm:$0xf] }
 0x127   : > { %735 = vst [vmem:[#allocation2 + $0x68] sm:$0xff] %v664_v60  ;;  %737 = vst [vmem:[#allocation2 + $0x78] sm:$0xff] %v717_v1 }
 0x128   : > { %v902_v3 = vpop.f32.mrf.mxu1 }
 0x129   : > { %v952_v61 = vcombine.low %v900_v2, %v902_v3 }
 0x12a   : > { %v904_v4 = vpop.f32.mrf.mxu1  ;;  %v778_v51 = vld [vmem:[#allocation2 + $0x40] ss:$8 sm:$0xf] }
 0x12b   : > { %v960_v63 = vrot.slane %v952_v61, %v5586_v11  ;;  %v5592_v61 = vld [vmem:[#allocation10] sm:$0xf] }
 0x12c   : > { %v905_v5 = vpop.f32.mrf.mxu1 }
 0x12e   : > { %v780_v52 = vld [vmem:[#allocation2 + $0x60] ss:$8 sm:$0xf] }
 0x136   : > { %v941_v10 = vpop.f32.mrf.mxu1 }
 0x138   : > { %v943_v62 = vpop.f32.mrf.mxu1 }
 0x139   : > { %v953_v12 = vcombine.low %v941_v10, %v943_v62 }
 0x13a   : > { %v945_v13 = vpop.f32.mrf.mxu1 }
 0x13b   : > { %v967_v0 = vrot.slane %v953_v12, %v5586_v11  ;;  %v1057_v13 = vrot.slane %v5592_v61, %v5586_v11 }
 0x13c   : > { %v946_v14 = vpop.f32.mrf.mxu1 }
 0x13d   : > { %v968_v19 = vcombine.low %v960_v63, %v967_v0  ;;  %v969_v20 = vcombine.high %v960_v63, %v967_v0  ;;  %v1058_v63 = vcombine.high %v1057_v13, %v1057_v13  ;;  %v1065_v0 = vrot.slane %v1057_v13, %v5586_v11 }
 0x13f   : > { %v976_v22 = vrot.slane %v968_v19, %v5586_v11  ;;  %v983_v25 = vrot.slane %v969_v20, %v5586_v11  ;;  %v1072_v19 = vrot.slane %v1058_v63, %v5586_v11 }
 0x141   : > { %v984_v48 = vcombine.high %v976_v22, %v976_v22  ;;  %v985_v53 = vcombine.high %v983_v25, %v983_v25  ;;  %v990_v49 = vadd.f32 %v976_v22, %v774_v30  ;;  %v991_v50 = vadd.f32 %v983_v25, %v776_v32 }
 0x142   : > { %v1073_v32 = vcombine.high %v1065_v0, %v1065_v0 }
 0x143   : > { %v992_v54 = vadd.f32 %v984_v48, %v778_v51  ;;  %v993_v55 = vadd.f32 %v985_v53, %v780_v52  ;;  %v4302_v56 = vmul.f32 -1.442695, %v990_v49  ;;  %v4303_v57 = vmul.f32 -1.442695, %v991_v50 }
 0x144   : > { %v1022_v60 = vrot.slane %v990_v49, 3  ;;  %v1023_v1 = vrot.slane %v991_v50, 3  ;;  %v1074_v49 = vcombine.high %v1072_v19, %v1072_v19 }
 0x145   : > { %4753 = vpow2.f32 %v4302_v56  ;;  %v4304_v58 = vmul.f32 -1.442695, %v992_v54  ;;  %v4305_v59 = vmul.f32 -1.442695, %v993_v55  ;;  %v1024_v10 = vrot.slane %v992_v54, 3 }
 0x146   : > { %4755 = vpow2.f32 %v4303_v57  ;;  %v1025_v12 = vrot.slane %v993_v55, 3 }
 0x147   : > { %4757 = vpow2.f32 %v4304_v58 }
 0x148   : > { %4759 = vpow2.f32 %v4305_v59 }
 0x149   : > { %4761 = vtanh.f32 %v1022_v60 }
 0x14a   : > { %4763 = vtanh.f32 %v1023_v1 }
 0x152   : > { %v4754_v2 = vpop.eup %4753 }
 0x153   : > { %v4756_v3 = vpop.eup %4755  ;;  %v1006_v4 = vadd.f32 1.0, %v4754_v2 }
 0x154   : > { %v4758_v5 = vpop.eup %4757  ;;  %v1007_v6 = vadd.f32 1.0, %v4756_v3 }
 0x155   : > { %v4760_v7 = vpop.eup %4759  ;;  %v1008_v8 = vadd.f32 1.0, %v4758_v5  ;;  %4765 = vrcp.f32 %v1006_v4 }
 0x156   : > { %v1009_v62 = vadd.f32 1.0, %v4760_v7  ;;  %4767 = vrcp.f32 %v1007_v6  ;;  %v4762_v14 = vpop.eup %4761 }
 0x157   : > { %4769 = vrcp.f32 %v1008_v8  ;;  %v4764_v20 = vpop.eup %4763 }
 0x158   : > { %4771 = vrcp.f32 %v1009_v62 }
 0x159   : > { %4773 = vtanh.f32 %v1024_v10 }
 0x15a   : > { %4775 = vtanh.f32 %v1025_v12 }
 0x162   : > { %v4766_v22 = vpop.eup %4765 }
 0x163   : > { %v4768_v25 = vpop.eup %4767  ;;  %v1042_v30 = vrot.slane %v4766_v22, 1  ;;  %v1034_v51 = vmul.f32 %v4766_v22, %v4762_v14 }
 0x164   : > { %v4770_v48 = vpop.eup %4769  ;;  %v1043_v53 = vrot.slane %v4768_v25, 1  ;;  %v1035_v56 = vmul.f32 %v4768_v25, %v4764_v20  ;;  %v1099_v20 = vrot.slane %v4766_v22, 2 }
 0x165   : > { %v4772_v50 = vpop.eup %4771  ;;  %v1044_v52 = vrot.slane %v4770_v48, 1  ;;  %v1079_v54 = vmul.f32 %v1065_v0, %v1042_v30 }
 0x166   : > { %v4774_v55 = vpop.eup %4773  ;;  %v1045_v57 = vrot.slane %v4772_v50, 1  ;;  %v1080_v58 = vmul.f32 %v1072_v19, %v1043_v53 }
 0x167   : > { %v4776_v59 = vpop.eup %4775  ;;  %v1036_v60 = vmul.f32 %v4774_v55, %v4770_v48  ;;  %v1081_v1 = vmul.f32 %v1073_v32, %v1044_v52  ;;  %v1083_v2 = vadd.f32 %v1079_v54, %v1034_v51  ;;  %v1100_v32 = vrot.slane %v4768_v25, 2 }
 0x168   : > { %v1037_v3 = vmul.f32 %v4776_v59, %v4772_v50  ;;  %v1082_v4 = vmul.f32 %v1074_v49, %v1045_v57  ;;  %v1084_v5 = vadd.f32 %v1080_v58, %v1035_v56  ;;  %v1101_v49 = vrot.slane %v4770_v48, 2 }
 0x169   : > { %v1085_v6 = vadd.f32 %v1081_v1, %v1036_v60  ;;  %v4306_v7 = vclamps-f32 %v1083_v2, 3.0  ;;  %v1102_v54 = vrot.slane %v4772_v50, 2 }
 0x16a   : > { %v1086_v8 = vadd.f32 %v1082_v4, %v1037_v3  ;;  %v4307_v10 = vclamps-f32 %v1084_v5, 3.0 }
 0x16b   : > { %v4308_v62 = vclamps-f32 %v1085_v6, 3.0  ;;  %4777 = vtanh.f32 %v4306_v7 }
 0x16c   : > { %v4309_v12 = vclamps-f32 %v1086_v8, 3.0  ;;  %4779 = vtanh.f32 %v4307_v10  ;;  %v1236_v13 = vcombine.low %v4306_v7, %v4307_v10 }
 0x16d   : > { %4781 = vtanh.f32 %v4308_v62 }
 0x16e   : > { %4783 = vtanh.f32 %v4309_v12  ;;  %v1237_v63 = vcombine.low %v4308_v62, %v4309_v12  ;;  %v1244_v0 = vrot.slane %v1236_v13, %v5586_v11  ;;  %v5626_v62 = vld [vmem:[%s6544_s9] sm:$0xf]  ;;  %v5628_v13 = vpop.permute.xlu0 %1229 }
 0x16f   : > { %vm1231_vm12 = vcmp.eq.s32.totalorder %v5628_v13, 1 }
 0x170   : > { %v1251_v14 = vrot.slane %v1237_v63, %v5586_v11 }
 0x172   : > { %v5600_v19 = vcombine.low %v1244_v0, %v1251_v14 }
 0x178   : > { %v4778_v30 = vpop.eup %4777 }
 0x179   : > { %v4780_v53 = vpop.eup %4779  ;;  %v1107_v51 = vmul.f32 %v4778_v30, %v1099_v20 }
 0x17a   : > { %v4782_v52 = vpop.eup %4781  ;;  %v1108_v55 = vmul.f32 %v4780_v53, %v1100_v32 }
 0x17b   : > { %v4784_v56 = vpop.eup %4783  ;;  %v1109_v57 = vmul.f32 %v4782_v52, %v1101_v49  ;;  %v1111_v59 = vpack.c.bf16 %v1107_v51, %v1107_v51 }
 0x17c   : > { %v1110_v58 = vmul.f32 %v4784_v56, %v1102_v54  ;;  %v1112_v60 = vpack.c.bf16 %v1108_v55, %v1108_v55 }
 0x17d   : > { %v1113_v1 = vpack.c.bf16 %v1109_v57, %v1109_v57  ;;  %v1119_v5 = vunpack.c.l.b16 %v1111_v59 }
 0x17e   : > { %v1114_v2 = vpack.c.bf16 %v1110_v58, %v1110_v58  ;;  %v1120_v3 = vunpack.c.l.b16 %v1112_v60 }
 0x17f   : > { %v1121_v4 = vunpack.c.l.b16 %v1113_v1 }
 0x180   : > { %v1122_v22 = vunpack.c.l.b16 %v1114_v2  ;;  %v1123_v6 = vrot.slane %v1120_v3, 7 }
 0x181   : > { %v1126_v25 = vrot.slane %v1121_v4, 6  ;;  %v1300_v4 = vld [vmem:[#allocation2 + $0x1] ss:$8 sm:$0xf] }
 0x182   : > { %v1125_v48 = vsel %vm1124_vm9, %v1123_v6, %v1119_v5  ;;  %v1129_v50 = vrot.slane %v1122_v22, 5  ;;  %v1302_v5 = vld [vmem:[#allocation2 + $0x21] ss:$8 sm:$0xf] }
 0x183   : > { %v1128_v7 = vsel %vm1127_vm10, %v1126_v25, %v1125_v48 }
 0x184   : > { %v1131_v8 = vsel %vm1130_vm11, %v1129_v50, %v1128_v7  ;;  %v1304_v50 = vld [vmem:[#allocation2 + $0x41] ss:$8 sm:$0xf] }
 0x185   : > { %v1132_v10 = vpack.c.b16 %v1131_v8, %v1131_v8  ;;  %v1306_v7 = vld [vmem:[#allocation2 + $0x61] ss:$8 sm:$0xf] }
 0x187   : > { %4493 = vmatmul.mubr.bf16.vlgmr.msra.gmra.mxu0 %v1132_v10 }
 0x188   : > { %4497 = vmatpush3.bf16.msra.mxu0 %v5511_v39  ;;  %4512 = vmatprep.mubr.msk.bf16.mxu0 %vm5193_vm5, %v5192_v40 }
 0x189   : > { %4498 = vmatprep.subr.bf16.mxu0 %v5192_v40 }
 0x18c   : > { %4499 = vmatpush3.bf16.msra.mxu0 %v5518_v41 }
 0x18d   : > { %4500 = vmatprep.subr.bf16.mxu0 %v5192_v40 }
 0x190   : > { %4501 = vmatpush3.bf16.msra.mxu0 %v5525_v42 }
 0x191   : > { %4502 = vmatprep.subr.bf16.mxu0 %v5192_v40 }
 0x194   : > { %4503 = vmatpush3.bf16.msra.mxu0 %v5533_v43 }
 0x195   : > { %4504 = vmatprep.subr.bf16.mxu0 %v5192_v40 }
 0x198   : > { %4505 = vmatpush3.bf16.msra.mxu0 %v5540_v44 }
 0x199   : > { %4506 = vmatprep.subr.bf16.mxu0 %v5192_v40 }
 0x19c   : > { %4507 = vmatpush3.bf16.msra.mxu0 %v5546_v45 }
 0x19d   : > { %4508 = vmatprep.subr.bf16.mxu0 %v5192_v40 }
 0x1a0   : > { %4509 = vmatpush3.bf16.msra.mxu0 %v5555_v46 }
 0x1a1   : > { %4510 = vmatprep.subr.bf16.mxu0 %v5192_v40 }
 0x1a4   : > { %4511 = vmatpush3.bf16.msra.mxu0 %v5562_v47 }
 0x1a5   : > { %4516 = vmatprep.subr.bf16.mxu0 %v5192_v40 }
 0x247   : > { %v1216_v12 = vpop.f32.mrf.mxu0 }
 0x248   : > { %v4318_v63 = vclamps-f32 %v1216_v12, 3.0 }
 0x249   : > { %v4494_v0 = vpop.f32.mrf.mxu0 }
 0x24a   : > { %v1224_v14 = vmul.f32 %v4318_v63, %v5626_v62 }
 0x24b   : > { %v1219_v20 = vpop.f32.mrf.mxu0 }
 0x24c   : > { %v5635_v30 = vsel %vm1231_vm12, %v1224_v14, %v5430_v27  ;;  %v1263_v32 = vsel %vm1231_vm12, %v1224_v14, 0.0 }
 0x24d   : > { %v1271_v53 = vrot.slane %v1263_v32, %v5586_v11  ;;  %v1307_v49 = vpack.c.bf16 %v5635_v30, %v5635_v30  ;;  %v4495_v51 = vpop.f32.mrf.mxu0 }
 0x24e   : > { %v1259_v51 = vrot.slane %v5600_v19, %v5586_v11 }
 0x24f   : > { %v1272_v52 = vcombine.high %v1271_v53, %v1271_v53  ;;  %v1279_v54 = vrot.slane %v1271_v53, %v5586_v11  ;;  %4319 = vmatmul.mubr.msk.bf16.vlgmr.msra.gmra.mxu1 %vm862_vm4, %v1307_v49 }
 0x250   : > { %1361 = vmatpush1.bf16.msra.mxu1 %v5452_v31  ;;  %1384 = vmatprep.mubr.bf16.mxu1 %v5191_v9 }
 0x251   : > { %v1286_v27 = vrot.slane %v1272_v52, %v5586_v11  ;;  %v1287_v55 = vcombine.high %v1279_v54, %v1279_v54  ;;  %1294 = vst.msk [vmem:[%s5342_s21] sm:$0x1] %vm1293_vm13, %v1279_v54  ;;  %1362 = vmatprep.subr.bf16.mxu1 %v5461_v33 }
 0x253   : > { %v1288_v56 = vcombine.high %v1286_v27, %v1286_v27  ;;  %1295 = vst.msk [vmem:[%s5342_s21 + $0x8] sm:$0x1] %vm1293_vm13, %v1286_v27  ;;  %1296 = vst.msk [vmem:[%s5342_s21 + $0x10] sm:$0x1] %vm1293_vm13, %v1287_v55 }
 0x254   : > { %1363 = vmatpush1.bf16.msra.mxu1 %v5468_v34 }
 0x255   : > { %1297 = vst.msk [vmem:[%s5342_s21 + $0x18] sm:$0x1] %vm1293_vm13, %v1288_v56  ;;  %1364 = vmatprep.subr.bf16.mxu1 %v5475_v35 }
 0x258   : > { %1365 = vmatpush1.bf16.msra.mxu1 %v5481_v36 }
 0x259   : > { %1366 = vmatprep.subr.bf16.mxu1 %v5487_v37 }
 0x25c   : > { %1367 = vmatpush1.bf16.msra.mxu1 %v5493_v38 }
 0x25d   : > { %1712 = vmatprep.subr.bf16.mxu1 %v5381_v15 }
 0x25f   : > { %4320 = vmatmul.mubr.msk.bf16.vlgmr.msra.gmra.mxu1 %vm862_vm4, %v1307_v49 }
 0x260   : > { %1713 = vmatpush1.bf16.msra.mxu1 %v5386_v16  ;;  %1736 = vmatprep.mubr.bf16.mxu1 %v5191_v9 }
 0x261   : > { %1714 = vmatprep.subr.bf16.mxu1 %v5391_v17 }
 0x264   : > { %1715 = vmatpush1.bf16.msra.mxu1 %v5399_v18 }
 0x265   : > { %1716 = vmatprep.subr.bf16.mxu1 %v5410_v21 }
 0x268   : > { %1717 = vmatpush1.bf16.msra.mxu1 %v5416_v23 }
 0x269   : > { %1718 = vmatprep.subr.bf16.mxu1 %v5422_v24 }
 0x26c   : > { %1719 = vmatpush1.bf16.msra.mxu1 %v5428_v26 }
 0x26d   : > { %1753 = vmatprep.subr.bf16.mxu1 %v5437_v28 }
 0x30f   : > { %v1345_v15 = vpop.f32.mrf.mxu1 }
 0x311   : > { %v1347_v57 = vpop.f32.mrf.mxu1 }
 0x312   : > { %v1397_v60 = vcombine.low %v1345_v15, %v1347_v57 }
 0x313   : > { %v1349_v58 = vpop.f32.mrf.mxu1 }
 0x314   : > { %v1405_v18 = vrot.slane %v1397_v60, %v5586_v11 }
 0x315   : > { %v1350_v16 = vpop.f32.mrf.mxu1 }
 0x316   : > { %v5681_v16 = vsel %vm1231_vm12, %v1259_v51, %v5592_v61  ;;  %vm4049_vm12 = vcmask 519168  }
 0x317   : > { %v1502_v19 = vrot.slane %v5681_v16, %v5586_v11 }
 0x31f   : > { %v1386_v59 = vpop.f32.mrf.mxu1 }
 0x321   : > { %v1388_v1 = vpop.f32.mrf.mxu1 }
 0x322   : > { %v1398_v17 = vcombine.low %v1386_v59, %v1388_v1  ;;  %v1503_v59 = vcombine.high %v1502_v19, %v1502_v19 }
 0x323   : > { %v1390_v2 = vpop.f32.mrf.mxu1 }
 0x324   : > { %v1412_v21 = vrot.slane %v1398_v17, %v5586_v11  ;;  %v1510_v17 = vrot.slane %v1502_v19, %v5586_v11 }
 0x325   : > { %v1391_v23 = vpop.f32.mrf.mxu1 }
 0x326   : > { %v1413_v3 = vcombine.low %v1405_v18, %v1412_v21  ;;  %v1414_v24 = vcombine.high %v1405_v18, %v1412_v21  ;;  %v1517_v18 = vrot.slane %v1503_v59, %v5586_v11 }
 0x328   : > { %v1421_v26 = vrot.slane %v1413_v3, %v5586_v11  ;;  %v1428_v28 = vrot.slane %v1414_v24, %v5586_v11  ;;  %v1518_v24 = vcombine.high %v1510_v17, %v1510_v17 }
 0x32a   : > { %v1429_v22 = vcombine.high %v1421_v26, %v1421_v26  ;;  %v1430_v6 = vcombine.high %v1428_v28, %v1428_v28  ;;  %v1435_v25 = vadd.f32 %v1421_v26, %v1300_v4  ;;  %v1436_v48 = vadd.f32 %v1428_v28, %v1302_v5 }
 0x32c   : > { %v1437_v8 = vadd.f32 %v1429_v22, %v1304_v50  ;;  %v1438_v10 = vadd.f32 %v1430_v6, %v1306_v7  ;;  %v4321_v12 = vmul.f32 -1.442695, %v1435_v25  ;;  %v4322_v63 = vmul.f32 -1.442695, %v1436_v48 }
 0x32d   : > { %v1467_v20 = vrot.slane %v1435_v25, 3  ;;  %v1468_v32 = vrot.slane %v1436_v48, 3  ;;  %v1519_v22 = vcombine.high %v1517_v18, %v1517_v18 }
 0x32e   : > { %4785 = vpow2.f32 %v4321_v12  ;;  %v4323_v0 = vmul.f32 -1.442695, %v1437_v8  ;;  %v4324_v14 = vmul.f32 -1.442695, %v1438_v10  ;;  %v1469_v15 = vrot.slane %v1437_v8, 3 }
 0x32f   : > { %4787 = vpow2.f32 %v4322_v63  ;;  %v1470_v58 = vrot.slane %v1438_v10, 3 }
 0x330   : > { %4789 = vpow2.f32 %v4323_v0 }
 0x331   : > { %4791 = vpow2.f32 %v4324_v14 }
 0x332   : > { %4793 = vtanh.f32 %v1467_v20 }
 0x333   : > { %4795 = vtanh.f32 %v1468_v32 }
 0x33b   : > { %v4786_v53 = vpop.eup %4785 }
 0x33c   : > { %v4788_v49 = vpop.eup %4787  ;;  %v1451_v52 = vadd.f32 1.0, %v4786_v53 }
 0x33d   : > { %v4790_v54 = vpop.eup %4789  ;;  %v1452_v27 = vadd.f32 1.0, %v4788_v49 }
 0x33e   : > { %v4792_v55 = vpop.eup %4791  ;;  %v1453_v56 = vadd.f32 1.0, %v4790_v54  ;;  %4797 = vrcp.f32 %v1451_v52 }
 0x33f   : > { %v1454_v57 = vadd.f32 1.0, %v4792_v55  ;;  %4799 = vrcp.f32 %v1452_v27  ;;  %v4794_v60 = vpop.eup %4793 }
 0x340   : > { %4801 = vrcp.f32 %v1453_v56  ;;  %v4796_v1 = vpop.eup %4795 }
 0x341   : > { %4803 = vrcp.f32 %v1454_v57 }
 0x342   : > { %4805 = vtanh.f32 %v1469_v15 }
 0x343   : > { %4807 = vtanh.f32 %v1470_v58 }
 0x34b   : > { %v4798_v2 = vpop.eup %4797 }
 0x34c   : > { %v4800_v21 = vpop.eup %4799  ;;  %v1487_v23 = vrot.slane %v4798_v2, 1  ;;  %v1479_v26 = vmul.f32 %v4798_v2, %v4794_v60  ;;  %v1544_v15 = vrot.slane %v4798_v2, 2 }
 0x34d   : > { %v4802_v13 = vpop.eup %4801  ;;  %v1488_v61 = vrot.slane %v4800_v21, 1  ;;  %v1480_v6 = vmul.f32 %v4800_v21, %v4796_v1  ;;  %v1545_v58 = vrot.slane %v4800_v21, 2 }
 0x34e   : > { %v4804_v3 = vpop.eup %4803  ;;  %v1489_v28 = vrot.slane %v4802_v13, 1  ;;  %v1524_v4 = vmul.f32 %v1510_v17, %v1487_v23  ;;  %v1546_v59 = vrot.slane %v4802_v13, 2 }
 0x34f   : > { %v4806_v5 = vpop.eup %4805  ;;  %v1490_v25 = vrot.slane %v4804_v3, 1  ;;  %v1525_v48 = vmul.f32 %v1517_v18, %v1488_v61  ;;  %v1547_v17 = vrot.slane %v4804_v3, 2 }
 0x350   : > { %v4808_v50 = vpop.eup %4807  ;;  %v1481_v7 = vmul.f32 %v4806_v5, %v4802_v13  ;;  %v1526_v8 = vmul.f32 %v1518_v24, %v1489_v28  ;;  %v1528_v10 = vadd.f32 %v1524_v4, %v1479_v26 }
 0x351   : > { %v1482_v12 = vmul.f32 %v4808_v50, %v4804_v3  ;;  %v1527_v63 = vmul.f32 %v1519_v22, %v1490_v25  ;;  %v1529_v0 = vadd.f32 %v1525_v48, %v1480_v6 }
 0x352   : > { %v1530_v14 = vadd.f32 %v1526_v8, %v1481_v7  ;;  %v4325_v20 = vclamps-f32 %v1528_v10, 3.0 }
 0x353   : > { %v1531_v32 = vadd.f32 %v1527_v63, %v1482_v12  ;;  %v4326_v53 = vclamps-f32 %v1529_v0, 3.0 }
 0x354   : > { %v4327_v49 = vclamps-f32 %v1530_v14, 3.0  ;;  %4809 = vtanh.f32 %v4325_v20 }
 0x355   : > { %v4328_v51 = vclamps-f32 %v1531_v32, 3.0  ;;  %4811 = vtanh.f32 %v4326_v53  ;;  %v1630_v52 = vcombine.low %v4325_v20, %v4326_v53 }
 0x356   : > { %4813 = vtanh.f32 %v4327_v49 }
 0x357   : > { %4815 = vtanh.f32 %v4328_v51  ;;  %v1631_v54 = vcombine.low %v4327_v49, %v4328_v51  ;;  %v1638_v27 = vrot.slane %v1630_v52, %v5586_v11  ;;  %v5795_v49 = vld [vmem:[%s6541_s6] ss:$16 sps:$4 sm:$0xff]   ;;  %v5801_v51 = vld [vmem:[%s6541_s6 + $0x6c] ss:$16 sps:$4 sm:$0xff]   ;;  %v2405_v52 = vstv %s2084_s0 }
 0x359   : > { %v1645_v55 = vrot.slane %v1631_v54, %v5586_v11  ;;  %v3191_v54 = vstv %s2870_s16 }
 0x35b   : > { %v5689_v56 = vcombine.low %v1638_v27, %v1645_v55  ;;  %v5018_v27 = vld [vmem:[%s6559_s1] sm:$0xf] }
 0x35c   : > { %vm2406_vm0 = vcmp.gt.s32.totalorder %v5018_v27, %v2405_v52  ;;  %vm3192_vm1 = vcmp.gt.s32.totalorder %v5018_v27, %v3191_v54 }
 0x35d   : > { %v2407_v55 = vsel %vm2406_vm0, 1, %v5191_v9 }
 0x361   : > { %v4810_v57 = vpop.eup %4809 }
 0x362   : > { %v4812_v19 = vpop.eup %4811  ;;  %v1552_v60 = vmul.f32 %v4810_v57, %v1544_v15  ;;  %v3977_v15 = vstv %s3656_s29  ;;  %v3193_v57 = vsel %vm3192_vm1, 1, %v5191_v9 }
 0x363   : > { %v4814_v1 = vpop.eup %4813  ;;  %v1553_v18 = vmul.f32 %v4812_v19, %v1545_v58  ;;  %vm3978_vm2 = vcmp.gt.s32.totalorder %v5018_v27, %v3977_v15 }
 0x364   : > { %v4816_v23 = vpop.eup %4815  ;;  %v1554_v61 = vmul.f32 %v4814_v1, %v1546_v59  ;;  %v1556_v26 = vpack.c.bf16 %v1552_v60, %v1552_v60  ;;  %v3979_v58 = vsel %vm3978_vm2, 1, %v5191_v9 }
 0x365   : > { %v1555_v24 = vmul.f32 %v4816_v23, %v1547_v17  ;;  %v1557_v28 = vpack.c.bf16 %v1553_v18, %v1553_v18 }
 0x366   : > { %v1558_v4 = vpack.c.bf16 %v1554_v61, %v1554_v61  ;;  %v1564_v25 = vunpack.c.l.b16 %v1556_v26 }
 0x367   : > { %v1559_v5 = vpack.c.bf16 %v1555_v24, %v1555_v24  ;;  %v1565_v22 = vunpack.c.l.b16 %v1557_v28 }
 0x368   : > { %v1566_v6 = vunpack.c.l.b16 %v1558_v4 }
 0x369   : > { %v1567_v48 = vunpack.c.l.b16 %v1559_v5  ;;  %v1568_v2 = vrot.slane %v1565_v22, 7 }
 0x36a   : > { %v1570_v50 = vrot.slane %v1566_v6, 6 }
 0x36b   : > { %v1569_v21 = vsel %vm1124_vm9, %v1568_v2, %v1564_v25  ;;  %v1572_v13 = vrot.slane %v1567_v48, 5  ;;  %v1693_v48 = vld [vmem:[#allocation2 + $0x2] ss:$8 sm:$0xf] }
 0x36c   : > { %v1571_v7 = vsel %vm1127_vm10, %v1570_v50, %v1569_v21  ;;  %v1695_v2 = vld [vmem:[#allocation2 + $0x22] ss:$8 sm:$0xf] }
 0x36d   : > { %v1573_v3 = vsel %vm1130_vm11, %v1572_v13, %v1571_v7 }
 0x36e   : > { %v1574_v8 = vpack.c.b16 %v1573_v3, %v1573_v3  ;;  %v1697_v3 = vld [vmem:[#allocation2 + $0x42] ss:$8 sm:$0xf] }
 0x370   : > { %4513 = vmatmul.mubr.bf16.vlgmr.msra.gmra.mxu0 %v1574_v8  ;;  %v1699_v8 = vld [vmem:[#allocation2 + $0x62] ss:$8 sm:$0xf] }
 0x371   : > { %4517 = vmatpush3.bf16.msra.mxu0 %v5511_v39  ;;  %4532 = vmatprep.mubr.msk.bf16.mxu0 %vm5193_vm5, %v5192_v40  ;;  %v2012_v39 = vstv %s1691_s20 }
 0x372   : > { %4518 = vmatprep.subr.bf16.mxu0 %v5192_v40  ;;  %vm2013_vm14 = vcmp.gt.s32.totalorder %v5442_v29, %v2012_v39 }
 0x375   : > { %4519 = vmatpush3.bf16.msra.mxu0 %v5518_v41  ;;  %v2014_v41 = vsel %vm2013_vm14, 1, %v5191_v9 }
 0x376   : > { %4520 = vmatprep.subr.bf16.mxu0 %v5192_v40  ;;  %2016 = vperm.xlu1 %4714, %v2014_v41  }
 0x379   : > { %4521 = vmatpush3.bf16.msra.mxu0 %v5525_v42 }
 0x37a   : > { %4522 = vmatprep.subr.bf16.mxu0 %v5192_v40  ;;  %2409 = vperm.xlu1 %4714, %v2407_v55  }
 0x37d   : > { %4523 = vmatpush3.bf16.msra.mxu0 %v5533_v43 }
 0x37e   : > { %4524 = vmatprep.subr.bf16.mxu0 %v5192_v40  ;;  %3195 = vperm.xlu1 %4714, %v3193_v57  }
 0x381   : > { %4525 = vmatpush3.bf16.msra.mxu0 %v5540_v44 }
 0x382   : > { %4526 = vmatprep.subr.bf16.mxu0 %v5192_v40  ;;  %3981 = vperm.xlu1 %4714, %v3979_v58  }
 0x385   : > { %4527 = vmatpush3.bf16.msra.mxu0 %v5546_v45  ;;  %v5715_v45 = vpop.permute.xlu0 %1623 }
 0x386   : > { %4528 = vmatprep.subr.bf16.mxu0 %v5192_v40  ;;  %vm1625_vm15 = vcmp.eq.s32.totalorder %v5715_v45, 1 }
 0x389   : > { %4529 = vmatpush3.bf16.msra.mxu0 %v5555_v46 }
 0x38a   : > { %4530 = vmatprep.subr.bf16.mxu0 %v5192_v40 }
 0x38d   : > { %4531 = vmatpush3.bf16.msra.mxu0 %v5562_v47 }
 0x38e   : > { %4536 = vmatprep.subr.bf16.mxu0 %v5192_v40 }
 0x430   : > { %v1610_v42 = vpop.f32.mrf.mxu0 }
 0x431   : > { %v4329_v43 = vclamps-f32 %v1610_v42, 3.0 }
 0x432   : > { %v4514_v44 = vpop.f32.mrf.mxu0 }
 0x433   : > { %v1618_v46 = vmul.f32 %v4329_v43, %v5626_v62 }
 0x434   : > { %v1613_v47 = vpop.f32.mrf.mxu0 }
 0x435   : > { %v5722_v10 = vsel %vm1625_vm15, %v1618_v46, %v5635_v30  ;;  %v1657_v29 = vsel %vm1625_vm15, %v1618_v46, 0.0 }
 0x436   : > { %v1665_v12 = vrot.slane %v1657_v29, %v5586_v11  ;;  %v1700_v63 = vpack.c.bf16 %v5722_v10, %v5722_v10  ;;  %v4515_v0 = vpop.f32.mrf.mxu0 }
 0x438   : > { %v1666_v14 = vcombine.high %v1665_v12, %v1665_v12  ;;  %v1673_v20 = vrot.slane %v1665_v12, %v5586_v11  ;;  %4330 = vmatmul.mubr.msk.bf16.vlgmr.msra.gmra.mxu1 %vm862_vm4, %v1700_v63 }
 0x439   : > { %1754 = vmatpush1.bf16.msra.mxu1 %v5452_v31  ;;  %1777 = vmatprep.mubr.bf16.mxu1 %v5191_v9  ;;  %v5751_v31 = vld [vmem:[%s6541_s6 + $0x64] ss:$16 sps:$4 sm:$0xff]  }
 0x43a   : > { %v1680_v30 = vrot.slane %v1666_v14, %v5586_v11  ;;  %v1681_v32 = vcombine.high %v1673_v20, %v1673_v20  ;;  %1687 = vst.msk [vmem:[%s5342_s21 + $0x1] sm:$0x1] %vm1293_vm13, %v1673_v20  ;;  %1755 = vmatprep.subr.bf16.mxu1 %v5461_v33  ;;  %v5758_v33 = vld [vmem:[%s6541_s6 + $0x60] ss:$16 sps:$4 sm:$0xff]   ;;  %v1653_v14 = vrot.slane %v5689_v56, %v5586_v11 }
 0x43c   : > { %v1682_v53 = vcombine.high %v1680_v30, %v1680_v30  ;;  %1688 = vst.msk [vmem:[%s5342_s21 + $0x9] sm:$0x1] %vm1293_vm13, %v1680_v30  ;;  %1689 = vst.msk [vmem:[%s5342_s21 + $0x11] sm:$0x1] %vm1293_vm13, %v1681_v32  ;;  %v5822_v55 = vsel %vm1625_vm15, %v1653_v14, %v5681_v16 }
 0x43d   : > { %1756 = vmatpush1.bf16.msra.mxu1 %v5468_v34  ;;  %v5765_v34 = vld [vmem:[%s6541_s6 + $0x44] ss:$16 sps:$4 sm:$0xff]   ;;  %v1895_v56 = vrot.slane %v5822_v55, %v5586_v11 }
 0x43e   : > { %1690 = vst.msk [vmem:[%s5342_s21 + $0x19] sm:$0x1] %vm1293_vm13, %v1682_v53  ;;  %1757 = vmatprep.subr.bf16.mxu1 %v5475_v35  ;;  %v5771_v35 = vld [vmem:[%s6541_s6 + $0x40] ss:$16 sps:$4 sm:$0xff]  }
 0x43f   : > { %v1896_v15 = vcombine.high %v1895_v56, %v1895_v56 }
 0x441   : > { %1758 = vmatpush1.bf16.msra.mxu1 %v5481_v36  ;;  %v5777_v36 = vld [vmem:[%s6541_s6 + $0x24] ss:$16 sps:$4 sm:$0xff]  }
 0x442   : > { %1759 = vmatprep.subr.bf16.mxu1 %v5487_v37  ;;  %v5783_v37 = vld [vmem:[%s6541_s6 + $0x20] ss:$16 sps:$4 sm:$0xff]  }
 0x445   : > { %1760 = vmatpush1.bf16.msra.mxu1 %v5493_v38  ;;  %v5789_v38 = vld [vmem:[%s6541_s6 + $0x4] ss:$16 sps:$4 sm:$0xff]  }
 0x446   : > { %2105 = vmatprep.subr.bf16.mxu1 %v5751_v31 }
 0x448   : > { %4331 = vmatmul.mubr.msk.bf16.vlgmr.msra.gmra.mxu1 %vm862_vm4, %v1700_v63 }
 0x449   : > { %2106 = vmatpush1.bf16.msra.mxu1 %v5758_v33  ;;  %2129 = vmatprep.mubr.bf16.mxu1 %v5191_v9 }
 0x44a   : > { %2107 = vmatprep.subr.bf16.mxu1 %v5765_v34 }
 0x44d   : > { %2108 = vmatpush1.bf16.msra.mxu1 %v5771_v35 }
 0x44e   : > { %2109 = vmatprep.subr.bf16.mxu1 %v5777_v36 }
 0x451   : > { %2110 = vmatpush1.bf16.msra.mxu1 %v5783_v37 }
 0x452   : > { %2111 = vmatprep.subr.bf16.mxu1 %v5789_v38 }
 0x455   : > { %2112 = vmatpush1.bf16.msra.mxu1 %v5795_v49 }
 0x456   : > { %2146 = vmatprep.subr.bf16.mxu1 %v5801_v51 }
 0x4f8   : > { %v1738_v19 = vpop.f32.mrf.mxu1 }
 0x4fa   : > { %v1740_v59 = vpop.f32.mrf.mxu1 }
 0x4fb   : > { %v1790_v18 = vcombine.low %v1738_v19, %v1740_v59  ;;  %v1903_v19 = vrot.slane %v1895_v56, %v5586_v11 }
 0x4fc   : > { %v1742_v60 = vpop.f32.mrf.mxu1 }
 0x4fd   : > { %v1798_v26 = vrot.slane %v1790_v18, %v5586_v11  ;;  %v1910_v60 = vrot.slane %v1896_v15, %v5586_v11 }
 0x4fe   : > { %v1743_v1 = vpop.f32.mrf.mxu1 }
 0x508   : > { %v1779_v17 = vpop.f32.mrf.mxu1 }
 0x50a   : > { %v1781_v23 = vpop.f32.mrf.mxu1 }
 0x50b   : > { %v1791_v61 = vcombine.low %v1779_v17, %v1781_v23 }
 0x50c   : > { %v1783_v24 = vpop.f32.mrf.mxu1 }
 0x50d   : > { %v1805_v28 = vrot.slane %v1791_v61, %v5586_v11  ;;  %v1911_v24 = vcombine.high %v1903_v19, %v1903_v19 }
 0x50e   : > { %v1784_v4 = vpop.f32.mrf.mxu1 }
 0x50f   : > { %v1806_v5 = vcombine.low %v1798_v26, %v1805_v28  ;;  %v1807_v22 = vcombine.high %v1798_v26, %v1805_v28 }
 0x511   : > { %v1814_v6 = vrot.slane %v1806_v5, %v5586_v11  ;;  %v1821_v25 = vrot.slane %v1807_v22, %v5586_v11  ;;  %v1912_v22 = vcombine.high %v1910_v60, %v1910_v60 }
 0x513   : > { %v1822_v50 = vcombine.high %v1814_v6, %v1814_v6  ;;  %v1823_v21 = vcombine.high %v1821_v25, %v1821_v25  ;;  %v1828_v13 = vadd.f32 %v1814_v6, %v1693_v48  ;;  %v1829_v7 = vadd.f32 %v1821_v25, %v1695_v2 }
 0x515   : > { %v1830_v39 = vadd.f32 %v1822_v50, %v1697_v3  ;;  %v1831_v41 = vadd.f32 %v1823_v21, %v1699_v8  ;;  %v4332_v42 = vmul.f32 -1.442695, %v1828_v13  ;;  %v4333_v43 = vmul.f32 -1.442695, %v1829_v7 }
 0x516   : > { %v1860_v47 = vrot.slane %v1828_v13, 3  ;;  %v1861_v29 = vrot.slane %v1829_v7, 3 }
 0x517   : > { %4817 = vpow2.f32 %v4332_v42  ;;  %v4334_v44 = vmul.f32 -1.442695, %v1830_v39  ;;  %v4335_v46 = vmul.f32 -1.442695, %v1831_v41  ;;  %v1862_v52 = vrot.slane %v1830_v39, 3 }
 0x518   : > { %4819 = vpow2.f32 %v4333_v43  ;;  %v1863_v27 = vrot.slane %v1831_v41, 3 }
 0x519   : > { %4821 = vpow2.f32 %v4334_v44 }
 0x51a   : > { %4823 = vpow2.f32 %v4335_v46 }
 0x51b   : > { %4825 = vtanh.f32 %v1860_v47 }
 0x51c   : > { %4827 = vtanh.f32 %v1861_v29 }
 0x524   : > { %v4818_v12 = vpop.eup %4817 }
 0x525   : > { %v4820_v63 = vpop.eup %4819  ;;  %v1844_v0 = vadd.f32 1.0, %v4818_v12 }
 0x526   : > { %v4822_v20 = vpop.eup %4821  ;;  %v1845_v30 = vadd.f32 1.0, %v4820_v63 }
 0x527   : > { %v4824_v32 = vpop.eup %4823  ;;  %v1846_v53 = vadd.f32 1.0, %v4822_v20  ;;  %4829 = vrcp.f32 %v1844_v0 }
 0x528   : > { %v1847_v54 = vadd.f32 1.0, %v4824_v32  ;;  %4831 = vrcp.f32 %v1845_v30  ;;  %v4826_v57 = vpop.eup %4825 }
 0x529   : > { %4833 = vrcp.f32 %v1846_v53  ;;  %v4828_v58 = vpop.eup %4827 }
 0x52a   : > { %4835 = vrcp.f32 %v1847_v54 }
 0x52b   : > { %4837 = vtanh.f32 %v1862_v52 }
 0x52c   : > { %4839 = vtanh.f32 %v1863_v27 }
 0x534   : > { %v4830_v59 = vpop.eup %4829 }
 0x535   : > { %v4832_v1 = vpop.eup %4831  ;;  %v1880_v17 = vrot.slane %v4830_v59, 1  ;;  %v1872_v23 = vmul.f32 %v4830_v59, %v4826_v57  ;;  %v1937_v63 = vrot.slane %v4830_v59, 2 }
 0x536   : > { %v4834_v18 = vpop.eup %4833  ;;  %v1881_v45 = vrot.slane %v4832_v1, 1  ;;  %v1873_v4 = vmul.f32 %v4832_v1, %v4828_v58  ;;  %v1938_v14 = vrot.slane %v4832_v1, 2 }
 0x537   : > { %v4836_v16 = vpop.eup %4835  ;;  %v1882_v61 = vrot.slane %v4834_v18, 1  ;;  %v1917_v26 = vmul.f32 %v1903_v19, %v1880_v17  ;;  %v1939_v30 = vrot.slane %v4834_v18, 2 }
 0x538   : > { %v4838_v28 = vpop.eup %4837  ;;  %v1883_v5 = vrot.slane %v4836_v16, 1  ;;  %v1918_v6 = vmul.f32 %v1910_v60, %v1881_v45  ;;  %v1940_v52 = vrot.slane %v4836_v16, 2 }
 0x539   : > { %v4840_v25 = vpop.eup %4839  ;;  %v1874_v48 = vmul.f32 %v4838_v28, %v4834_v18  ;;  %v1919_v2 = vmul.f32 %v1911_v24, %v1882_v61  ;;  %v1921_v50 = vadd.f32 %v1917_v26, %v1872_v23 }
 0x53a   : > { %v1875_v21 = vmul.f32 %v4840_v25, %v4836_v16  ;;  %v1920_v13 = vmul.f32 %v1912_v22, %v1883_v5  ;;  %v1922_v7 = vadd.f32 %v1918_v6, %v1873_v4  ;;  %v5838_v4 = vld [vmem:[%s6543_s8 + $0x38] sm:$0xff]   ;;  %v5847_v5 = vld [vmem:[%s6543_s8 + $0x30] sm:$0xff]   ;;  %v5854_v22 = vld [vmem:[%s6543_s8 + $0x28] sm:$0xff]  }
 0x53b   : > { %v1923_v3 = vadd.f32 %v1919_v2, %v1874_v48  ;;  %v4336_v8 = vclamps-f32 %v1921_v50, 3.0  ;;  %v5861_v6 = vld [vmem:[%s6543_s8 + $0x20] sm:$0xff]   ;;  %v5868_v25 = vld [vmem:[%s6543_s8 + $0x18] sm:$0xff]   ;;  %v5875_v48 = vld [vmem:[%s6543_s8 + $0x10] sm:$0xff]  }
 0x53c   : > { %v1924_v39 = vadd.f32 %v1920_v13, %v1875_v21  ;;  %v4337_v41 = vclamps-f32 %v1922_v7, 3.0  ;;  %v5882_v2 = vld [vmem:[%s6543_s8 + $0x8] sm:$0xff]   ;;  %v5889_v50 = vld [vmem:[%s6543_s8] sm:$0xff]   ;;  %v5893_v13 = vpop.permute.xlu1 %2016 }
 0x53d   : > { %v4338_v42 = vclamps-f32 %v1923_v3, 3.0  ;;  %4841 = vtanh.f32 %v4336_v8  ;;  %vm2018_vm3 = vcmp.eq.s32.totalorder %v5893_v13, 1 }
 0x53e   : > { %v4339_v43 = vclamps-f32 %v1924_v39, 3.0  ;;  %4843 = vtanh.f32 %v4337_v41  ;;  %v2023_v44 = vcombine.low %v4336_v8, %v4337_v41 }
 0x53f   : > { %4845 = vtanh.f32 %v4338_v42 }
 0x540   : > { %4847 = vtanh.f32 %v4339_v43  ;;  %v2024_v46 = vcombine.low %v4338_v42, %v4339_v43  ;;  %v2031_v47 = vrot.slane %v2023_v44, %v5586_v11 }
 0x542   : > { %v2038_v29 = vrot.slane %v2024_v46, %v5586_v11 }
 0x544   : > { %v5830_v12 = vcombine.low %v2031_v47, %v2038_v29 }
 0x54a   : > { %v4842_v0 = vpop.eup %4841 }
 0x54b   : > { %v4844_v20 = vpop.eup %4843  ;;  %v1945_v32 = vmul.f32 %v4842_v0, %v1937_v63  ;;  %v5922_v0 = vld [vmem:[%s6541_s6 + $0x4c] ss:$16 sps:$4 sm:$0xff]  }
 0x54c   : > { %v4846_v53 = vpop.eup %4845  ;;  %v1946_v54 = vmul.f32 %v4844_v20, %v1938_v14  ;;  %v5932_v20 = vld [vmem:[%s6541_s6 + $0x48] ss:$16 sps:$4 sm:$0xff]  }
 0x54d   : > { %v4848_v27 = vpop.eup %4847  ;;  %v1947_v56 = vmul.f32 %v4846_v53, %v1939_v30  ;;  %v1949_v57 = vpack.c.bf16 %v1945_v32, %v1945_v32  ;;  %v5940_v30 = vld [vmem:[%s6541_s6 + $0x2c] ss:$16 sps:$4 sm:$0xff]   ;;  %v5946_v32 = vld [vmem:[%s6541_s6 + $0x28] ss:$16 sps:$4 sm:$0xff]  }
 0x54e   : > { %v1948_v15 = vmul.f32 %v4848_v27, %v1940_v52  ;;  %v1950_v58 = vpack.c.bf16 %v1946_v54, %v1946_v54  ;;  %v5952_v53 = vld [vmem:[%s6541_s6 + $0xc] ss:$16 sps:$4 sm:$0xff]   ;;  %v5958_v52 = vld [vmem:[%s6541_s6 + $0x8] ss:$16 sps:$4 sm:$0xff]  }
 0x54f   : > { %v1951_v19 = vpack.c.bf16 %v1947_v56, %v1947_v56  ;;  %v1957_v23 = vunpack.c.l.b16 %v1949_v57 }
 0x550   : > { %v1952_v60 = vpack.c.bf16 %v1948_v15, %v1948_v15  ;;  %v1958_v17 = vunpack.c.l.b16 %v1950_v58 }
 0x551   : > { %v1959_v45 = vunpack.c.l.b16 %v1951_v19 }
 0x552   : > { %v1960_v61 = vunpack.c.l.b16 %v1952_v60  ;;  %v1961_v59 = vrot.slane %v1958_v17, 7 }
 0x553   : > { %v1963_v24 = vrot.slane %v1959_v45, 6 }
 0x554   : > { %v1962_v1 = vsel %vm1124_vm9, %v1961_v59, %v1957_v23  ;;  %v1965_v18 = vrot.slane %v1960_v61, 5 }
 0x555   : > { %v1964_v26 = vsel %vm1127_vm10, %v1963_v24, %v1962_v1 }
 0x556   : > { %v1966_v16 = vsel %vm1130_vm11, %v1965_v18, %v1964_v26  ;;  %v2086_v26 = vld [vmem:[#allocation2 + $0x3] ss:$8 sm:$0xf] }
 0x557   : > { %v1967_v28 = vpack.c.b16 %v1966_v16, %v1966_v16  ;;  %v2088_v16 = vld [vmem:[#allocation2 + $0x23] ss:$8 sm:$0xf] }
 0x559   : > { %4533 = vmatmul.mubr.bf16.vlgmr.msra.gmra.mxu0 %v1967_v28 }
 0x55a   : > { %4537 = vmatpush3.bf16.msra.mxu0 %v5838_v4  ;;  %4552 = vmatprep.mubr.msk.bf16.mxu0 %vm5193_vm5, %v5192_v40 }
 0x55b   : > { %4538 = vmatprep.subr.bf16.mxu0 %v5192_v40 }
 0x55e   : > { %4539 = vmatpush3.bf16.msra.mxu0 %v5847_v5 }
 0x55f   : > { %4540 = vmatprep.subr.bf16.mxu0 %v5192_v40 }
 0x562   : > { %4541 = vmatpush3.bf16.msra.mxu0 %v5854_v22 }
 0x563   : > { %4542 = vmatprep.subr.bf16.mxu0 %v5192_v40 }
 0x566   : > { %4543 = vmatpush3.bf16.msra.mxu0 %v5861_v6 }
 0x567   : > { %4544 = vmatprep.subr.bf16.mxu0 %v5192_v40 }
 0x56a   : > { %4545 = vmatpush3.bf16.msra.mxu0 %v5868_v25 }
 0x56b   : > { %4546 = vmatprep.subr.bf16.mxu0 %v5192_v40 }
 0x56e   : > { %4547 = vmatpush3.bf16.msra.mxu0 %v5875_v48 }
 0x56f   : > { %4548 = vmatprep.subr.bf16.mxu0 %v5192_v40 }
 0x572   : > { %4549 = vmatpush3.bf16.msra.mxu0 %v5882_v2 }
 0x573   : > { %4550 = vmatprep.subr.bf16.mxu0 %v5192_v40 }
 0x576   : > { %4551 = vmatpush3.bf16.msra.mxu0 %v5889_v50 }
 0x577   : > { %4556 = vmatprep.subr.bf16.mxu0 %v5192_v40 }
 0x619   : > { %v2003_v21 = vpop.f32.mrf.mxu0 }
 0x61a   : > { %v4340_v7 = vclamps-f32 %v2003_v21, 3.0 }
 0x61b   : > { %v4534_v3 = vpop.f32.mrf.mxu0 }
 0x61c   : > { %v2011_v8 = vmul.f32 %v4340_v7, %v5626_v62 }
 0x61d   : > { %v2006_v39 = vpop.f32.mrf.mxu0 }
 0x61e   : > { %v5900_v41 = vsel %vm2018_vm3, %v2011_v8, %v5722_v10  ;;  %v2050_v42 = vsel %vm2018_vm3, %v2011_v8, 0.0  ;;  %v5912_v10 = vld [vmem:[%s6541_s6 + $0x68] ss:$16 sps:$4 sm:$0xff]  }
 0x61f   : > { %v2058_v43 = vrot.slane %v2050_v42, %v5586_v11  ;;  %v2093_v44 = vpack.c.bf16 %v5900_v41, %v5900_v41  ;;  %v4535_v62 = vpop.f32.mrf.mxu0  ;;  %v2090_v8 = vld [vmem:[#allocation2 + $0x43] ss:$8 sm:$0xf] }
 0x620   : > { %v2092_v39 = vld [vmem:[#allocation2 + $0x63] ss:$8 sm:$0xf] }
 0x621   : > { %v2059_v46 = vcombine.high %v2058_v43, %v2058_v43  ;;  %v2066_v47 = vrot.slane %v2058_v43, %v5586_v11  ;;  %4341 = vmatmul.mubr.msk.bf16.vlgmr.msra.gmra.mxu1 %vm862_vm4, %v2093_v44 }
 0x622   : > { %2147 = vmatpush1.bf16.msra.mxu1 %v5912_v10  ;;  %2170 = vmatprep.mubr.bf16.mxu1 %v5191_v9 }
 0x623   : > { %v2073_v29 = vrot.slane %v2059_v46, %v5586_v11  ;;  %v2074_v63 = vcombine.high %v2066_v47, %v2066_v47  ;;  %2080 = vst.msk [vmem:[%s5342_s21 + $0x2] sm:$0x1] %vm1293_vm13, %v2066_v47  ;;  %2148 = vmatprep.subr.bf16.mxu1 %v5922_v0 }
 0x625   : > { %v2075_v14 = vcombine.high %v2073_v29, %v2073_v29  ;;  %2081 = vst.msk [vmem:[%s5342_s21 + $0xa] sm:$0x1] %vm1293_vm13, %v2073_v29  ;;  %2082 = vst.msk [vmem:[%s5342_s21 + $0x12] sm:$0x1] %vm1293_vm13, %v2074_v63 }
 0x626   : > { %2149 = vmatpush1.bf16.msra.mxu1 %v5932_v20 }
 0x627   : > { %2083 = vst.msk [vmem:[%s5342_s21 + $0x1a] sm:$0x1] %vm1293_vm13, %v2075_v14  ;;  %2150 = vmatprep.subr.bf16.mxu1 %v5940_v30 }
 0x62a   : > { %2151 = vmatpush1.bf16.msra.mxu1 %v5946_v32 }
 0x62b   : > { %2152 = vmatprep.subr.bf16.mxu1 %v5952_v53 }
 0x62e   : > { %2153 = vmatpush1.bf16.msra.mxu1 %v5958_v52 }
 0x62f   : > { %2498 = vmatprep.subr.bf16.mxu1 %v5751_v31 }
 0x631   : > { %4342 = vmatmul.mubr.msk.bf16.vlgmr.msra.gmra.mxu1 %vm862_vm4, %v2093_v44 }
 0x632   : > { %2499 = vmatpush1.bf16.msra.mxu1 %v5758_v33  ;;  %2522 = vmatprep.mubr.bf16.mxu1 %v5191_v9 }
 0x633   : > { %2500 = vmatprep.subr.bf16.mxu1 %v5765_v34 }
 0x636   : > { %2501 = vmatpush1.bf16.msra.mxu1 %v5771_v35 }
 0x637   : > { %2502 = vmatprep.subr.bf16.mxu1 %v5777_v36 }
 0x63a   : > { %2503 = vmatpush1.bf16.msra.mxu1 %v5783_v37 }
 0x63b   : > { %2504 = vmatprep.subr.bf16.mxu1 %v5789_v38 }
 0x63e   : > { %2505 = vmatpush1.bf16.msra.mxu1 %v5795_v49 }
 0x63f   : > { %2539 = vmatprep.subr.bf16.mxu1 %v5801_v51 }
 0x6e1   : > { %v2131_v54 = vpop.f32.mrf.mxu1 }
 0x6e3   : > { %v2133_v27 = vpop.f32.mrf.mxu1 }
 0x6e4   : > { %v2183_v58 = vcombine.low %v2131_v54, %v2133_v27  ;;  %v2046_v27 = vrot.slane %v5830_v12, %v5586_v11 }
 0x6e5   : > { %v2135_v56 = vpop.f32.mrf.mxu1 }
 0x6e6   : > { %v2191_v45 = vrot.slane %v2183_v58, %v5586_v11 }
 0x6e7   : > { %v2136_v15 = vpop.f32.mrf.mxu1 }
 0x6f1   : > { %v2172_v57 = vpop.f32.mrf.mxu1 }
 0x6f3   : > { %v2174_v19 = vpop.f32.mrf.mxu1 }
 0x6f4   : > { %v2184_v60 = vcombine.low %v2172_v57, %v2174_v19 }
 0x6f5   : > { %v2176_v17 = vpop.f32.mrf.mxu1 }
 0x6f6   : > { %v2198_v23 = vrot.slane %v2184_v60, %v5586_v11 }
 0x6f7   : > { %v2177_v61 = vpop.f32.mrf.mxu1 }
 0x6f8   : > { %v2199_v59 = vcombine.low %v2191_v45, %v2198_v23  ;;  %v2200_v24 = vcombine.high %v2191_v45, %v2198_v23  ;;  %v5981_v23 = vsel %vm2018_vm3, %v2046_v27, %v5822_v55 }
 0x6f9   : > { %v2288_v12 = vrot.slane %v5981_v23, %v5586_v11 }
 0x6fa   : > { %v2207_v1 = vrot.slane %v2199_v59, %v5586_v11  ;;  %v2214_v18 = vrot.slane %v2200_v24, %v5586_v11 }
 0x6fb   : > { %v2289_v61 = vcombine.high %v2288_v12, %v2288_v12 }
 0x6fc   : > { %v2215_v28 = vcombine.high %v2207_v1, %v2207_v1  ;;  %v2216_v21 = vcombine.high %v2214_v18, %v2214_v18  ;;  %v2221_v7 = vadd.f32 %v2207_v1, %v2086_v26  ;;  %v2222_v3 = vadd.f32 %v2214_v18, %v2088_v16 }
 0x6fd   : > { %v2296_v1 = vrot.slane %v2288_v12, %v5586_v11  ;;  %v2303_v26 = vrot.slane %v2289_v61, %v5586_v11 }
 0x6fe   : > { %v2223_v42 = vadd.f32 %v2215_v28, %v2090_v8  ;;  %v2224_v43 = vadd.f32 %v2216_v21, %v2092_v39  ;;  %v4343_v44 = vmul.f32 -1.442695, %v2221_v7  ;;  %v4344_v62 = vmul.f32 -1.442695, %v2222_v3 }
 0x6ff   : > { %v2253_v29 = vrot.slane %v2221_v7, 3  ;;  %v2254_v63 = vrot.slane %v2222_v3, 3  ;;  %v2304_v7 = vcombine.high %v2296_v1, %v2296_v1 }
 0x700   : > { %4849 = vpow2.f32 %v4343_v44  ;;  %v4345_v46 = vmul.f32 -1.442695, %v2223_v42  ;;  %v4346_v47 = vmul.f32 -1.442695, %v2224_v43  ;;  %v2255_v60 = vrot.slane %v2223_v42, 3 }
 0x701   : > { %4851 = vpow2.f32 %v4344_v62  ;;  %v2256_v45 = vrot.slane %v2224_v43, 3  ;;  %v2305_v43 = vcombine.high %v2303_v26, %v2303_v26 }
 0x702   : > { %4853 = vpow2.f32 %v4345_v46 }
 0x703   : > { %4855 = vpow2.f32 %v4346_v47 }
 0x704   : > { %4857 = vtanh.f32 %v2253_v29 }
 0x705   : > { %4859 = vtanh.f32 %v2254_v63 }
 0x70d   : > { %v4850_v14 = vpop.eup %4849 }
 0x70e   : > { %v4852_v54 = vpop.eup %4851  ;;  %v2237_v56 = vadd.f32 1.0, %v4850_v14 }
 0x70f   : > { %v4854_v15 = vpop.eup %4853  ;;  %v2238_v57 = vadd.f32 1.0, %v4852_v54 }
 0x710   : > { %v4856_v58 = vpop.eup %4855  ;;  %v2239_v19 = vadd.f32 1.0, %v4854_v15  ;;  %4861 = vrcp.f32 %v2237_v56 }
 0x711   : > { %v2240_v17 = vadd.f32 1.0, %v4856_v58  ;;  %4863 = vrcp.f32 %v2238_v57  ;;  %v4858_v59 = vpop.eup %4857 }
 0x712   : > { %4865 = vrcp.f32 %v2239_v19  ;;  %v4860_v24 = vpop.eup %4859 }
 0x713   : > { %4867 = vrcp.f32 %v2240_v17 }
 0x714   : > { %4869 = vtanh.f32 %v2255_v60 }
 0x715   : > { %4871 = vtanh.f32 %v2256_v45 }
 0x71d   : > { %v4862_v18 = vpop.eup %4861 }
 0x71e   : > { %v4864_v16 = vpop.eup %4863  ;;  %v2273_v28 = vrot.slane %v4862_v18, 1  ;;  %v2265_v3 = vmul.f32 %v4862_v18, %v4858_v59 }
 0x71f   : > { %v4866_v13 = vpop.eup %4865  ;;  %v2274_v55 = vrot.slane %v4864_v16, 1  ;;  %v2266_v44 = vmul.f32 %v4864_v16, %v4860_v24 }
 0x720   : > { %v4868_v21 = vpop.eup %4867  ;;  %v2275_v8 = vrot.slane %v4866_v13, 1  ;;  %v2310_v39 = vmul.f32 %v2296_v1, %v2273_v28  ;;  %v2330_v1 = vrot.slane %v4862_v18, 2  ;;  %v2331_v28 = vrot.slane %v4864_v16, 2 }
 0x721   : > { %v4870_v42 = vpop.eup %4869  ;;  %v2276_v62 = vrot.slane %v4868_v21, 1  ;;  %v2311_v46 = vmul.f32 %v2303_v26, %v2274_v55 }
 0x722   : > { %v4872_v47 = vpop.eup %4871  ;;  %v2267_v29 = vmul.f32 %v4870_v42, %v4866_v13  ;;  %v2312_v63 = vmul.f32 %v2304_v7, %v2275_v8  ;;  %v2314_v14 = vadd.f32 %v2310_v39, %v2265_v3  ;;  %v2332_v7 = vrot.slane %v4866_v13, 2 }
 0x723   : > { %v2268_v54 = vmul.f32 %v4872_v47, %v4868_v21  ;;  %v2313_v27 = vmul.f32 %v2305_v43, %v2276_v62  ;;  %v2315_v56 = vadd.f32 %v2311_v46, %v2266_v44  ;;  %v2333_v39 = vrot.slane %v4868_v21, 2 }
 0x724   : > { %v2316_v15 = vadd.f32 %v2312_v63, %v2267_v29  ;;  %v4347_v57 = vclamps-f32 %v2314_v14, 3.0 }
 0x725   : > { %v2317_v58 = vadd.f32 %v2313_v27, %v2268_v54  ;;  %v4348_v19 = vclamps-f32 %v2315_v56, 3.0 }
 0x726   : > { %v4349_v60 = vclamps-f32 %v2316_v15, 3.0  ;;  %4873 = vtanh.f32 %v4347_v57 }
 0x727   : > { %v4350_v17 = vclamps-f32 %v2317_v58, 3.0  ;;  %4875 = vtanh.f32 %v4348_v19  ;;  %v2416_v45 = vcombine.low %v4347_v57, %v4348_v19 }
 0x728   : > { %4877 = vtanh.f32 %v4349_v60 }
 0x729   : > { %v2417_v12 = vcombine.low %v4349_v60, %v4350_v17  ;;  %4879 = vtanh.f32 %v4350_v17  ;;  %v2424_v61 = vrot.slane %v2416_v45, %v5586_v11  ;;  %v6012_v45 = vpop.permute.xlu1 %2409 }
 0x72a   : > { %vm2411_vm6 = vcmp.eq.s32.totalorder %v6012_v45, 1 }
 0x72b   : > { %v2431_v59 = vrot.slane %v2417_v12, %v5586_v11  ;;  %v6017_v12 = vld [vmem:[%s6544_s9] sm:$0xf] }
 0x72d   : > { %v5989_v24 = vcombine.low %v2424_v61, %v2431_v59 }
 0x733   : > { %v4874_v26 = vpop.eup %4873 }
 0x734   : > { %v4876_v55 = vpop.eup %4875  ;;  %v2338_v3 = vmul.f32 %v4874_v26, %v2330_v1 }
 0x735   : > { %v4878_v8 = vpop.eup %4877  ;;  %v2339_v42 = vmul.f32 %v4876_v55, %v2331_v28 }
 0x736   : > { %v4880_v43 = vpop.eup %4879  ;;  %v2340_v44 = vmul.f32 %v4878_v8, %v2332_v7  ;;  %v2342_v46 = vpack.c.bf16 %v2338_v3, %v2338_v3 }
 0x737   : > { %v2341_v62 = vmul.f32 %v4880_v43, %v2333_v39  ;;  %v2343_v47 = vpack.c.bf16 %v2339_v42, %v2339_v42 }
 0x738   : > { %v2344_v29 = vpack.c.bf16 %v2340_v44, %v2340_v44  ;;  %v2350_v27 = vunpack.c.l.b16 %v2342_v46 }
 0x739   : > { %v2345_v63 = vpack.c.bf16 %v2341_v62, %v2341_v62  ;;  %v2351_v14 = vunpack.c.l.b16 %v2343_v47 }
 0x73a   : > { %v2352_v54 = vunpack.c.l.b16 %v2344_v29 }
 0x73b   : > { %v2353_v56 = vunpack.c.l.b16 %v2345_v63  ;;  %v2354_v18 = vrot.slane %v2351_v14, 7  ;;  %v2479_v14 = vld [vmem:[#allocation2 + $0x4] ss:$8 sm:$0xf] }
 0x73c   : > { %v2356_v15 = vrot.slane %v2352_v54, 6  ;;  %v2481_v54 = vld [vmem:[#allocation2 + $0x24] ss:$8 sm:$0xf] }
 0x73d   : > { %v2355_v16 = vsel %vm1124_vm9, %v2354_v18, %v2350_v27  ;;  %v2358_v13 = vrot.slane %v2353_v56, 5 }
 0x73e   : > { %v2357_v57 = vsel %vm1127_vm10, %v2356_v15, %v2355_v16  ;;  %v2483_v16 = vld [vmem:[#allocation2 + $0x44] ss:$8 sm:$0xf] }
 0x73f   : > { %v2359_v21 = vsel %vm1130_vm11, %v2358_v13, %v2357_v57  ;;  %v2485_v13 = vld [vmem:[#allocation2 + $0x64] ss:$8 sm:$0xf] }
 0x740   : > { %v2360_v58 = vpack.c.b16 %v2359_v21, %v2359_v21 }
 0x742   : > { %4553 = vmatmul.mubr.bf16.vlgmr.msra.gmra.mxu0 %v2360_v58 }
 0x743   : > { %4557 = vmatpush3.bf16.msra.mxu0 %v5838_v4  ;;  %4572 = vmatprep.mubr.msk.bf16.mxu0 %vm5193_vm5, %v5192_v40 }
 0x744   : > { %4558 = vmatprep.subr.bf16.mxu0 %v5192_v40 }
 0x747   : > { %4559 = vmatpush3.bf16.msra.mxu0 %v5847_v5 }
 0x748   : > { %4560 = vmatprep.subr.bf16.mxu0 %v5192_v40 }
 0x74b   : > { %4561 = vmatpush3.bf16.msra.mxu0 %v5854_v22 }
 0x74c   : > { %4562 = vmatprep.subr.bf16.mxu0 %v5192_v40 }
 0x74f   : > { %4563 = vmatpush3.bf16.msra.mxu0 %v5861_v6 }
 0x750   : > { %4564 = vmatprep.subr.bf16.mxu0 %v5192_v40 }
 0x753   : > { %4565 = vmatpush3.bf16.msra.mxu0 %v5868_v25 }
 0x754   : > { %4566 = vmatprep.subr.bf16.mxu0 %v5192_v40 }
 0x757   : > { %4567 = vmatpush3.bf16.msra.mxu0 %v5875_v48 }
 0x758   : > { %4568 = vmatprep.subr.bf16.mxu0 %v5192_v40 }
 0x75b   : > { %4569 = vmatpush3.bf16.msra.mxu0 %v5882_v2 }
 0x75c   : > { %4570 = vmatprep.subr.bf16.mxu0 %v5192_v40 }
 0x75f   : > { %4571 = vmatpush3.bf16.msra.mxu0 %v5889_v50 }
 0x760   : > { %4576 = vmatprep.subr.bf16.mxu0 %v5192_v40 }
 0x802   : > { %v2396_v19 = vpop.f32.mrf.mxu0 }
 0x803   : > { %v4351_v60 = vclamps-f32 %v2396_v19, 3.0 }
 0x804   : > { %v4554_v17 = vpop.f32.mrf.mxu0 }
 0x805   : > { %v2404_v61 = vmul.f32 %v6017_v12, %v4351_v60 }
 0x806   : > { %v2399_v59 = vpop.f32.mrf.mxu0 }
 0x807   : > { %v6024_v1 = vsel %vm2411_vm6, %v2404_v61, %v5900_v41  ;;  %v2443_v26 = vsel %vm2411_vm6, %v2404_v61, 0.0 }
 0x808   : > { %v2451_v28 = vrot.slane %v2443_v26, %v5586_v11  ;;  %v2486_v55 = vpack.c.bf16 %v6024_v1, %v6024_v1  ;;  %v4555_v7 = vpop.f32.mrf.mxu0 }
 0x80a   : > { %v2452_v3 = vcombine.high %v2451_v28, %v2451_v28  ;;  %v2459_v8 = vrot.slane %v2451_v28, %v5586_v11  ;;  %4352 = vmatmul.mubr.msk.bf16.vlgmr.msra.gmra.mxu1 %vm862_vm4, %v2486_v55 }
 0x80b   : > { %2540 = vmatpush1.bf16.msra.mxu1 %v5912_v10  ;;  %2563 = vmatprep.mubr.bf16.mxu1 %v5191_v9 }
 0x80c   : > { %v2466_v41 = vrot.slane %v2452_v3, %v5586_v11  ;;  %v2467_v39 = vcombine.high %v2459_v8, %v2459_v8  ;;  %2473 = vst.msk [vmem:[%s5342_s21 + $0x3] sm:$0x1] %vm1293_vm13, %v2459_v8  ;;  %2541 = vmatprep.subr.bf16.mxu1 %v5922_v0 }
 0x80e   : > { %v2468_v42 = vcombine.high %v2466_v41, %v2466_v41  ;;  %2474 = vst.msk [vmem:[%s5342_s21 + $0xb] sm:$0x1] %vm1293_vm13, %v2466_v41  ;;  %2475 = vst.msk [vmem:[%s5342_s21 + $0x13] sm:$0x1] %vm1293_vm13, %v2467_v39 }
 0x80f   : > { %2542 = vmatpush1.bf16.msra.mxu1 %v5932_v20 }
 0x810   : > { %2476 = vst.msk [vmem:[%s5342_s21 + $0x1b] sm:$0x1] %vm1293_vm13, %v2468_v42  ;;  %2543 = vmatprep.subr.bf16.mxu1 %v5940_v30 }
 0x813   : > { %2544 = vmatpush1.bf16.msra.mxu1 %v5946_v32 }
 0x814   : > { %2545 = vmatprep.subr.bf16.mxu1 %v5952_v53 }
 0x817   : > { %2546 = vmatpush1.bf16.msra.mxu1 %v5958_v52 }
 0x818   : > { %2891 = vmatprep.subr.bf16.mxu1 %v5751_v31 }
 0x81a   : > { %4353 = vmatmul.mubr.msk.bf16.vlgmr.msra.gmra.mxu1 %vm862_vm4, %v2486_v55  ;;  %v2439_v55 = vrot.slane %v5989_v24, %v5586_v11 }
 0x81b   : > { %2892 = vmatpush1.bf16.msra.mxu1 %v5758_v33  ;;  %2915 = vmatprep.mubr.bf16.mxu1 %v5191_v9 }
 0x81c   : > { %2893 = vmatprep.subr.bf16.mxu1 %v5765_v34 }
 0x81f   : > { %2894 = vmatpush1.bf16.msra.mxu1 %v5771_v35 }
 0x820   : > { %2895 = vmatprep.subr.bf16.mxu1 %v5777_v36 }
 0x823   : > { %2896 = vmatpush1.bf16.msra.mxu1 %v5783_v37 }
 0x824   : > { %2897 = vmatprep.subr.bf16.mxu1 %v5789_v38 }
 0x827   : > { %2898 = vmatpush1.bf16.msra.mxu1 %v5795_v49 }
 0x828   : > { %2932 = vmatprep.subr.bf16.mxu1 %v5801_v51 }
 0x8ca   : > { %v2524_v31 = vpop.f32.mrf.mxu1 }
 0x8cc   : > { %v2526_v43 = vpop.f32.mrf.mxu1 }
 0x8cd   : > { %v2576_v46 = vcombine.low %v2524_v31, %v2526_v43 }
 0x8ce   : > { %v2528_v44 = vpop.f32.mrf.mxu1 }
 0x8cf   : > { %v2584_v35 = vrot.slane %v2576_v46, %v5586_v11  ;;  %v6070_v44 = vsel %vm2411_vm6, %v2439_v55, %v5981_v23 }
 0x8d0   : > { %v2529_v33 = vpop.f32.mrf.mxu1  ;;  %v2681_v24 = vrot.slane %v6070_v44, %v5586_v11 }
 0x8d2   : > { %v2682_v33 = vcombine.high %v2681_v24, %v2681_v24 }
 0x8da   : > { %v2565_v62 = vpop.f32.mrf.mxu1 }
 0x8dc   : > { %v2567_v47 = vpop.f32.mrf.mxu1 }
 0x8dd   : > { %v2577_v34 = vcombine.low %v2565_v62, %v2567_v47  ;;  %v2689_v47 = vrot.slane %v2681_v24, %v5586_v11 }
 0x8de   : > { %v2569_v29 = vpop.f32.mrf.mxu1 }
 0x8df   : > { %v2591_v36 = vrot.slane %v2577_v34, %v5586_v11  ;;  %v2696_v29 = vrot.slane %v2682_v33, %v5586_v11 }
 0x8e0   : > { %v2570_v37 = vpop.f32.mrf.mxu1 }
 0x8e1   : > { %v2592_v63 = vcombine.low %v2584_v35, %v2591_v36  ;;  %v2593_v38 = vcombine.high %v2584_v35, %v2591_v36 }
 0x8e3   : > { %v2600_v49 = vrot.slane %v2592_v63, %v5586_v11  ;;  %v2607_v51 = vrot.slane %v2593_v38, %v5586_v11 }
 0x8e5   : > { %v2608_v27 = vcombine.high %v2600_v49, %v2600_v49  ;;  %v2609_v56 = vcombine.high %v2607_v51, %v2607_v51  ;;  %v2614_v18 = vadd.f32 %v2600_v49, %v2479_v14  ;;  %v2615_v15 = vadd.f32 %v2607_v51, %v2481_v54 }
 0x8e6   : > { %v2697_v49 = vcombine.high %v2689_v47, %v2689_v47 }
 0x8e7   : > { %v2616_v57 = vadd.f32 %v2608_v27, %v2483_v16  ;;  %v2617_v21 = vadd.f32 %v2609_v56, %v2485_v13  ;;  %v4354_v58 = vmul.f32 -1.442695, %v2614_v18  ;;  %v4355_v19 = vmul.f32 -1.442695, %v2615_v15 }
 0x8e8   : > { %v2646_v61 = vrot.slane %v2614_v18, 3  ;;  %v2647_v59 = vrot.slane %v2615_v15, 3  ;;  %v2698_v56 = vcombine.high %v2696_v29, %v2696_v29 }
 0x8e9   : > { %4881 = vpow2.f32 %v4354_v58  ;;  %v4356_v60 = vmul.f32 -1.442695, %v2616_v57  ;;  %v4357_v17 = vmul.f32 -1.442695, %v2617_v21  ;;  %v2648_v42 = vrot.slane %v2616_v57, 3 }
 0x8ea   : > { %4883 = vpow2.f32 %v4355_v19  ;;  %v2649_v43 = vrot.slane %v2617_v21, 3 }
 0x8eb   : > { %4885 = vpow2.f32 %v4356_v60 }
 0x8ec   : > { %4887 = vpow2.f32 %v4357_v17 }
 0x8ed   : > { %4889 = vtanh.f32 %v2646_v61 }
 0x8ee   : > { %4891 = vtanh.f32 %v2647_v59 }
 0x8f6   : > { %v4882_v26 = vpop.eup %4881 }
 0x8f7   : > { %v4884_v28 = vpop.eup %4883  ;;  %v2630_v7 = vadd.f32 1.0, %v4882_v26 }
 0x8f8   : > { %v4886_v3 = vpop.eup %4885  ;;  %v2631_v8 = vadd.f32 1.0, %v4884_v28 }
 0x8f9   : > { %v4888_v41 = vpop.eup %4887  ;;  %v2632_v39 = vadd.f32 1.0, %v4886_v3  ;;  %4893 = vrcp.f32 %v2630_v7 }
 0x8fa   : > { %v2633_v31 = vadd.f32 1.0, %v4888_v41  ;;  %4895 = vrcp.f32 %v2631_v8  ;;  %v4890_v62 = vpop.eup %4889 }
 0x8fb   : > { %4897 = vrcp.f32 %v2632_v39  ;;  %v4892_v46 = vpop.eup %4891 }
 0x8fc   : > { %4899 = vrcp.f32 %v2633_v31 }
 0x8fd   : > { %4901 = vtanh.f32 %v2648_v42 }
 0x8fe   : > { %4903 = vtanh.f32 %v2649_v43 }
 0x906   : > { %v4894_v34 = vpop.eup %4893 }
 0x907   : > { %v4896_v35 = vpop.eup %4895  ;;  %v2666_v36 = vrot.slane %v4894_v34, 1  ;;  %v2658_v63 = vmul.f32 %v4894_v34, %v4890_v62  ;;  %v2723_v39 = vrot.slane %v4894_v34, 2 }
 0x908   : > { %v4898_v45 = vpop.eup %4897  ;;  %v2667_v23 = vrot.slane %v4896_v35, 1  ;;  %v2659_v54 = vmul.f32 %v4896_v35, %v4892_v46  ;;  %v2724_v31 = vrot.slane %v4896_v35, 2 }
 0x909   : > { %v4900_v37 = vpop.eup %4899  ;;  %v2668_v38 = vrot.slane %v4898_v45, 1  ;;  %v2703_v51 = vmul.f32 %v2689_v47, %v2666_v36  ;;  %v2725_v24 = vrot.slane %v4898_v45, 2 }
 0x90a   : > { %v4902_v14 = vpop.eup %4901  ;;  %v2669_v27 = vrot.slane %v4900_v37, 1  ;;  %v2704_v18 = vmul.f32 %v2696_v29, %v2667_v23  ;;  %v2726_v46 = vrot.slane %v4900_v37, 2 }
 0x90b   : > { %v4904_v15 = vpop.eup %4903  ;;  %v2660_v16 = vmul.f32 %v4902_v14, %v4898_v45  ;;  %v2705_v13 = vmul.f32 %v2697_v49, %v2668_v38  ;;  %v2707_v57 = vadd.f32 %v2703_v51, %v2658_v63 }
 0x90c   : > { %v2661_v21 = vmul.f32 %v4904_v15, %v4900_v37  ;;  %v2706_v58 = vmul.f32 %v2698_v56, %v2669_v27  ;;  %v2708_v19 = vadd.f32 %v2704_v18, %v2659_v54 }
 0x90d   : > { %v2709_v60 = vadd.f32 %v2705_v13, %v2660_v16  ;;  %v4358_v17 = vclamps-f32 %v2707_v57, 3.0 }
 0x90e   : > { %v2710_v61 = vadd.f32 %v2706_v58, %v2661_v21  ;;  %v4359_v59 = vclamps-f32 %v2708_v19, 3.0 }
 0x90f   : > { %v4360_v26 = vclamps-f32 %v2709_v60, 3.0  ;;  %4905 = vtanh.f32 %v4358_v17 }
 0x910   : > { %v4361_v28 = vclamps-f32 %v2710_v61, 3.0  ;;  %4907 = vtanh.f32 %v4359_v59  ;;  %v2809_v55 = vcombine.low %v4358_v17, %v4359_v59  ;;  %v6181_v61 = vld [vmem:[%s6541_s6] ss:$16 sps:$4 sm:$0xff]   ;;  %v6187_v59 = vld [vmem:[%s6541_s6 + $0x6c] ss:$16 sps:$4 sm:$0xff]  }
 0x911   : > { %4909 = vtanh.f32 %v4360_v26 }
 0x912   : > { %v2810_v7 = vcombine.low %v4360_v26, %v4361_v28  ;;  %4911 = vtanh.f32 %v4361_v28  ;;  %v2817_v3 = vrot.slane %v2809_v55, %v5586_v11 }
 0x914   : > { %v2824_v8 = vrot.slane %v2810_v7, %v5586_v11 }
 0x916   : > { %v6078_v41 = vcombine.low %v2817_v3, %v2824_v8 }
 0x91c   : > { %v4906_v42 = vpop.eup %4905 }
 0x91d   : > { %v4908_v43 = vpop.eup %4907  ;;  %v2731_v33 = vmul.f32 %v4906_v42, %v2723_v39 }
 0x91e   : > { %v4910_v62 = vpop.eup %4909  ;;  %v2732_v47 = vmul.f32 %v4908_v43, %v2724_v31 }
 0x91f   : > { %v4912_v29 = vpop.eup %4911  ;;  %v2733_v36 = vmul.f32 %v4910_v62, %v2725_v24  ;;  %v2735_v63 = vpack.c.bf16 %v2731_v33, %v2731_v33 }
 0x920   : > { %v2734_v23 = vmul.f32 %v4912_v29, %v2726_v46  ;;  %v2736_v38 = vpack.c.bf16 %v2732_v47, %v2732_v47 }
 0x921   : > { %v2737_v49 = vpack.c.bf16 %v2733_v36, %v2733_v36  ;;  %v2743_v27 = vunpack.c.l.b16 %v2735_v63  ;;  %v2872_v36 = vld [vmem:[#allocation2 + $0x5] ss:$8 sm:$0xf] }
 0x922   : > { %v2738_v51 = vpack.c.bf16 %v2734_v23, %v2734_v23  ;;  %v2744_v14 = vunpack.c.l.b16 %v2736_v38  ;;  %v2874_v23 = vld [vmem:[#allocation2 + $0x25] ss:$8 sm:$0xf] }
 0x923   : > { %v2745_v54 = vunpack.c.l.b16 %v2737_v49 }
 0x924   : > { %v2746_v56 = vunpack.c.l.b16 %v2738_v51  ;;  %v2747_v34 = vrot.slane %v2744_v14, 7  ;;  %v2876_v14 = vld [vmem:[#allocation2 + $0x45] ss:$8 sm:$0xf] }
 0x925   : > { %v2749_v18 = vrot.slane %v2745_v54, 6  ;;  %v2878_v54 = vld [vmem:[#allocation2 + $0x65] ss:$8 sm:$0xf] }
 0x926   : > { %v2748_v35 = vsel %vm1124_vm9, %v2747_v34, %v2743_v27  ;;  %v2751_v45 = vrot.slane %v2746_v56, 5 }
 0x927   : > { %v2750_v15 = vsel %vm1127_vm10, %v2749_v18, %v2748_v35 }
 0x928   : > { %v2752_v37 = vsel %vm1130_vm11, %v2751_v45, %v2750_v15 }
 0x929   : > { %v2753_v16 = vpack.c.b16 %v2752_v37, %v2752_v37 }
 0x92b   : > { %4573 = vmatmul.mubr.bf16.vlgmr.msra.gmra.mxu0 %v2753_v16 }
 0x92c   : > { %4577 = vmatpush3.bf16.msra.mxu0 %v5838_v4  ;;  %4592 = vmatprep.mubr.msk.bf16.mxu0 %vm5193_vm5, %v5192_v40 }
 0x92d   : > { %4578 = vmatprep.subr.bf16.mxu0 %v5192_v40 }
 0x930   : > { %4579 = vmatpush3.bf16.msra.mxu0 %v5847_v5 }
 0x931   : > { %4580 = vmatprep.subr.bf16.mxu0 %v5192_v40 }
 0x934   : > { %4581 = vmatpush3.bf16.msra.mxu0 %v5854_v22 }
 0x935   : > { %4582 = vmatprep.subr.bf16.mxu0 %v5192_v40 }
 0x938   : > { %4583 = vmatpush3.bf16.msra.mxu0 %v5861_v6  ;;  %v6101_v6 = vpop.permute.xlu0 %2802 }
 0x939   : > { %4584 = vmatprep.subr.bf16.mxu0 %v5192_v40  ;;  %vm2804_vm7 = vcmp.eq.s32.totalorder %v6101_v6, 1 }
 0x93c   : > { %4585 = vmatpush3.bf16.msra.mxu0 %v5868_v25 }
 0x93d   : > { %4586 = vmatprep.subr.bf16.mxu0 %v5192_v40 }
 0x940   : > { %4587 = vmatpush3.bf16.msra.mxu0 %v5875_v48 }
 0x941   : > { %4588 = vmatprep.subr.bf16.mxu0 %v5192_v40 }
 0x944   : > { %4589 = vmatpush3.bf16.msra.mxu0 %v5882_v2 }
 0x945   : > { %4590 = vmatprep.subr.bf16.mxu0 %v5192_v40 }
 0x948   : > { %4591 = vmatpush3.bf16.msra.mxu0 %v5889_v50 }
 0x949   : > { %4596 = vmatprep.subr.bf16.mxu0 %v5192_v40 }
 0x9eb   : > { %v2789_v4 = vpop.f32.mrf.mxu0 }
 0x9ec   : > { %v4362_v5 = vclamps-f32 %v2789_v4, 3.0 }
 0x9ed   : > { %v4574_v22 = vpop.f32.mrf.mxu0 }
 0x9ee   : > { %v2797_v25 = vmul.f32 %v6017_v12, %v4362_v5  ;;  %v2832_v5 = vrot.slane %v6078_v41, %v5586_v11 }
 0x9ef   : > { %v2792_v48 = vpop.f32.mrf.mxu0 }
 0x9f0   : > { %v6108_v2 = vsel %vm2804_vm7, %v2797_v25, %v6024_v1  ;;  %v2836_v50 = vsel %vm2804_vm7, %v2797_v25, 0.0 }
 0x9f1   : > { %v2844_v13 = vrot.slane %v2836_v50, %v5586_v11  ;;  %v2879_v57 = vpack.c.bf16 %v6108_v2, %v6108_v2  ;;  %v4575_v21 = vpop.f32.mrf.mxu0 }
 0x9f3   : > { %v2845_v58 = vcombine.high %v2844_v13, %v2844_v13  ;;  %v2852_v19 = vrot.slane %v2844_v13, %v5586_v11  ;;  %4363 = vmatmul.mubr.msk.bf16.vlgmr.msra.gmra.mxu1 %vm862_vm4, %v2879_v57 }
 0x9f4   : > { %2933 = vmatpush1.bf16.msra.mxu1 %v5912_v10  ;;  %2956 = vmatprep.mubr.bf16.mxu1 %v5191_v9  ;;  %v6137_v10 = vld [vmem:[%s6541_s6 + $0x64] ss:$16 sps:$4 sm:$0xff]  }
 0x9f5   : > { %v2859_v1 = vrot.slane %v2845_v58, %v5586_v11  ;;  %v2860_v60 = vcombine.high %v2852_v19, %v2852_v19  ;;  %2866 = vst.msk [vmem:[%s5342_s21 + $0x4] sm:$0x1] %vm1293_vm13, %v2852_v19  ;;  %2934 = vmatprep.subr.bf16.mxu1 %v5922_v0  ;;  %v6144_v0 = vld [vmem:[%s6541_s6 + $0x60] ss:$16 sps:$4 sm:$0xff]   ;;  %v6199_v19 = vsel %vm2804_vm7, %v2832_v5, %v6070_v44 }
 0x9f6   : > { %v3074_v41 = vrot.slane %v6199_v19, %v5586_v11 }
 0x9f7   : > { %v2861_v17 = vcombine.high %v2859_v1, %v2859_v1  ;;  %2867 = vst.msk [vmem:[%s5342_s21 + $0xc] sm:$0x1] %vm1293_vm13, %v2859_v1  ;;  %2868 = vst.msk [vmem:[%s5342_s21 + $0x14] sm:$0x1] %vm1293_vm13, %v2860_v60 }
 0x9f8   : > { %2935 = vmatpush1.bf16.msra.mxu1 %v5932_v20  ;;  %v6151_v20 = vld [vmem:[%s6541_s6 + $0x44] ss:$16 sps:$4 sm:$0xff]   ;;  %v3075_v1 = vcombine.high %v3074_v41, %v3074_v41 }
 0x9f9   : > { %2869 = vst.msk [vmem:[%s5342_s21 + $0x1c] sm:$0x1] %vm1293_vm13, %v2861_v17  ;;  %2936 = vmatprep.subr.bf16.mxu1 %v5940_v30  ;;  %v6157_v30 = vld [vmem:[%s6541_s6 + $0x40] ss:$16 sps:$4 sm:$0xff]  }
 0x9fc   : > { %2937 = vmatpush1.bf16.msra.mxu1 %v5946_v32  ;;  %v6163_v32 = vld [vmem:[%s6541_s6 + $0x24] ss:$16 sps:$4 sm:$0xff]  }
 0x9fd   : > { %2938 = vmatprep.subr.bf16.mxu1 %v5952_v53  ;;  %v6169_v53 = vld [vmem:[%s6541_s6 + $0x20] ss:$16 sps:$4 sm:$0xff]  }
 0xa00   : > { %2939 = vmatpush1.bf16.msra.mxu1 %v5958_v52  ;;  %v6175_v52 = vld [vmem:[%s6541_s6 + $0x4] ss:$16 sps:$4 sm:$0xff]  }
 0xa01   : > { %3284 = vmatprep.subr.bf16.mxu1 %v6137_v10 }
 0xa03   : > { %4364 = vmatmul.mubr.msk.bf16.vlgmr.msra.gmra.mxu1 %vm862_vm4, %v2879_v57 }
 0xa04   : > { %3285 = vmatpush1.bf16.msra.mxu1 %v6144_v0  ;;  %3308 = vmatprep.mubr.bf16.mxu1 %v5191_v9 }
 0xa05   : > { %3286 = vmatprep.subr.bf16.mxu1 %v6151_v20 }
 0xa08   : > { %3287 = vmatpush1.bf16.msra.mxu1 %v6157_v30 }
 0xa09   : > { %3288 = vmatprep.subr.bf16.mxu1 %v6163_v32 }
 0xa0c   : > { %3289 = vmatpush1.bf16.msra.mxu1 %v6169_v53 }
 0xa0d   : > { %3290 = vmatprep.subr.bf16.mxu1 %v6175_v52 }
 0xa10   : > { %3291 = vmatpush1.bf16.msra.mxu1 %v6181_v61 }
 0xa11   : > { %3325 = vmatprep.subr.bf16.mxu1 %v6187_v59 }
 0xab3   : > { %v2917_v26 = vpop.f32.mrf.mxu1 }
 0xab5   : > { %v2919_v28 = vpop.f32.mrf.mxu1 }
 0xab6   : > { %v2969_v8 = vcombine.low %v2917_v26, %v2919_v28  ;;  %v3082_v26 = vrot.slane %v3074_v41, %v5586_v11 }
 0xab7   : > { %v2921_v55 = vpop.f32.mrf.mxu1 }
 0xab8   : > { %v2977_v43 = vrot.slane %v2969_v8, %v5586_v11  ;;  %v3089_v55 = vrot.slane %v3075_v1, %v5586_v11 }
 0xab9   : > { %v2922_v7 = vpop.f32.mrf.mxu1 }
 0xac3   : > { %v2958_v3 = vpop.f32.mrf.mxu1 }
 0xac5   : > { %v2960_v39 = vpop.f32.mrf.mxu1 }
 0xac6   : > { %v2970_v42 = vcombine.low %v2958_v3, %v2960_v39 }
 0xac7   : > { %v2962_v31 = vpop.f32.mrf.mxu1 }
 0xac8   : > { %v2984_v24 = vrot.slane %v2970_v42, %v5586_v11  ;;  %v3090_v31 = vcombine.high %v3082_v26, %v3082_v26 }
 0xac9   : > { %v2963_v33 = vpop.f32.mrf.mxu1 }
 0xaca   : > { %v2985_v62 = vcombine.low %v2977_v43, %v2984_v24  ;;  %v2986_v46 = vcombine.high %v2977_v43, %v2984_v24 }
 0xacc   : > { %v2993_v47 = vrot.slane %v2985_v62, %v5586_v11  ;;  %v3000_v29 = vrot.slane %v2986_v46, %v5586_v11  ;;  %v3091_v46 = vcombine.high %v3089_v55, %v3089_v55 }
 0xace   : > { %v3001_v63 = vcombine.high %v2993_v47, %v2993_v47  ;;  %v3002_v38 = vcombine.high %v3000_v29, %v3000_v29  ;;  %v3007_v49 = vadd.f32 %v2993_v47, %v2872_v36  ;;  %v3008_v51 = vadd.f32 %v3000_v29, %v2874_v23 }
 0xad0   : > { %v3009_v27 = vadd.f32 %v3001_v63, %v2876_v14  ;;  %v3010_v56 = vadd.f32 %v3002_v38, %v2878_v54  ;;  %v4365_v34 = vmul.f32 -1.442695, %v3007_v49  ;;  %v4366_v18 = vmul.f32 -1.442695, %v3008_v51 }
 0xad1   : > { %v3039_v15 = vrot.slane %v3007_v49, 3  ;;  %v3040_v37 = vrot.slane %v3008_v51, 3 }
 0xad2   : > { %4913 = vpow2.f32 %v4365_v34  ;;  %v4367_v35 = vmul.f32 -1.442695, %v3009_v27  ;;  %v4368_v45 = vmul.f32 -1.442695, %v3010_v56  ;;  %v3041_v57 = vrot.slane %v3009_v27, 3 }
 0xad3   : > { %4915 = vpow2.f32 %v4366_v18  ;;  %v3042_v58 = vrot.slane %v3010_v56, 3 }
 0xad4   : > { %4917 = vpow2.f32 %v4367_v35 }
 0xad5   : > { %4919 = vpow2.f32 %v4368_v45 }
 0xad6   : > { %4921 = vtanh.f32 %v3039_v15 }
 0xad7   : > { %4923 = vtanh.f32 %v3040_v37 }
 0xadf   : > { %v4914_v16 = vpop.eup %4913 }
 0xae0   : > { %v4916_v4 = vpop.eup %4915  ;;  %v3023_v22 = vadd.f32 1.0, %v4914_v16 }
 0xae1   : > { %v4918_v25 = vpop.eup %4917  ;;  %v3024_v48 = vadd.f32 1.0, %v4916_v4 }
 0xae2   : > { %v4920_v50 = vpop.eup %4919  ;;  %v3025_v13 = vadd.f32 1.0, %v4918_v25  ;;  %4925 = vrcp.f32 %v3023_v22 }
 0xae3   : > { %v3026_v21 = vadd.f32 1.0, %v4920_v50  ;;  %4927 = vrcp.f32 %v3024_v48  ;;  %v4922_v60 = vpop.eup %4921 }
 0xae4   : > { %4929 = vrcp.f32 %v3025_v13  ;;  %v4924_v17 = vpop.eup %4923 }
 0xae5   : > { %4931 = vrcp.f32 %v3026_v21 }
 0xae6   : > { %4933 = vtanh.f32 %v3041_v57 }
 0xae7   : > { %4935 = vtanh.f32 %v3042_v58 }
 0xaef   : > { %v4926_v28 = vpop.eup %4925 }
 0xaf0   : > { %v4928_v7 = vpop.eup %4927  ;;  %v3059_v3 = vrot.slane %v4926_v28, 1  ;;  %v3051_v39 = vmul.f32 %v4926_v28, %v4922_v60  ;;  %v3116_v4 = vrot.slane %v4926_v28, 2 }
 0xaf1   : > { %v4930_v6 = vpop.eup %4929  ;;  %v3060_v44 = vrot.slane %v4928_v7, 1  ;;  %v3052_v33 = vmul.f32 %v4928_v7, %v4924_v17  ;;  %v3117_v22 = vrot.slane %v4928_v7, 2 }
 0xaf2   : > { %v4932_v8 = vpop.eup %4931  ;;  %v3061_v42 = vrot.slane %v4930_v6, 1  ;;  %v3096_v43 = vmul.f32 %v3082_v26, %v3059_v3  ;;  %v3118_v48 = vrot.slane %v4930_v6, 2 }
 0xaf3   : > { %v4934_v24 = vpop.eup %4933  ;;  %v3062_v62 = vrot.slane %v4932_v8, 1  ;;  %v3097_v47 = vmul.f32 %v3089_v55, %v3060_v44  ;;  %v3119_v57 = vrot.slane %v4932_v8, 2 }
 0xaf4   : > { %v4936_v29 = vpop.eup %4935  ;;  %v3053_v36 = vmul.f32 %v4934_v24, %v4930_v6  ;;  %v3098_v23 = vmul.f32 %v3090_v31, %v3061_v42  ;;  %v3100_v63 = vadd.f32 %v3096_v43, %v3051_v39 }
 0xaf5   : > { %v3054_v38 = vmul.f32 %v4936_v29, %v4932_v8  ;;  %v3099_v49 = vmul.f32 %v3091_v46, %v3062_v62  ;;  %v3101_v51 = vadd.f32 %v3097_v47, %v3052_v33  ;;  %v6215_v33 = vld [vmem:[%s6543_s8 + $0x38] sm:$0xff]   ;;  %v6224_v62 = vld [vmem:[%s6543_s8 + $0x30] sm:$0xff]   ;;  %v6231_v46 = vld [vmem:[%s6543_s8 + $0x28] sm:$0xff]  }
 0xaf6   : > { %v3102_v14 = vadd.f32 %v3098_v23, %v3053_v36  ;;  %v4369_v54 = vclamps-f32 %v3100_v63, 3.0  ;;  %v6238_v47 = vld [vmem:[%s6543_s8 + $0x20] sm:$0xff]   ;;  %v6245_v29 = vld [vmem:[%s6543_s8 + $0x18] sm:$0xff]   ;;  %v6252_v36 = vld [vmem:[%s6543_s8 + $0x10] sm:$0xff]  }
 0xaf7   : > { %v3103_v27 = vadd.f32 %v3099_v49, %v3054_v38  ;;  %v4370_v56 = vclamps-f32 %v3101_v51, 3.0  ;;  %v6259_v23 = vld [vmem:[%s6543_s8 + $0x8] sm:$0xff]   ;;  %v6266_v63 = vld [vmem:[%s6543_s8] sm:$0xff]  }
 0xaf8   : > { %v4371_v34 = vclamps-f32 %v3102_v14, 3.0  ;;  %4937 = vtanh.f32 %v4369_v54  ;;  %v6270_v14 = vpop.permute.xlu1 %3195 }
 0xaf9   : > { %v4372_v18 = vclamps-f32 %v3103_v27, 3.0  ;;  %4939 = vtanh.f32 %v4370_v56  ;;  %v3202_v35 = vcombine.low %v4369_v54, %v4370_v56  ;;  %vm3197_vm8 = vcmp.eq.s32.totalorder %v6270_v14, 1 }
 0xafa   : > { %4941 = vtanh.f32 %v4371_v34 }
 0xafb   : > { %v3203_v45 = vcombine.low %v4371_v34, %v4372_v18  ;;  %4943 = vtanh.f32 %v4372_v18  ;;  %v3210_v15 = vrot.slane %v3202_v35, %v5586_v11 }
 0xafd   : > { %v3217_v37 = vrot.slane %v3203_v45, %v5586_v11 }
 0xaff   : > { %v6207_v16 = vcombine.low %v3210_v15, %v3217_v37 }
 0xb05   : > { %v4938_v5 = vpop.eup %4937 }
 0xb06   : > { %v4940_v25 = vpop.eup %4939  ;;  %v3124_v50 = vmul.f32 %v4938_v5, %v3116_v4  ;;  %v6299_v5 = vld [vmem:[%s6541_s6 + $0x4c] ss:$16 sps:$4 sm:$0xff]  }
 0xb07   : > { %v4942_v13 = vpop.eup %4941  ;;  %v3125_v21 = vmul.f32 %v4940_v25, %v3117_v22  ;;  %v6309_v25 = vld [vmem:[%s6541_s6 + $0x48] ss:$16 sps:$4 sm:$0xff]  }
 0xb08   : > { %v4944_v58 = vpop.eup %4943  ;;  %v3126_v41 = vmul.f32 %v4942_v13, %v3118_v48  ;;  %v3128_v60 = vpack.c.bf16 %v3124_v50, %v3124_v50  ;;  %v6317_v48 = vld [vmem:[%s6541_s6 + $0x2c] ss:$16 sps:$4 sm:$0xff]   ;;  %v6323_v50 = vld [vmem:[%s6541_s6 + $0x28] ss:$16 sps:$4 sm:$0xff]  }
 0xb09   : > { %v3127_v1 = vmul.f32 %v4944_v58, %v3119_v57  ;;  %v3129_v17 = vpack.c.bf16 %v3125_v21, %v3125_v21  ;;  %v6329_v13 = vld [vmem:[%s6541_s6 + $0xc] ss:$16 sps:$4 sm:$0xff]   ;;  %v6335_v57 = vld [vmem:[%s6541_s6 + $0x8] ss:$16 sps:$4 sm:$0xff]  }
 0xb0a   : > { %v3130_v26 = vpack.c.bf16 %v3126_v41, %v3126_v41  ;;  %v3136_v39 = vunpack.c.l.b16 %v3128_v60 }
 0xb0b   : > { %v3131_v55 = vpack.c.bf16 %v3127_v1, %v3127_v1  ;;  %v3137_v3 = vunpack.c.l.b16 %v3129_v17 }
 0xb0c   : > { %v3138_v44 = vunpack.c.l.b16 %v3130_v26 }
 0xb0d   : > { %v3139_v42 = vunpack.c.l.b16 %v3131_v55  ;;  %v3140_v28 = vrot.slane %v3137_v3, 7  ;;  %v3265_v55 = vld [vmem:[#allocation2 + $0x6] ss:$8 sm:$0xf] }
 0xb0e   : > { %v3142_v31 = vrot.slane %v3138_v44, 6  ;;  %v3267_v3 = vld [vmem:[#allocation2 + $0x26] ss:$8 sm:$0xf] }
 0xb0f   : > { %v3141_v7 = vsel %vm1124_vm9, %v3140_v28, %v3136_v39  ;;  %v3144_v6 = vrot.slane %v3139_v42, 5 }
 0xb10   : > { %v3143_v43 = vsel %vm1127_vm10, %v3142_v31, %v3141_v7  ;;  %v3269_v31 = vld [vmem:[#allocation2 + $0x46] ss:$8 sm:$0xf] }
 0xb11   : > { %v3145_v8 = vsel %vm1130_vm11, %v3144_v6, %v3143_v43  ;;  %v3271_v7 = vld [vmem:[#allocation2 + $0x66] ss:$8 sm:$0xf] }
 0xb12   : > { %v3146_v24 = vpack.c.b16 %v3145_v8, %v3145_v8 }
 0xb14   : > { %4593 = vmatmul.mubr.bf16.vlgmr.msra.gmra.mxu0 %v3146_v24 }
 0xb15   : > { %4597 = vmatpush3.bf16.msra.mxu0 %v6215_v33  ;;  %4612 = vmatprep.mubr.msk.bf16.mxu0 %vm5193_vm5, %v5192_v40 }
 0xb16   : > { %4598 = vmatprep.subr.bf16.mxu0 %v5192_v40 }
 0xb19   : > { %4599 = vmatpush3.bf16.msra.mxu0 %v6224_v62 }
 0xb1a   : > { %4600 = vmatprep.subr.bf16.mxu0 %v5192_v40 }
 0xb1d   : > { %4601 = vmatpush3.bf16.msra.mxu0 %v6231_v46 }
 0xb1e   : > { %4602 = vmatprep.subr.bf16.mxu0 %v5192_v40 }
 0xb21   : > { %4603 = vmatpush3.bf16.msra.mxu0 %v6238_v47 }
 0xb22   : > { %4604 = vmatprep.subr.bf16.mxu0 %v5192_v40 }
 0xb25   : > { %4605 = vmatpush3.bf16.msra.mxu0 %v6245_v29 }
 0xb26   : > { %4606 = vmatprep.subr.bf16.mxu0 %v5192_v40 }
 0xb29   : > { %4607 = vmatpush3.bf16.msra.mxu0 %v6252_v36 }
 0xb2a   : > { %4608 = vmatprep.subr.bf16.mxu0 %v5192_v40 }
 0xb2d   : > { %4609 = vmatpush3.bf16.msra.mxu0 %v6259_v23 }
 0xb2e   : > { %4610 = vmatprep.subr.bf16.mxu0 %v5192_v40 }
 0xb31   : > { %4611 = vmatpush3.bf16.msra.mxu0 %v6266_v63 }
 0xb32   : > { %4616 = vmatprep.subr.bf16.mxu0 %v5192_v40 }
 0xbd4   : > { %v3182_v38 = vpop.f32.mrf.mxu0 }
 0xbd5   : > { %v4373_v49 = vclamps-f32 %v3182_v38, 3.0 }
 0xbd6   : > { %v4594_v51 = vpop.f32.mrf.mxu0 }
 0xbd7   : > { %v3190_v54 = vmul.f32 %v6017_v12, %v4373_v49 }
 0xbd8   : > { %v3185_v27 = vpop.f32.mrf.mxu0 }
 0xbd9   : > { %v6277_v56 = vsel %vm3197_vm8, %v3190_v54, %v6108_v2  ;;  %v3229_v34 = vsel %vm3197_vm8, %v3190_v54, 0.0  ;;  %v6289_v2 = vld [vmem:[%s6541_s6 + $0x68] ss:$16 sps:$4 sm:$0xff]  }
 0xbda   : > { %v3237_v18 = vrot.slane %v3229_v34, %v5586_v11  ;;  %v3272_v35 = vpack.c.bf16 %v6277_v56, %v6277_v56  ;;  %v4595_v12 = vpop.f32.mrf.mxu0 }
 0xbdc   : > { %v3238_v45 = vcombine.high %v3237_v18, %v3237_v18  ;;  %v3245_v15 = vrot.slane %v3237_v18, %v5586_v11  ;;  %4374 = vmatmul.mubr.msk.bf16.vlgmr.msra.gmra.mxu1 %vm862_vm4, %v3272_v35  ;;  %v3225_v18 = vrot.slane %v6207_v16, %v5586_v11 }
 0xbdd   : > { %3326 = vmatpush1.bf16.msra.mxu1 %v6289_v2  ;;  %3349 = vmatprep.mubr.bf16.mxu1 %v5191_v9 }
 0xbde   : > { %v3252_v37 = vrot.slane %v3238_v45, %v5586_v11  ;;  %v3253_v4 = vcombine.high %v3245_v15, %v3245_v15  ;;  %3259 = vst.msk [vmem:[%s5342_s21 + $0x5] sm:$0x1] %vm1293_vm13, %v3245_v15  ;;  %3327 = vmatprep.subr.bf16.mxu1 %v6299_v5 }
 0xbe0   : > { %v3254_v22 = vcombine.high %v3252_v37, %v3252_v37  ;;  %3260 = vst.msk [vmem:[%s5342_s21 + $0xd] sm:$0x1] %vm1293_vm13, %v3252_v37  ;;  %3261 = vst.msk [vmem:[%s5342_s21 + $0x15] sm:$0x1] %vm1293_vm13, %v3253_v4 }
 0xbe1   : > { %3328 = vmatpush1.bf16.msra.mxu1 %v6309_v25 }
 0xbe2   : > { %3262 = vst.msk [vmem:[%s5342_s21 + $0x1d] sm:$0x1] %vm1293_vm13, %v3254_v22  ;;  %3329 = vmatprep.subr.bf16.mxu1 %v6317_v48 }
 0xbe5   : > { %3330 = vmatpush1.bf16.msra.mxu1 %v6323_v50 }
 0xbe6   : > { %3331 = vmatprep.subr.bf16.mxu1 %v6329_v13 }
 0xbe9   : > { %3332 = vmatpush1.bf16.msra.mxu1 %v6335_v57 }
 0xbea   : > { %3677 = vmatprep.subr.bf16.mxu1 %v6137_v10 }
 0xbec   : > { %4375 = vmatmul.mubr.msk.bf16.vlgmr.msra.gmra.mxu1 %vm862_vm4, %v3272_v35 }
 0xbed   : > { %3678 = vmatpush1.bf16.msra.mxu1 %v6144_v0  ;;  %3701 = vmatprep.mubr.bf16.mxu1 %v5191_v9 }
 0xbee   : > { %3679 = vmatprep.subr.bf16.mxu1 %v6151_v20 }
 0xbf1   : > { %3680 = vmatpush1.bf16.msra.mxu1 %v6157_v30 }
 0xbf2   : > { %3681 = vmatprep.subr.bf16.mxu1 %v6163_v32 }
 0xbf5   : > { %3682 = vmatpush1.bf16.msra.mxu1 %v6169_v53 }
 0xbf6   : > { %3683 = vmatprep.subr.bf16.mxu1 %v6175_v52 }
 0xbf9   : > { %3684 = vmatpush1.bf16.msra.mxu1 %v6181_v61 }
 0xbfa   : > { %3718 = vmatprep.subr.bf16.mxu1 %v6187_v59 }
 0xc9c   : > { %v3310_v10 = vpop.f32.mrf.mxu1 }
 0xc9e   : > { %v3312_v21 = vpop.f32.mrf.mxu1 }
 0xc9f   : > { %v3362_v1 = vcombine.low %v3310_v10, %v3312_v21  ;;  %v6358_v21 = vsel %vm3197_vm8, %v3225_v18, %v6199_v19 }
 0xca0   : > { %v3314_v58 = vpop.f32.mrf.mxu1  ;;  %v3467_v16 = vrot.slane %v6358_v21, %v5586_v11 }
 0xca1   : > { %v3370_v30 = vrot.slane %v3362_v1, %v5586_v11 }
 0xca2   : > { %v3315_v0 = vpop.f32.mrf.mxu1  ;;  %v3468_v58 = vcombine.high %v3467_v16, %v3467_v16  ;;  %v3475_v1 = vrot.slane %v3467_v16, %v5586_v11 }
 0xcac   : > { %v3351_v41 = vpop.f32.mrf.mxu1 }
 0xcae   : > { %v3353_v60 = vpop.f32.mrf.mxu1 }
 0xcaf   : > { %v3363_v20 = vcombine.low %v3351_v41, %v3353_v60 }
 0xcb0   : > { %v3355_v17 = vpop.f32.mrf.mxu1 }
 0xcb1   : > { %v3377_v32 = vrot.slane %v3363_v20, %v5586_v11  ;;  %v3482_v20 = vrot.slane %v3468_v58, %v5586_v11 }
 0xcb2   : > { %v3356_v53 = vpop.f32.mrf.mxu1 }
 0xcb3   : > { %v3378_v26 = vcombine.low %v3370_v30, %v3377_v32  ;;  %v3379_v52 = vcombine.high %v3370_v30, %v3377_v32 }
 0xcb5   : > { %v3386_v61 = vrot.slane %v3378_v26, %v5586_v11  ;;  %v3393_v59 = vrot.slane %v3379_v52, %v5586_v11  ;;  %v3483_v52 = vcombine.high %v3475_v1, %v3475_v1 }
 0xcb7   : > { %v3394_v44 = vcombine.high %v3386_v61, %v3386_v61  ;;  %v3395_v39 = vcombine.high %v3393_v59, %v3393_v59  ;;  %v3400_v42 = vadd.f32 %v3386_v61, %v3265_v55  ;;  %v3401_v28 = vadd.f32 %v3393_v59, %v3267_v3 }
 0xcb9   : > { %v3402_v6 = vadd.f32 %v3394_v44, %v3269_v31  ;;  %v3403_v43 = vadd.f32 %v3395_v39, %v3271_v7  ;;  %v4376_v8 = vmul.f32 -1.442695, %v3400_v42  ;;  %v4377_v24 = vmul.f32 -1.442695, %v3401_v28 }
 0xcba   : > { %v3432_v51 = vrot.slane %v3400_v42, 3  ;;  %v3433_v54 = vrot.slane %v3401_v28, 3  ;;  %v3484_v44 = vcombine.high %v3482_v20, %v3482_v20 }
 0xcbb   : > { %4945 = vpow2.f32 %v4376_v8  ;;  %v4378_v38 = vmul.f32 -1.442695, %v3402_v6  ;;  %v4379_v49 = vmul.f32 -1.442695, %v3403_v43  ;;  %v3434_v4 = vrot.slane %v3402_v6, 3 }
 0xcbc   : > { %4947 = vpow2.f32 %v4377_v24  ;;  %v3435_v10 = vrot.slane %v3403_v43, 3 }
 0xcbd   : > { %4949 = vpow2.f32 %v4378_v38 }
 0xcbe   : > { %4951 = vpow2.f32 %v4379_v49 }
 0xcbf   : > { %4953 = vtanh.f32 %v3432_v51 }
 0xcc0   : > { %4955 = vtanh.f32 %v3433_v54 }
 0xcc8   : > { %v4946_v27 = vpop.eup %4945 }
 0xcc9   : > { %v4948_v34 = vpop.eup %4947  ;;  %v3416_v35 = vadd.f32 1.0, %v4946_v27 }
 0xcca   : > { %v4950_v12 = vpop.eup %4949  ;;  %v3417_v45 = vadd.f32 1.0, %v4948_v34 }
 0xccb   : > { %v4952_v15 = vpop.eup %4951  ;;  %v3418_v37 = vadd.f32 1.0, %v4950_v12  ;;  %4957 = vrcp.f32 %v3416_v35 }
 0xccc   : > { %v3419_v22 = vadd.f32 1.0, %v4952_v15  ;;  %4959 = vrcp.f32 %v3417_v45  ;;  %v4954_v0 = vpop.eup %4953 }
 0xccd   : > { %4961 = vrcp.f32 %v3418_v37  ;;  %v4956_v41 = vpop.eup %4955 }
 0xcce   : > { %4963 = vrcp.f32 %v3419_v22 }
 0xccf   : > { %4965 = vtanh.f32 %v3434_v4 }
 0xcd0   : > { %4967 = vtanh.f32 %v3435_v10 }
 0xcd8   : > { %v4958_v60 = vpop.eup %4957 }
 0xcd9   : > { %v4960_v17 = vpop.eup %4959  ;;  %v3452_v30 = vrot.slane %v4958_v60, 1  ;;  %v3444_v53 = vmul.f32 %v4958_v60, %v4954_v0  ;;  %v3509_v15 = vrot.slane %v4958_v60, 2 }
 0xcda   : > { %v4962_v14 = vpop.eup %4961  ;;  %v3453_v19 = vrot.slane %v4960_v17, 1  ;;  %v3445_v55 = vmul.f32 %v4960_v17, %v4956_v41  ;;  %v3510_v4 = vrot.slane %v4960_v17, 2 }
 0xcdb   : > { %v4964_v32 = vpop.eup %4963  ;;  %v3454_v26 = vrot.slane %v4962_v14, 1  ;;  %v3489_v61 = vmul.f32 %v3475_v1, %v3452_v30  ;;  %v3511_v10 = vrot.slane %v4962_v14, 2 }
 0xcdc   : > { %v4966_v59 = vpop.eup %4965  ;;  %v3455_v3 = vrot.slane %v4964_v32, 1  ;;  %v3490_v39 = vmul.f32 %v3482_v20, %v3453_v19  ;;  %v3512_v0 = vrot.slane %v4964_v32, 2 }
 0xcdd   : > { %v4968_v42 = vpop.eup %4967  ;;  %v3446_v28 = vmul.f32 %v4966_v59, %v4962_v14  ;;  %v3491_v31 = vmul.f32 %v3483_v52, %v3454_v26  ;;  %v3493_v7 = vadd.f32 %v3489_v61, %v3444_v53 }
 0xcde   : > { %v3447_v6 = vmul.f32 %v4968_v42, %v4964_v32  ;;  %v3492_v43 = vmul.f32 %v3484_v44, %v3455_v3  ;;  %v3494_v8 = vadd.f32 %v3490_v39, %v3445_v55 }
 0xcdf   : > { %v3495_v24 = vadd.f32 %v3491_v31, %v3446_v28  ;;  %v4380_v38 = vclamps-f32 %v3493_v7, 3.0 }
 0xce0   : > { %v3496_v49 = vadd.f32 %v3492_v43, %v3447_v6  ;;  %v4381_v51 = vclamps-f32 %v3494_v8, 3.0 }
 0xce1   : > { %v4382_v54 = vclamps-f32 %v3495_v24, 3.0  ;;  %4969 = vtanh.f32 %v4380_v38 }
 0xce2   : > { %v4383_v27 = vclamps-f32 %v3496_v49, 3.0  ;;  %4971 = vtanh.f32 %v4381_v51  ;;  %v3595_v34 = vcombine.low %v4380_v38, %v4381_v51 }
 0xce3   : > { %4973 = vtanh.f32 %v4382_v54 }
 0xce4   : > { %v3596_v18 = vcombine.low %v4382_v54, %v4383_v27  ;;  %4975 = vtanh.f32 %v4383_v27  ;;  %v3603_v35 = vrot.slane %v3595_v34, %v5586_v11 }
 0xce6   : > { %v3610_v12 = vrot.slane %v3596_v18, %v5586_v11 }
 0xce8   : > { %v6366_v45 = vcombine.low %v3603_v35, %v3610_v12  ;;  %v3658_v12 = vld [vmem:[#allocation2 + $0x7] ss:$8 sm:$0xf] }
 0xcee   : > { %v4970_v37 = vpop.eup %4969 }
 0xcef   : > { %v4972_v22 = vpop.eup %4971  ;;  %v3517_v16 = vmul.f32 %v4970_v37, %v3509_v15  ;;  %v3660_v15 = vld [vmem:[#allocation2 + $0x27] ss:$8 sm:$0xf] }
 0xcf0   : > { %v4974_v58 = vpop.eup %4973  ;;  %v3518_v41 = vmul.f32 %v4972_v22, %v3510_v4 }
 0xcf1   : > { %v4976_v1 = vpop.eup %4975  ;;  %v3519_v20 = vmul.f32 %v4974_v58, %v3511_v10  ;;  %v3521_v19 = vpack.c.bf16 %v3517_v16, %v3517_v16  ;;  %v3662_v16 = vld [vmem:[#allocation2 + $0x47] ss:$8 sm:$0xf] }
 0xcf2   : > { %v3520_v30 = vmul.f32 %v4976_v1, %v3512_v0  ;;  %v3522_v53 = vpack.c.bf16 %v3518_v41, %v3518_v41  ;;  %v3664_v58 = vld [vmem:[#allocation2 + $0x67] ss:$8 sm:$0xf] }
 0xcf3   : > { %v3523_v26 = vpack.c.bf16 %v3519_v20, %v3519_v20  ;;  %v3529_v55 = vunpack.c.l.b16 %v3521_v19 }
 0xcf4   : > { %v3524_v52 = vpack.c.bf16 %v3520_v30, %v3520_v30  ;;  %v3530_v61 = vunpack.c.l.b16 %v3522_v53 }
 0xcf5   : > { %v3531_v59 = vunpack.c.l.b16 %v3523_v26 }
 0xcf6   : > { %v3532_v3 = vunpack.c.l.b16 %v3524_v52  ;;  %v3533_v60 = vrot.slane %v3530_v61, 7 }
 0xcf7   : > { %v3535_v44 = vrot.slane %v3531_v59, 6  ;;  %v3618_v59 = vrot.slane %v6366_v45, %v5586_v11 }
 0xcf8   : > { %v3534_v17 = vsel %vm1124_vm9, %v3533_v60, %v3529_v55  ;;  %v3537_v14 = vrot.slane %v3532_v3, 5 }
 0xcf9   : > { %v3536_v39 = vsel %vm1127_vm10, %v3535_v44, %v3534_v17 }
 0xcfa   : > { %v3538_v32 = vsel %vm1130_vm11, %v3537_v14, %v3536_v39 }
 0xcfb   : > { %v3539_v42 = vpack.c.b16 %v3538_v32, %v3538_v32 }
 0xcfd   : > { %4613 = vmatmul.mubr.bf16.vlgmr.msra.gmra.mxu0 %v3539_v42 }
 0xcfe   : > { %4617 = vmatpush3.bf16.msra.mxu0 %v6215_v33  ;;  %4632 = vmatprep.mubr.msk.bf16.mxu0 %vm5193_vm5, %v5192_v40 }
 0xcff   : > { %4618 = vmatprep.subr.bf16.mxu0 %v5192_v40 }
 0xd02   : > { %4619 = vmatpush3.bf16.msra.mxu0 %v6224_v62  ;;  %v6388_v62 = vpop.permute.xlu0 %3588 }
 0xd03   : > { %4620 = vmatprep.subr.bf16.mxu0 %v5192_v40  ;;  %vm3590_vm5 = vcmp.eq.s32.totalorder %v6388_v62, 1 }
 0xd04   : > { %v3620_v42 = vsel %vm3590_vm5, %v3618_v59, %v6358_v21 }
 0xd05   : > { %v3860_v45 = vrot.slane %v3620_v42, %v5586_v11 }
 0xd06   : > { %4621 = vmatpush3.bf16.msra.mxu0 %v6231_v46 }
 0xd07   : > { %4622 = vmatprep.subr.bf16.mxu0 %v5192_v40 }
 0xd0a   : > { %4623 = vmatpush3.bf16.msra.mxu0 %v6238_v47 }
 0xd0b   : > { %4624 = vmatprep.subr.bf16.mxu0 %v5192_v40 }
 0xd0e   : > { %4625 = vmatpush3.bf16.msra.mxu0 %v6245_v29  ;;  %v6393_v29 = vld [vmem:[%s6544_s9] sm:$0xf] }
 0xd0f   : > { %4626 = vmatprep.subr.bf16.mxu0 %v5192_v40 }
 0xd12   : > { %4627 = vmatpush3.bf16.msra.mxu0 %v6252_v36 }
 0xd13   : > { %4628 = vmatprep.subr.bf16.mxu0 %v5192_v40 }
 0xd16   : > { %4629 = vmatpush3.bf16.msra.mxu0 %v6259_v23 }
 0xd17   : > { %4630 = vmatprep.subr.bf16.mxu0 %v5192_v40 }
 0xd1a   : > { %4631 = vmatpush3.bf16.msra.mxu0 %v6266_v63 }
 0xdbd   : > { %v3575_v33 = vpop.f32.mrf.mxu0 }
 0xdbe   : > { %v4384_v46 = vclamps-f32 %v3575_v33, 3.0  ;;  %v3861_v33 = vcombine.high %v3860_v45, %v3860_v45 }
 0xdbf   : > { %v4614_v47 = vpop.f32.mrf.mxu0 }
 0xdc0   : > { %v3583_v36 = vmul.f32 %v6393_v29, %v4384_v46 }
 0xdc1   : > { %v3578_v23 = vpop.f32.mrf.mxu0 }
 0xdc2   : > { %v6400_v40 = vsel %vm3590_vm5, %v3583_v36, %v6277_v56  ;;  %v3622_v63 = vsel %vm3590_vm5, %v3583_v36, 0.0  ;;  %v3868_v36 = vrot.slane %v3860_v45, %v5586_v11 }
 0xdc3   : > { %v3630_v28 = vrot.slane %v3622_v63, %v5586_v11  ;;  %v3665_v31 = vpack.c.bf16 %v6400_v40, %v6400_v40  ;;  %v4615_v7 = vpop.f32.mrf.mxu0  ;;  %v3875_v63 = vrot.slane %v3861_v33, %v5586_v11 }
 0xdc5   : > { %v3631_v6 = vcombine.high %v3630_v28, %v3630_v28  ;;  %v3638_v43 = vrot.slane %v3630_v28, %v5586_v11  ;;  %4385 = vmatmul.mubr.msk.bf16.vlgmr.msra.gmra.mxu1 %vm862_vm4, %v3665_v31 }
 0xdc6   : > { %3719 = vmatpush1.bf16.msra.mxu1 %v6289_v2  ;;  %3742 = vmatprep.mubr.bf16.mxu1 %v5191_v9 }
 0xdc7   : > { %v3645_v56 = vrot.slane %v3631_v6, %v5586_v11  ;;  %v3646_v8 = vcombine.high %v3638_v43, %v3638_v43  ;;  %3652 = vst.msk [vmem:[%s5342_s21 + $0x6] sm:$0x1] %vm1293_vm13, %v3638_v43  ;;  %3720 = vmatprep.subr.bf16.mxu1 %v6299_v5 }
 0xdc9   : > { %v3647_v24 = vcombine.high %v3645_v56, %v3645_v56  ;;  %3653 = vst.msk [vmem:[%s5342_s21 + $0xe] sm:$0x1] %vm1293_vm13, %v3645_v56  ;;  %3654 = vst.msk [vmem:[%s5342_s21 + $0x16] sm:$0x1] %vm1293_vm13, %v3646_v8  ;;  %v3876_v56 = vcombine.high %v3868_v36, %v3868_v36 }
 0xdca   : > { %3721 = vmatpush1.bf16.msra.mxu1 %v6309_v25 }
 0xdcb   : > { %3655 = vst.msk [vmem:[%s5342_s21 + $0x1e] sm:$0x1] %vm1293_vm13, %v3647_v24  ;;  %3722 = vmatprep.subr.bf16.mxu1 %v6317_v48 }
 0xdce   : > { %3723 = vmatpush1.bf16.msra.mxu1 %v6323_v50 }
 0xdcf   : > { %3724 = vmatprep.subr.bf16.mxu1 %v6329_v13 }
 0xdd2   : > { %3725 = vmatpush1.bf16.msra.mxu1 %v6335_v57 }
 0xdd5   : > { %4386 = vmatmul.mubr.msk.bf16.vlgmr.msra.gmra.mxu1 %vm862_vm4, %v3665_v31 }
 0xe85   : > { %v3703_v9 = vpop.f32.mrf.mxu1 }
 0xe87   : > { %v3705_v2 = vpop.f32.mrf.mxu1 }
 0xe88   : > { %v3755_v51 = vcombine.low %v3703_v9, %v3705_v2 }
 0xe89   : > { %v3707_v5 = vpop.f32.mrf.mxu1 }
 0xe8a   : > { %v3763_v34 = vrot.slane %v3755_v51, %v5586_v11  ;;  %v3877_v5 = vcombine.high %v3875_v63, %v3875_v63 }
 0xe8b   : > { %v3708_v38 = vpop.f32.mrf.mxu1 }
 0xe95   : > { %v3744_v49 = vpop.f32.mrf.mxu1 }
 0xe97   : > { %v3746_v54 = vpop.f32.mrf.mxu1 }
 0xe98   : > { %v3756_v25 = vcombine.low %v3744_v49, %v3746_v54 }
 0xe99   : > { %v3748_v27 = vpop.f32.mrf.mxu1 }
 0xe9a   : > { %v3770_v48 = vrot.slane %v3756_v25, %v5586_v11 }
 0xe9b   : > { %v3749_v50 = vpop.f32.mrf.mxu1 }
 0xe9c   : > { %v3771_v18 = vcombine.low %v3763_v34, %v3770_v48  ;;  %v3772_v13 = vcombine.high %v3763_v34, %v3770_v48 }
 0xe9e   : > { %v3779_v57 = vrot.slane %v3771_v18, %v5586_v11  ;;  %v3786_v35 = vrot.slane %v3772_v13, %v5586_v11 }
 0xea0   : > { %v3787_v37 = vcombine.high %v3779_v57, %v3779_v57  ;;  %v3788_v4 = vcombine.high %v3786_v35, %v3786_v35  ;;  %v3793_v22 = vadd.f32 %v3779_v57, %v3658_v12  ;;  %v3794_v10 = vadd.f32 %v3786_v35, %v3660_v15 }
 0xea2   : > { %v3795_v0 = vadd.f32 %v3787_v37, %v3662_v16  ;;  %v3796_v41 = vadd.f32 %v3788_v4, %v3664_v58  ;;  %v4387_v1 = vmul.f32 -1.442695, %v3793_v22  ;;  %v4388_v20 = vmul.f32 -1.442695, %v3794_v10 }
 0xea3   : > { %v3825_v53 = vrot.slane %v3793_v22, 3  ;;  %v3826_v26 = vrot.slane %v3794_v10, 3  ;;  %v3982_v10 = vpop.permute.xlu1 %3981 }
 0xea4   : > { %4977 = vpow2.f32 %v4387_v1  ;;  %v4389_v30 = vmul.f32 -1.442695, %v3795_v0  ;;  %v4390_v19 = vmul.f32 -1.442695, %v3796_v41  ;;  %v3827_v14 = vrot.slane %v3795_v0, 3 }
 0xea5   : > { %4979 = vpow2.f32 %v4388_v20  ;;  %v3828_v32 = vrot.slane %v3796_v41, 3  ;;  %vm3983_vm4 = vcmp.eq.s32.totalorder %v3982_v10, 1 }
 0xea6   : > { %4981 = vpow2.f32 %v4389_v30 }
 0xea7   : > { %4983 = vpow2.f32 %v4390_v19 }
 0xea8   : > { %4985 = vtanh.f32 %v3825_v53 }
 0xea9   : > { %4987 = vtanh.f32 %v3826_v26 }
 0xeb1   : > { %v4978_v52 = vpop.eup %4977 }
 0xeb2   : > { %v4980_v61 = vpop.eup %4979  ;;  %v3809_v55 = vadd.f32 1.0, %v4978_v52 }
 0xeb3   : > { %v4982_v3 = vpop.eup %4981  ;;  %v3810_v60 = vadd.f32 1.0, %v4980_v61 }
 0xeb4   : > { %v4984_v44 = vpop.eup %4983  ;;  %v3811_v17 = vadd.f32 1.0, %v4982_v3  ;;  %4989 = vrcp.f32 %v3809_v55 }
 0xeb5   : > { %v3812_v39 = vadd.f32 1.0, %v4984_v44  ;;  %4991 = vrcp.f32 %v3810_v60  ;;  %v4986_v46 = vpop.eup %4985 }
 0xeb6   : > { %4993 = vrcp.f32 %v3811_v17  ;;  %v4988_v47 = vpop.eup %4987 }
 0xeb7   : > { %4995 = vrcp.f32 %v3812_v39 }
 0xeb8   : > { %4997 = vtanh.f32 %v3827_v14 }
 0xeb9   : > { %4999 = vtanh.f32 %v3828_v32 }
 0xec1   : > { %v4990_v23 = vpop.eup %4989 }
 0xec2   : > { %v4992_v28 = vpop.eup %4991  ;;  %v3845_v31 = vrot.slane %v4990_v23, 1  ;;  %v3837_v21 = vmul.f32 %v4990_v23, %v4986_v46  ;;  %v3902_v41 = vrot.slane %v4990_v23, 2 }
 0xec3   : > { %v4994_v7 = vpop.eup %4993  ;;  %v3846_v6 = vrot.slane %v4992_v28, 1  ;;  %v3838_v9 = vmul.f32 %v4992_v28, %v4988_v47  ;;  %v3903_v20 = vrot.slane %v4992_v28, 2 }
 0xec4   : > { %v4996_v62 = vpop.eup %4995  ;;  %v3847_v43 = vrot.slane %v4994_v7, 1  ;;  %v3882_v8 = vmul.f32 %v3868_v36, %v3845_v31  ;;  %v3904_v19 = vrot.slane %v4994_v7, 2 }
 0xec5   : > { %v4998_v24 = vpop.eup %4997  ;;  %v3848_v2 = vrot.slane %v4996_v62, 1  ;;  %v3883_v38 = vmul.f32 %v3875_v63, %v3846_v6  ;;  %v3905_v52 = vrot.slane %v4996_v62, 2 }
 0xec6   : > { %v5000_v49 = vpop.eup %4999  ;;  %v3839_v51 = vmul.f32 %v4998_v24, %v4994_v7  ;;  %v3884_v54 = vmul.f32 %v3876_v56, %v3847_v43  ;;  %v3886_v25 = vadd.f32 %v3882_v8, %v3837_v21 }
 0xec7   : > { %v3840_v27 = vmul.f32 %v5000_v49, %v4996_v62  ;;  %v3885_v34 = vmul.f32 %v3877_v5, %v3848_v2  ;;  %v3887_v48 = vadd.f32 %v3883_v38, %v3838_v9 }
 0xec8   : > { %v3888_v50 = vadd.f32 %v3884_v54, %v3839_v51  ;;  %v4391_v18 = vclamps-f32 %v3886_v25, 3.0 }
 0xec9   : > { %v3889_v13 = vadd.f32 %v3885_v34, %v3840_v27  ;;  %v4392_v57 = vclamps-f32 %v3887_v48, 3.0 }
 0xeca   : > { %v4393_v35 = vclamps-f32 %v3888_v50, 3.0  ;;  %5001 = vtanh.f32 %v4391_v18 }
 0xecb   : > { %v4394_v12 = vclamps-f32 %v3889_v13, 3.0  ;;  %5003 = vtanh.f32 %v4392_v57  ;;  %v3988_v15 = vcombine.low %v4391_v18, %v4392_v57 }
 0xecc   : > { %5005 = vtanh.f32 %v4393_v35 }
 0xecd   : > { %v3989_v37 = vcombine.low %v4393_v35, %v4394_v12  ;;  %5007 = vtanh.f32 %v4394_v12  ;;  %v3996_v4 = vrot.slane %v3988_v15, %v5586_v11 }
 0xecf   : > { %v4003_v22 = vrot.slane %v3989_v37, %v5586_v11 }
 0xed1   : > { %v4004_v16 = vcombine.low %v3996_v4, %v4003_v22 }
 0xed3   : > { %v4011_v58 = vrot.slane %v4004_v16, %v5586_v11 }
 0xed5   : > { %v4013_v0 = vsel %vm3983_vm4, %v4011_v58, %v3620_v42 }
 0xed6   : > { %4051 = vst [vmem:[#allocation10] sm:$0xf] %v4013_v0 }
 0xed7   : > { %v5002_v1 = vpop.eup %5001 }
 0xed8   : > { %v5004_v30 = vpop.eup %5003  ;;  %v3910_v53 = vmul.f32 %v5002_v1, %v3902_v41 }
 0xed9   : > { %v5006_v26 = vpop.eup %5005  ;;  %v3911_v61 = vmul.f32 %v5004_v30, %v3903_v20 }
 0xeda   : > { %v5008_v59 = vpop.eup %5007  ;;  %v3912_v55 = vmul.f32 %v5006_v26, %v3904_v19  ;;  %v3914_v60 = vpack.c.bf16 %v3910_v53, %v3910_v53 }
 0xedb   : > { %v3913_v3 = vmul.f32 %v5008_v59, %v3905_v52  ;;  %v3915_v44 = vpack.c.bf16 %v3911_v61, %v3911_v61 }
 0xedc   : > { %v3916_v17 = vpack.c.bf16 %v3912_v55, %v3912_v55  ;;  %v3922_v42 = vunpack.c.l.b16 %v3914_v60 }
 0xedd   : > { %v3917_v14 = vpack.c.bf16 %v3913_v3, %v3913_v3  ;;  %v3923_v39 = vunpack.c.l.b16 %v3915_v44 }
 0xede   : > { %v3924_v32 = vunpack.c.l.b16 %v3916_v17 }
 0xedf   : > { %v3925_v45 = vunpack.c.l.b16 %v3917_v14  ;;  %v3926_v33 = vrot.slane %v3923_v39, 7 }
 0xee0   : > { %v3928_v46 = vrot.slane %v3924_v32, 6 }
 0xee1   : > { %v3927_v47 = vsel %vm1124_vm9, %v3926_v33, %v3922_v42  ;;  %v3930_v36 = vrot.slane %v3925_v45, 5 }
 0xee2   : > { %v3929_v23 = vsel %vm1127_vm10, %v3928_v46, %v3927_v47 }
 0xee3   : > { %v3931_v63 = vsel %vm1130_vm11, %v3930_v36, %v3929_v23 }
 0xee4   : > { %v3932_v28 = vpack.c.b16 %v3931_v63, %v3931_v63 }
 0xee6   : > { %4633 = vmatmul.mubr.bf16.vlgmr.msra.gmra.mxu0 %v3932_v28 }
 0xfa6   : > { %v3968_v31 = vpop.f32.mrf.mxu0 }
 0xfa7   : > { %v4395_v7 = vclamps-f32 %v3968_v31, 3.0 }
 0xfa8   : > { %v4634_v6 = vpop.f32.mrf.mxu0 }
 0xfa9   : > { %v3976_v62 = vmul.f32 %v6393_v29, %v4395_v7 }
 0xfaa   : > { %v3971_v21 = vpop.f32.mrf.mxu0 }
 0xfab   : > { %v4014_v43 = vsel %vm3983_vm4, %v3976_v62, %v6400_v40  ;;  %v4015_v56 = vsel %vm3983_vm4, %v3976_v62, 0.0 }
 0xfac   : > { %v4023_v8 = vrot.slane %v4015_v56, %v5586_v11  ;;  %4050 = vst.msk [vmem:[#allocation8] sm:$0xf] %vm4049_vm12, %v4014_v43  ;;  %v4635_v24 = vpop.f32.mrf.mxu0 }
 0xfae   : > { %v4024_v9 = vcombine.high %v4023_v8, %v4023_v8  ;;  %v4031_v2 = vrot.slane %v4023_v8, %v5586_v11 }
 0xfb0   : > { %v4038_v5 = vrot.slane %v4024_v9, %v5586_v11  ;;  %v4039_v38 = vcombine.high %v4031_v2, %v4031_v2  ;;  %4045 = vst.msk [vmem:[%s5342_s21 + $0x7] sm:$0x1] %vm1293_vm13, %v4031_v2 }
 0xfb2   : > { %v4040_v29 = vcombine.high %v4038_v5, %v4038_v5  ;;  %4046 = vst.msk [vmem:[%s5342_s21 + $0xf] sm:$0x1] %vm1293_vm13, %v4038_v5  ;;  %4047 = vst.msk [vmem:[%s5342_s21 + $0x17] sm:$0x1] %vm1293_vm13, %v4039_v38 }
 0xfb4   : > { %4048 = vst.msk [vmem:[%s5342_s21 + $0x1f] sm:$0x1] %vm1293_vm13, %v4040_v29 }
 0xfb5 PF: > { %s5195_s3 = smov [#allocation8]   ;;  %s4397_s20 = sshll.u32 %s5180_s26, 7 }
 0xfb6   : > { %s4084_s4 = sshll.u32 %s5195_s3, 4  ;;  %s4085_s4 = int_to_ptr.vmem [resolvable:$true] %s4084_s4 }
 0xfb7   : > { %s5060_s0 = scalar_lea.vmem %s4085_s4, 64  ;;  %p5067_p8 = scmp.lt.s32.totalorder %s4085_s4, %s4085_s4 }
 0xfb8   : > { %p5061_p4 = scmp.ne.s32.totalorder %s4085_s4, %s5060_s0  ;;  %p5068_p10 = scmp.lt.s32.totalorder %s5060_s0, %s5060_s0 }
 0xfba   : > { %p5062_p6 = pnand %p5061_p4, %p5306_p3  ;;  %p5069_p11 = por %p5068_p10, %p5067_p8 }
 0xfbc   : > { %p5063_p7 = pneg %p5062_p6 }
 0xfbe   : > { %p5070_p12 = pnand %p5069_p11, %p5063_p7 }
 0xfc0   : > { %5073 = shalt.err (!%p5070_p12)
}
 0xfc1   : > { %4638 = dma.vmem_to_hbm [thread:$0]  (%p5306_p3), %s4085_s4, 64, %s6546_s11, [#allocation9]  }
 0xfc2   : > { %s6472_s22 = scalar_lea.hbm %s6545_s10, %s4397_s20  ;;  %s4068_s13 = sshll.u32 %s5342_s21, 4  ;;  %s6475_s13 = int_to_ptr.vmem [resolvable:$true] %s4068_s13 }
 0xfc3   : > { %s6560_s2 = sand.u32 1, %s5172_s24   ;;  %s5084_s0 = scalar_lea.vmem %s6475_s13, 512 }
 0xfc4   : > { %s6479_s3 = scalar_lea.sflag [#allocation7], %s6560_s2  ;;  %p5085_p13 = scmp.ne.s32.totalorder %s6475_s13, %s5084_s0 }
 0xfc5   : > { %s5196_s4 = smov [#allocation6]  }
 0xfc6   : > { %p5086_p0 = pnand %p5085_p13, %p5314_p5  ;;  %s5088_s16 = sshll.u32 %s5196_s4, 4  ;;  %s5089_s16 = int_to_ptr.vmem [resolvable:$false] %s5088_s16 }
 0xfc7   : > { %s5090_s29 = scalar_lea.vmem %s5089_s16, 1024  ;;  %p5091_p2 = scmp.lt.s32.totalorder %s6475_s13, %s5089_s16 }
 0xfc8   : > { %p5087_p1 = pneg %p5086_p0  ;;  %p5092_p4 = scmp.lt.s32.totalorder %s5090_s29, %s5084_s0 }
 0xfca   : > { %p5093_p6 = por %p5092_p4, %p5091_p2 }
 0xfcc   : > { %p5094_p7 = pnand %p5093_p6, %p5087_p1 }
 0xfce   : > { %5097 = shalt.err (!%p5094_p7)
}
 0xfcf   : > { %s5098_s21 = scalar_lea.hbm %s6472_s22, 512  ;;  %s5102_s19 = scalar_lea.hbm %s6545_s10, 2560 }
 0xfd0   : > { %p5099_p8 = scmp.ne.s32.totalorder %s6472_s22, %s5098_s21  ;;  %p5103_p12 = scmp.lt.s32.totalorder %s6472_s22, %s6545_s10 }
 0xfd1   : > { %p5104_p13 = scmp.lt.s32.totalorder %s5102_s19, %s5098_s21 }
 0xfd2   : > { %p5100_p10 = pnand %p5099_p8, %p5314_p5 }
 0xfd3   : > { %p5105_p0 = por %p5104_p13, %p5103_p12 }
 0xfd4   : > { %p5101_p11 = pneg %p5100_p10 }
 0xfd6   : > { %p5106_p1 = pnand %p5105_p0, %p5101_p11 }
 0xfd8   : > { %5109 = shalt.err (!%p5106_p1)
}
 0xfd9   : > { %s5197_s0 = smov 128   ;;  %s5198_s16 = smov 640  }
 0xfda   : > { %s5199_s29 = smov 8   ;;  %s5200_s20 = smov [#allocation10]  }
 0xfdb   : > { %4636 = dma.vmem_to_hbm [thread:$0]  (%p5314_p5), %s6475_s13, 512, %s6472_s22, %s6479_s3, %s5197_s0, %s5198_s16, %s5199_s29  }
 0xfdc   : > { %s4097_s26 = sshll.u32 %s5200_s20, 4  ;;  %s4098_s26 = int_to_ptr.vmem [resolvable:$true] %s4097_s26 }
 0xfdd   : > { %s5110_s1 = scalar_lea.vmem %s4098_s26, 64  ;;  %p5117_p7 = scmp.lt.s32.totalorder %s4098_s26, %s4098_s26 }
 0xfde   : > { %p5111_p2 = scmp.ne.s32.totalorder %s4098_s26, %s5110_s1  ;;  %p5118_p8 = scmp.lt.s32.totalorder %s5110_s1, %s5110_s1 }
 0xfe0   : > { %p5112_p4 = pnand %p5111_p2, %p5306_p3  ;;  %p5119_p10 = por %p5118_p8, %p5117_p7 }
 0xfe2   : > { %p5113_p6 = pneg %p5112_p4 }
 0xfe4   : > { %p5120_p11 = pnand %p5119_p10, %p5113_p6 }
 0xfe6   : > { %5123 = shalt.err (!%p5120_p11)
}
 0xfe7   : > { %4640 = dma.vmem_to_hbm [thread:$0]  (%p5306_p3), %s4098_s26, 64, %s6547_s12, [#allocation9]  }
 0xfe8   : > { %5159 = dma.done.wait (%p5306_p3), [#allocation9], 128  }
 0xfe9   : > { %5161 = vsyncadd (%p5306_p3), [#allocation9], 4294967168 }
 0xfea PF: > { %p4654_p5 = scmp.ge.s32.totalorder %s5188_s28, 2  ;;  %s4117_s1 = sand.u32 1, %s5168_s23  }
 0xfeb   : > { %s4118_s15 = scalar_lea.sflag [#allocation7], %s4117_s1 }
 0xfec   : > { %p4647_p12 = pnand %p4654_p5, %p5325_p9 }
 0xfee   : > { %p4648_p13 = pneg %p4647_p12 }
 0xff0   : > { %5163 = dma.done.wait (%p4648_p13), %s4118_s15, 512  }
 0xff1   : > { %5165 = vsyncadd (%p4648_p13), %s4118_s15, 4294966784  ;;  %s28_s28 = sadd.s32 1, %s5188_s28   ;;  %s6561_s23 = smov %s5172_s24 }
 0xff2   : > { %p25_p0 = scmp.ge.s32.totalorder %s28_s28, 7   ;;  %s6562_s24 = smov %s5176_s25 }
 0xff3   : > { %s6563_s25 = smov %s5323_s17  ;;  %s6564_s26 = smov %s5184_s27 }
 0xff4   : > { %s6565_s27 = smov %s6567_s30  ;;  %27 = sbr.rel (!%p25_p0) target bundleno = 11 (0xb), region = 210 }
 0xff9   :  { %4123 = vsyncpa [#allocation7], 1 }
 0xffa   :  { %4125 = vsyncpa [#allocation7 + $0x1], 1 }
 0xffb   :  { %4126 = vsyncpa [#allocation9], 1 }

</bundles_post_ra>
